<compile_context>
chip_gen: v5e
topology: v5e:2x2
jax: 0.10.0
libtpu: 0.0.40
codegen_flags: <defaults>
</compile_context>

<pallas_src>
import math
from functools import partial

import jax
import jax.numpy as jnp
from jax.experimental import pallas as pl
from jax.experimental.pallas import tpu as pltpu

D_MODEL = 32
N_HEAD = 4
D_FF = 64
N_LAYERS = 2
VOCAB = 50
EPS = 1e-5       # nn.LayerNorm default
NEG_INF = -1e9

# Order of the stacked weight arrays as passed to the kernel.
WKEYS = [
    "sa_wqkv", "sa_bqkv", "sa_wo", "sa_bo", "sa_g", "sa_b",
    "ca_wqkv", "ca_bqkv", "ca_wo", "ca_bo", "ca_g", "ca_b",
    "ff_w1", "ff_b1", "ff_w2", "ff_b2", "ff_g", "ff_b",
]


# ------------------------------- kernel -------------------------------------


def _layernorm(x, gamma, beta):
    mu = jnp.mean(x, axis=-1, keepdims=True)
    var = jnp.mean((x - mu) ** 2, axis=-1, keepdims=True)
    return (x - mu) * jax.lax.rsqrt(var + EPS) * gamma + beta


def decoder_stack_kernel(
    x_ref, mem_ref, sbias_ref, cbias_ref,
    sa_wqkv_ref, sa_bqkv_ref, sa_wo_ref, sa_bo_ref, sa_g_ref, sa_b_ref,
    ca_wqkv_ref, ca_bqkv_ref, ca_wo_ref, ca_bo_ref, ca_g_ref, ca_b_ref,
    ff_w1_ref, ff_b1_ref, ff_w2_ref, ff_b2_ref, ff_g_ref, ff_b_ref,
    out_ref, *, n_head, n_layers):
    """Full decoder stack (all layers) for one block of batch elements, fused."""
    x = x_ref[0]          # (N, D)  N = b_blk*Tq flattened (batch, pos) rows
    mem = mem_ref[0]      # (M, D)  M = b_blk*Tk flattened encoder-memory rows
    sbias = sbias_ref[0]  # (N, N)  additive self-attn bias (0 / -1e9, block-diag over batch)
    cbias = cbias_ref[0]  # (N, M)  additive cross-attn bias

    d_model = x.shape[-1]
    dh = d_model // n_head
    scale = 1.0 / math.sqrt(dh)

    def attention(xq, xkv, bias, wqkv, bqkv, wo, bo, gamma, beta, fused_qkv):
        if fused_qkv:
            # Single fused QKV matmul: (N, D) @ (D, 3D)
            qkv = jnp.dot(xq, wqkv, preferred_element_type=jnp.float32) + bqkv
            q = qkv[:, :d_model]
            k = qkv[:, d_model:2 * d_model]
            v = qkv[:, 2 * d_model:]
        else:
            # Cross attention: Q from xq, fused KV from memory.
            q = (jnp.dot(xq, wqkv[:, :d_model],
                         preferred_element_type=jnp.float32) + bqkv[:, :d_model])
            kv = (jnp.dot(xkv, wqkv[:, d_model:],
                          preferred_element_type=jnp.float32) + bqkv[:, d_model:])
            k = kv[:, :d_model]
            v = kv[:, d_model:]

        heads = []
        for h in range(n_head):  # static, unrolled
            qh = q[:, h * dh:(h + 1) * dh]
            kh = k[:, h * dh:(h + 1) * dh]
            vh = v[:, h * dh:(h + 1) * dh]
            # q . k^T via dot_general contracting last dims (no transpose).
            s = jax.lax.dot_general(qh, kh, (((1,), (1,)), ((), ())),
                                    preferred_element_type=jnp.float32)
            s = s * scale + bias
            m = jnp.max(s, axis=-1, keepdims=True)
            e = jnp.exp(s - m)
            p = e / jnp.sum(e, axis=-1, keepdims=True)   # exact divide (review concern)
            # TODO(synk): attention-probability dropout omitted (eval identity).
            heads.append(jnp.dot(p, vh, preferred_element_type=jnp.float32))

        # Lane-concat all heads, then ONE output projection matmul
        # (replaces 4 accumulating hv @ wo[h*dh:(h+1)*dh] matmuls + zero-init).
        ctx = jnp.concatenate(heads, axis=-1)                       # (N, D)
        proj = jnp.dot(ctx, wo, preferred_element_type=jnp.float32) + bo
        return _layernorm(xq + proj, gamma, beta)

    def ffn(xin, w1, b1, w2, b2, gamma, beta):
        h = jnp.dot(xin, w1, preferred_element_type=jnp.float32) + b1
        h = jnp.maximum(h, 0.0)
        # TODO(synk): hidden dropout omitted (eval identity).
        y = jnp.dot(h, w2, preferred_element_type=jnp.float32) + b2
        return _layernorm(xin + y, gamma, beta)

    # Static unrolled loop over layers; x carried in vregs the whole time.
    for l in range(n_layers):
        x = attention(x, x, sbias,
                      sa_wqkv_ref[l], sa_bqkv_ref[l], sa_wo_ref[l], sa_bo_ref[l],
                      sa_g_ref[l], sa_b_ref[l], True)
        x = attention(x, mem, cbias,
                      ca_wqkv_ref[l], ca_bqkv_ref[l], ca_wo_ref[l], ca_bo_ref[l],
                      ca_g_ref[l], ca_b_ref[l], False)
        x = ffn(x, ff_w1_ref[l], ff_b1_ref[l], ff_w2_ref[l], ff_b2_ref[l],
                ff_g_ref[l], ff_b_ref[l])

    out_ref[0] = x  # single store of the final slab per grid step
    # TODO(synk): lane-dense (.., 128)-wide output store skipped: the required
    # cross-row reshape of a (N, 32) slab has no guaranteed Mosaic lowering.


# --------------------------- pallas wrapper ---------------------------------


def _single_tensorcore_chip():
    """True on 1-TensorCore chips (v5e / v6e) -> collapse the batch grid."""
    try:
        kind = jax.devices()[0].device_kind.lower()
    except Exception:
        return False
    return any(m in kind for m in ("v5e", "v5 lite", "v5litepod", "v6e", "v6 lite"))


def _const_spec(shape):
    """Whole-array, grid-invariant, single-buffered (weights stay VMEM-resident)."""
    n = len(shape)
    return pl.BlockSpec(shape, lambda g, _n=n: (0,) * _n,
                        pipeline_mode=pl.Buffered(1))


def _block_diag_bias(mask, b_blk):
    """(B, Tq, Tk) 1/0 keep-mask -> (B//b_blk, b_blk*Tq, b_blk*Tk) additive bias.

    Off-(block)diagonal entries get NEG_INF so that flattening b_blk batch
    elements into one attention matmul cannot attend across batch elements.
    """
    B, Tq, Tk = mask.shape
    G = B // b_blk
    bias = jnp.where(mask > 0, 0.0, NEG_INF).astype(jnp.float32)
    if b_blk == 1:
        return bias                                        # (B, Tq, Tk)
    bias = bias.reshape(G, b_blk, Tq, Tk)
    same = (jnp.eye(b_blk, dtype=jnp.float32) > 0)[None, :, None, :, None]
    full = jnp.where(same, bias[:, :, :, None, :], NEG_INF)  # (G, b, Tq, b, Tk)
    return full.reshape(G, b_blk * Tq, b_blk * Tk)


def _cost_estimate(B, Tq, Tk, d, dff, n_head, n_layers, in_arrays, out_bytes):
    per_b = (
        2 * Tq * d * 3 * d              # self QKV projection
        + 2 * Tq * Tq * d * 2           # self scores + P@V (all heads)
        + 2 * Tq * d * d                # self output projection
        + 2 * Tq * d * d                # cross Q projection
        + 2 * Tk * d * 2 * d            # cross KV projection
        + 2 * Tq * Tk * d * 2           # cross scores + P@V
        + 2 * Tq * d * d                # cross output projection
        + 2 * Tq * d * dff * 2          # FFN
    )
    flops = int(B * n_layers * per_b)
    transcendentals = int(B * n_layers * n_head * (Tq * Tq + Tq * Tk))
    bytes_accessed = int(out_bytes + sum(int(a.size) * a.dtype.itemsize
                                         for a in in_arrays))
    return pl.CostEstimate(flops=flops, transcendentals=transcendentals,
                           bytes_accessed=bytes_accessed)


def decoder_forward(tokens, mask, memory, src_mask, params):
    B, Tq = tokens.shape
    Tk = memory.shape[1]

    # Embeddings: lut(x) * sqrt(d_model)   (gather stays in plain JAX)
    x = params["emb"][tokens] * math.sqrt(D_MODEL)
    # PositionalEncoding (dropout = eval identity)
    x = x + params["pe"][:Tq][None, :, :]

    # Chip-aware batch blocking:
    #   * 1-TC chips (v5e/v6e): one grid step over the whole flattened batch.
    #   * multi-TC chips (v7x/unknown): one batch element per "parallel" step.
    b_blk = B if _single_tensorcore_chip() else 1
    G = B // b_blk
    N = b_blk * Tq
    M = b_blk * Tk

    x2 = x.reshape(G, N, D_MODEL)
    mem2 = memory.reshape(G, M, D_MODEL)
    # Precompute additive attention biases once (0 keep / -1e9 masked), block-
    # diagonal over the collapsed batch, so the kernel never re-evaluates masks.
    sbias = _block_diag_bias(mask, b_blk)        # (G, N, N)
    cbias = _block_diag_bias(src_mask, b_blk)    # (G, N, M)

    w = params["layers"]
    weight_args = [w[k] for k in WKEYS]

    kernel = partial(decoder_stack_kernel, n_head=N_HEAD, n_layers=N_LAYERS)
    in_specs = [
        pl.BlockSpec((1, N, D_MODEL), lambda g: (g, 0, 0)),
        pl.BlockSpec((1, M, D_MODEL), lambda g: (g, 0, 0)),
        pl.BlockSpec((1, N, N), lambda g: (g, 0, 0)),
        pl.BlockSpec((1, N, M), lambda g: (g, 0, 0)),
    ] + [_const_spec(a.shape) for a in weight_args]

    cost = _cost_estimate(B, Tq, Tk, D_MODEL, D_FF, N_HEAD, N_LAYERS,
                          [x2, mem2, sbias, cbias] + weight_args,
                          out_bytes=B * Tq * D_MODEL * 4)

    out = pl.pallas_call(
        kernel,
        out_shape=jax.ShapeDtypeStruct((G, N, D_MODEL), jnp.float32),
        grid=(G,),
        in_specs=in_specs,
        out_specs=pl.BlockSpec((1, N, D_MODEL), lambda g: (g, 0, 0)),
        compiler_params=pltpu.CompilerParams(
            dimension_semantics=("parallel",) if G > 1 else ("arbitrary",)),
        cost_estimate=cost,
    )(x2, mem2, sbias, cbias, *weight_args)
    return out.reshape(B, Tq, D_MODEL)


# --------------------------- parameter setup --------------------------------


def _linear_params(key, d_in, d_out):
    kw, _ = jax.random.split(key)
    w = jax.random.normal(kw, (d_in, d_out), jnp.float32) * 0.02
    b = jnp.zeros((1, d_out), jnp.float32)
    return w, b


def _mha_params(key, d_model):
    ks = jax.random.split(key, 4)
    wq, bq = _linear_params(ks[0], d_model, d_model)
    wk, bk = _linear_params(ks[1], d_model, d_model)
    wv, bv = _linear_params(ks[2], d_model, d_model)
    wo, bo = _linear_params(ks[3], d_model, d_model)
    gamma = jnp.ones((1, d_model), jnp.float32)
    beta = jnp.zeros((1, d_model), jnp.float32)
    return (wq, bq, wk, bk, wv, bv, wo, bo, gamma, beta)


def _ffn_params(key, d_model, d_ff):
    k1, k2 = jax.random.split(key)
    w1, b1 = _linear_params(k1, d_model, d_ff)
    w2, b2 = _linear_params(k2, d_ff, d_model)
    gamma = jnp.ones((1, d_model), jnp.float32)
    beta = jnp.zeros((1, d_model), jnp.float32)
    return (w1, b1, w2, b2, gamma, beta)


def _sinusoidal_pe(max_len, d_model):
    pos = jnp.arange(max_len, dtype=jnp.float32)[:, None]
    div = jnp.exp(jnp.arange(0, d_model, 2, dtype=jnp.float32)
                  * (-math.log(10000.0) / d_model))
    pe = jnp.zeros((max_len, d_model), jnp.float32)
    pe = pe.at[:, 0::2].set(jnp.sin(pos * div))
    pe = pe.at[:, 1::2].set(jnp.cos(pos * div))
    return pe


def init_decoder_params(key, vocab_size, d_model, n_head, d_ff, n_layers):
    keys = jax.random.split(key, n_layers + 1)
    emb = jax.random.normal(keys[0], (vocab_size, d_model), jnp.float32) * 0.02

    per_layer = []
    for i in range(n_layers):
        k_self, k_cross, k_ffn = jax.random.split(keys[i + 1], 3)
        per_layer.append((_mha_params(k_self, d_model),
                          _mha_params(k_cross, d_model),
                          _ffn_params(k_ffn, d_model, d_ff)))

    def cat_qkv(p):
        wq, bq, wk, bk, wv, bv, wo, bo, g, be = p
        return (jnp.concatenate([wq, wk, wv], axis=1),
                jnp.concatenate([bq, bk, bv], axis=1), wo, bo, g, be)

    sa = [cat_qkv(p[0]) for p in per_layer]
    ca = [cat_qkv(p[1]) for p in per_layer]
    ff = [p[2] for p in per_layer]

    def stack_i(lst, i):
        return jnp.stack([t[i] for t in lst], axis=0)

    stacked = {
        "sa_wqkv": stack_i(sa, 0), "sa_bqkv": stack_i(sa, 1), "sa_wo": stack_i(sa, 2),
        "sa_bo": stack_i(sa, 3), "sa_g": stack_i(sa, 4), "sa_b": stack_i(sa, 5),
        "ca_wqkv": stack_i(ca, 0), "ca_bqkv": stack_i(ca, 1), "ca_wo": stack_i(ca, 2),
        "ca_bo": stack_i(ca, 3), "ca_g": stack_i(ca, 4), "ca_b": stack_i(ca, 5),
        "ff_w1": stack_i(ff, 0), "ff_b1": stack_i(ff, 1), "ff_w2": stack_i(ff, 2),
        "ff_b2": stack_i(ff, 3), "ff_g": stack_i(ff, 4), "ff_b": stack_i(ff, 5),
    }
    return {"emb": emb, "pe": _sinusoidal_pe(512, d_model), "layers": stacked}


# -------------------------------- main --------------------------------------

if __name__ == "__main__":
    key = jax.random.PRNGKey(0)
    k_tok, k_mem, k_par = jax.random.split(key, 3)

    B, T_TGT, T_SRC = 2, 8, 8
    tokens = jax.random.randint(k_tok, (B, T_TGT), 0, VOCAB, dtype=jnp.int32)
    memory = jax.random.normal(k_mem, (B, T_SRC, D_MODEL), jnp.float32)

    # causal self-attention mask [B, Tq, Tq]; full-visibility source mask [B, Tq, Ts]
    mask = jnp.broadcast_to(
        jnp.tril(jnp.ones((T_TGT, T_TGT), jnp.float32)), (B, T_TGT, T_TGT))
    src_mask = jnp.ones((B, T_TGT, T_SRC), jnp.float32)

    params = init_decoder_params(k_par, VOCAB, D_MODEL, N_HEAD, D_FF, N_LAYERS)

    fwd = jax.jit(decoder_forward)
    out = fwd(tokens, mask, memory, src_mask, params)
    out = jax.block_until_ready(out)
    assert out.shape == (B, T_TGT, D_MODEL) and out.dtype == jnp.float32
    assert bool(jnp.all(jnp.isfinite(out)))
    print("KERNEL_OK")
</pallas_src>

<mosaic_0001>
module attributes {stable_mosaic.version = 11 : i64} {
  func.func @decoder_stack_kernel(%arg0: i32, %arg1: memref<1x8x32xf32, #tpu.memory_space<vmem>>, %arg2: memref<1x8x32xf32, #tpu.memory_space<vmem>>, %arg3: memref<1x8x8xf32, #tpu.memory_space<vmem>>, %arg4: memref<1x8x8xf32, #tpu.memory_space<vmem>>, %arg5: memref<2x32x96xf32, #tpu.memory_space<vmem>>, %arg6: memref<2x1x96xf32, #tpu.memory_space<vmem>>, %arg7: memref<2x32x32xf32, #tpu.memory_space<vmem>>, %arg8: memref<2x1x32xf32, #tpu.memory_space<vmem>>, %arg9: memref<2x1x32xf32, #tpu.memory_space<vmem>>, %arg10: memref<2x1x32xf32, #tpu.memory_space<vmem>>, %arg11: memref<2x32x96xf32, #tpu.memory_space<vmem>>, %arg12: memref<2x1x96xf32, #tpu.memory_space<vmem>>, %arg13: memref<2x32x32xf32, #tpu.memory_space<vmem>>, %arg14: memref<2x1x32xf32, #tpu.memory_space<vmem>>, %arg15: memref<2x1x32xf32, #tpu.memory_space<vmem>>, %arg16: memref<2x1x32xf32, #tpu.memory_space<vmem>>, %arg17: memref<2x32x64xf32, #tpu.memory_space<vmem>>, %arg18: memref<2x1x64xf32, #tpu.memory_space<vmem>>, %arg19: memref<2x64x32xf32, #tpu.memory_space<vmem>>, %arg20: memref<2x1x32xf32, #tpu.memory_space<vmem>>, %arg21: memref<2x1x32xf32, #tpu.memory_space<vmem>>, %arg22: memref<2x1x32xf32, #tpu.memory_space<vmem>>, %arg23: memref<1x8x32xf32, #tpu.memory_space<vmem>>) attributes {dimension_semantics = [#tpu.dimension_semantics<parallel>], iteration_bounds = array<i64: 2>, scalar_prefetch = 0 : i64, scratch_operands = 0 : i64, tpu.core_type = #tpu.core_type<tc>, window_params = [{transform_indices = @transform_0, window_bounds = array<i64: 1, 8, 32>}, {transform_indices = @transform_1, window_bounds = array<i64: 1, 8, 32>}, {transform_indices = @transform_2, window_bounds = array<i64: 1, 8, 8>}, {transform_indices = @transform_3, window_bounds = array<i64: 1, 8, 8>}, {pipeline_mode = #tpu.pipeline_mode<synchronous>, transform_indices = @transform_4, window_bounds = array<i64: 2, 32, 96>}, {pipeline_mode = #tpu.pipeline_mode<synchronous>, transform_indices = @transform_5, window_bounds = array<i64: 2, 1, 96>}, {pipeline_mode = #tpu.pipeline_mode<synchronous>, transform_indices = @transform_6, window_bounds = array<i64: 2, 32, 32>}, {pipeline_mode = #tpu.pipeline_mode<synchronous>, transform_indices = @transform_7, window_bounds = array<i64: 2, 1, 32>}, {pipeline_mode = #tpu.pipeline_mode<synchronous>, transform_indices = @transform_8, window_bounds = array<i64: 2, 1, 32>}, {pipeline_mode = #tpu.pipeline_mode<synchronous>, transform_indices = @transform_9, window_bounds = array<i64: 2, 1, 32>}, {pipeline_mode = #tpu.pipeline_mode<synchronous>, transform_indices = @transform_10, window_bounds = array<i64: 2, 32, 96>}, {pipeline_mode = #tpu.pipeline_mode<synchronous>, transform_indices = @transform_11, window_bounds = array<i64: 2, 1, 96>}, {pipeline_mode = #tpu.pipeline_mode<synchronous>, transform_indices = @transform_12, window_bounds = array<i64: 2, 32, 32>}, {pipeline_mode = #tpu.pipeline_mode<synchronous>, transform_indices = @transform_13, window_bounds = array<i64: 2, 1, 32>}, {pipeline_mode = #tpu.pipeline_mode<synchronous>, transform_indices = @transform_14, window_bounds = array<i64: 2, 1, 32>}, {pipeline_mode = #tpu.pipeline_mode<synchronous>, transform_indices = @transform_15, window_bounds = array<i64: 2, 1, 32>}, {pipeline_mode = #tpu.pipeline_mode<synchronous>, transform_indices = @transform_16, window_bounds = array<i64: 2, 32, 64>}, {pipeline_mode = #tpu.pipeline_mode<synchronous>, transform_indices = @transform_17, window_bounds = array<i64: 2, 1, 64>}, {pipeline_mode = #tpu.pipeline_mode<synchronous>, transform_indices = @transform_18, window_bounds = array<i64: 2, 64, 32>}, {pipeline_mode = #tpu.pipeline_mode<synchronous>, transform_indices = @transform_19, window_bounds = array<i64: 2, 1, 32>}, {pipeline_mode = #tpu.pipeline_mode<synchronous>, transform_indices = @transform_20, window_bounds = array<i64: 2, 1, 32>}, {pipeline_mode = #tpu.pipeline_mode<synchronous>, transform_indices = @transform_21, window_bounds = array<i64: 2, 1, 32>}, {transform_indices = @transform_22, window_bounds = array<i64: 1, 8, 32>}]} {
    %c0 = arith.constant 0 : index
    %c0_0 = arith.constant 0 : index
    %c0_1 = arith.constant 0 : index
    %0 = vector.load %arg1[%c0, %c0_0, %c0_1] : memref<1x8x32xf32, #tpu.memory_space<vmem>>, vector<1x8x32xf32>
    %1 = vector.shape_cast %0 : vector<1x8x32xf32> to vector<8x32xf32>
    %c0_2 = arith.constant 0 : index
    %c0_3 = arith.constant 0 : index
    %c0_4 = arith.constant 0 : index
    %2 = vector.load %arg2[%c0_2, %c0_3, %c0_4] : memref<1x8x32xf32, #tpu.memory_space<vmem>>, vector<1x8x32xf32>
    %3 = vector.shape_cast %2 : vector<1x8x32xf32> to vector<8x32xf32>
    %c0_5 = arith.constant 0 : index
    %c0_6 = arith.constant 0 : index
    %c0_7 = arith.constant 0 : index
    %4 = vector.load %arg3[%c0_5, %c0_6, %c0_7] : memref<1x8x8xf32, #tpu.memory_space<vmem>>, vector<1x8x8xf32>
    %5 = vector.shape_cast %4 : vector<1x8x8xf32> to vector<8x8xf32>
    %c0_8 = arith.constant 0 : index
    %c0_9 = arith.constant 0 : index
    %c0_10 = arith.constant 0 : index
    %6 = vector.load %arg4[%c0_8, %c0_9, %c0_10] : memref<1x8x8xf32, #tpu.memory_space<vmem>>, vector<1x8x8xf32>
    %7 = vector.shape_cast %6 : vector<1x8x8xf32> to vector<8x8xf32>
    %c0_11 = arith.constant 0 : index
    %c0_12 = arith.constant 0 : index
    %c0_13 = arith.constant 0 : index
    %8 = vector.load %arg5[%c0_11, %c0_12, %c0_13] : memref<2x32x96xf32, #tpu.memory_space<vmem>>, vector<1x32x96xf32>
    %9 = vector.shape_cast %8 : vector<1x32x96xf32> to vector<32x96xf32>
    %c0_14 = arith.constant 0 : index
    %c0_15 = arith.constant 0 : index
    %c0_16 = arith.constant 0 : index
    %10 = vector.load %arg6[%c0_14, %c0_15, %c0_16] : memref<2x1x96xf32, #tpu.memory_space<vmem>>, vector<1x1x96xf32>
    %11 = vector.shape_cast %10 : vector<1x1x96xf32> to vector<1x96xf32>
    %c0_17 = arith.constant 0 : index
    %c0_18 = arith.constant 0 : index
    %c0_19 = arith.constant 0 : index
    %12 = vector.load %arg7[%c0_17, %c0_18, %c0_19] : memref<2x32x32xf32, #tpu.memory_space<vmem>>, vector<1x32x32xf32>
    %13 = vector.shape_cast %12 : vector<1x32x32xf32> to vector<32x32xf32>
    %c0_20 = arith.constant 0 : index
    %c0_21 = arith.constant 0 : index
    %c0_22 = arith.constant 0 : index
    %14 = vector.load %arg8[%c0_20, %c0_21, %c0_22] : memref<2x1x32xf32, #tpu.memory_space<vmem>>, vector<1x1x32xf32>
    %15 = vector.shape_cast %14 : vector<1x1x32xf32> to vector<1x32xf32>
    %c0_23 = arith.constant 0 : index
    %c0_24 = arith.constant 0 : index
    %c0_25 = arith.constant 0 : index
    %16 = vector.load %arg9[%c0_23, %c0_24, %c0_25] : memref<2x1x32xf32, #tpu.memory_space<vmem>>, vector<1x1x32xf32>
    %17 = vector.shape_cast %16 : vector<1x1x32xf32> to vector<1x32xf32>
    %c0_26 = arith.constant 0 : index
    %c0_27 = arith.constant 0 : index
    %c0_28 = arith.constant 0 : index
    %18 = vector.load %arg10[%c0_26, %c0_27, %c0_28] : memref<2x1x32xf32, #tpu.memory_space<vmem>>, vector<1x1x32xf32>
    %19 = vector.shape_cast %18 : vector<1x1x32xf32> to vector<1x32xf32>
    %cst = arith.constant dense<0.000000e+00> : vector<8x96xf32>
    %20 = tpu.matmul %1, %9, %cst {dimension_numbers = #tpu.dot_dimension_numbers<[1], [0], [0], [1], [0, 0, 1, 1], [], []>} : vector<8x32xf32>, vector<32x96xf32>, vector<8x96xf32> -> vector<8x96xf32>
    %21 = vector.broadcast %11 : vector<1x96xf32> to vector<8x96xf32>
    %22 = arith.addf %20, %21 : vector<8x96xf32>
    %23 = vector.extract_strided_slice %22 {offsets = [0, 0], sizes = [8, 32], strides = [1, 1]} : vector<8x96xf32> to vector<8x32xf32>
    %24 = vector.extract_strided_slice %22 {offsets = [0, 32], sizes = [8, 32], strides = [1, 1]} : vector<8x96xf32> to vector<8x32xf32>
    %25 = vector.extract_strided_slice %22 {offsets = [0, 64], sizes = [8, 32], strides = [1, 1]} : vector<8x96xf32> to vector<8x32xf32>
    %26 = vector.extract_strided_slice %23 {offsets = [0, 0], sizes = [8, 8], strides = [1, 1]} : vector<8x32xf32> to vector<8x8xf32>
    %27 = vector.extract_strided_slice %24 {offsets = [0, 0], sizes = [8, 8], strides = [1, 1]} : vector<8x32xf32> to vector<8x8xf32>
    %28 = vector.extract_strided_slice %25 {offsets = [0, 0], sizes = [8, 8], strides = [1, 1]} : vector<8x32xf32> to vector<8x8xf32>
    %cst_29 = arith.constant dense<0.000000e+00> : vector<8x8xf32>
    %29 = tpu.matmul %26, %27, %cst_29 {dimension_numbers = #tpu.dot_dimension_numbers<[1], [1], [0], [0], [0, 0, 1, 0], [], []>} : vector<8x8xf32>, vector<8x8xf32>, vector<8x8xf32> -> vector<8x8xf32>
    %cst_30 = arith.constant 0.353553385 : f32
    %30 = vector.broadcast %cst_30 : f32 to vector<8x8xf32>
    %31 = arith.mulf %29, %30 : vector<8x8xf32>
    %32 = arith.addf %31, %5 : vector<8x8xf32>
    %cst_31 = arith.constant dense<0xFF800000> : vector<8xf32>
    %33 = vector.multi_reduction <maximumf>, %32, %cst_31 [1] : vector<8x8xf32> to vector<8xf32>
    %34 = vector.shape_cast %33 : vector<8xf32> to vector<8x1xf32>
    %35 = vector.broadcast %34 : vector<8x1xf32> to vector<8x8xf32>
    %36 = arith.subf %32, %35 : vector<8x8xf32>
    %37 = math.exp %36 : vector<8x8xf32>
    %cst_32 = arith.constant dense<0.000000e+00> : vector<8xf32>
    %38 = vector.multi_reduction <add>, %37, %cst_32 [1] : vector<8x8xf32> to vector<8xf32>
    %39 = vector.shape_cast %38 : vector<8xf32> to vector<8x1xf32>
    %40 = vector.broadcast %39 : vector<8x1xf32> to vector<8x8xf32>
    %41 = arith.divf %37, %40 : vector<8x8xf32>
    %cst_33 = arith.constant dense<0.000000e+00> : vector<8x8xf32>
    %42 = tpu.matmul %41, %28, %cst_33 {dimension_numbers = #tpu.dot_dimension_numbers<[1], [0], [0], [1], [0, 0, 1, 1], [], []>} : vector<8x8xf32>, vector<8x8xf32>, vector<8x8xf32> -> vector<8x8xf32>
    %43 = vector.extract_strided_slice %23 {offsets = [0, 8], sizes = [8, 8], strides = [1, 1]} : vector<8x32xf32> to vector<8x8xf32>
    %44 = vector.extract_strided_slice %24 {offsets = [0, 8], sizes = [8, 8], strides = [1, 1]} : vector<8x32xf32> to vector<8x8xf32>
    %45 = vector.extract_strided_slice %25 {offsets = [0, 8], sizes = [8, 8], strides = [1, 1]} : vector<8x32xf32> to vector<8x8xf32>
    %cst_34 = arith.constant dense<0.000000e+00> : vector<8x8xf32>
    %46 = tpu.matmul %43, %44, %cst_34 {dimension_numbers = #tpu.dot_dimension_numbers<[1], [1], [0], [0], [0, 0, 1, 0], [], []>} : vector<8x8xf32>, vector<8x8xf32>, vector<8x8xf32> -> vector<8x8xf32>
    %cst_35 = arith.constant 0.353553385 : f32
    %47 = vector.broadcast %cst_35 : f32 to vector<8x8xf32>
    %48 = arith.mulf %46, %47 : vector<8x8xf32>
    %49 = arith.addf %48, %5 : vector<8x8xf32>
    %cst_36 = arith.constant dense<0xFF800000> : vector<8xf32>
    %50 = vector.multi_reduction <maximumf>, %49, %cst_36 [1] : vector<8x8xf32> to vector<8xf32>
    %51 = vector.shape_cast %50 : vector<8xf32> to vector<8x1xf32>
    %52 = vector.broadcast %51 : vector<8x1xf32> to vector<8x8xf32>
    %53 = arith.subf %49, %52 : vector<8x8xf32>
    %54 = math.exp %53 : vector<8x8xf32>
    %cst_37 = arith.constant dense<0.000000e+00> : vector<8xf32>
    %55 = vector.multi_reduction <add>, %54, %cst_37 [1] : vector<8x8xf32> to vector<8xf32>
    %56 = vector.shape_cast %55 : vector<8xf32> to vector<8x1xf32>
    %57 = vector.broadcast %56 : vector<8x1xf32> to vector<8x8xf32>
    %58 = arith.divf %54, %57 : vector<8x8xf32>
    %cst_38 = arith.constant dense<0.000000e+00> : vector<8x8xf32>
    %59 = tpu.matmul %58, %45, %cst_38 {dimension_numbers = #tpu.dot_dimension_numbers<[1], [0], [0], [1], [0, 0, 1, 1], [], []>} : vector<8x8xf32>, vector<8x8xf32>, vector<8x8xf32> -> vector<8x8xf32>
    %60 = vector.extract_strided_slice %23 {offsets = [0, 16], sizes = [8, 8], strides = [1, 1]} : vector<8x32xf32> to vector<8x8xf32>
    %61 = vector.extract_strided_slice %24 {offsets = [0, 16], sizes = [8, 8], strides = [1, 1]} : vector<8x32xf32> to vector<8x8xf32>
    %62 = vector.extract_strided_slice %25 {offsets = [0, 16], sizes = [8, 8], strides = [1, 1]} : vector<8x32xf32> to vector<8x8xf32>
    %cst_39 = arith.constant dense<0.000000e+00> : vector<8x8xf32>
    %63 = tpu.matmul %60, %61, %cst_39 {dimension_numbers = #tpu.dot_dimension_numbers<[1], [1], [0], [0], [0, 0, 1, 0], [], []>} : vector<8x8xf32>, vector<8x8xf32>, vector<8x8xf32> -> vector<8x8xf32>
    %cst_40 = arith.constant 0.353553385 : f32
    %64 = vector.broadcast %cst_40 : f32 to vector<8x8xf32>
    %65 = arith.mulf %63, %64 : vector<8x8xf32>
    %66 = arith.addf %65, %5 : vector<8x8xf32>
    %cst_41 = arith.constant dense<0xFF800000> : vector<8xf32>
    %67 = vector.multi_reduction <maximumf>, %66, %cst_41 [1] : vector<8x8xf32> to vector<8xf32>
    %68 = vector.shape_cast %67 : vector<8xf32> to vector<8x1xf32>
    %69 = vector.broadcast %68 : vector<8x1xf32> to vector<8x8xf32>
    %70 = arith.subf %66, %69 : vector<8x8xf32>
    %71 = math.exp %70 : vector<8x8xf32>
    %cst_42 = arith.constant dense<0.000000e+00> : vector<8xf32>
    %72 = vector.multi_reduction <add>, %71, %cst_42 [1] : vector<8x8xf32> to vector<8xf32>
    %73 = vector.shape_cast %72 : vector<8xf32> to vector<8x1xf32>
    %74 = vector.broadcast %73 : vector<8x1xf32> to vector<8x8xf32>
    %75 = arith.divf %71, %74 : vector<8x8xf32>
    %cst_43 = arith.constant dense<0.000000e+00> : vector<8x8xf32>
    %76 = tpu.matmul %75, %62, %cst_43 {dimension_numbers = #tpu.dot_dimension_numbers<[1], [0], [0], [1], [0, 0, 1, 1], [], []>} : vector<8x8xf32>, vector<8x8xf32>, vector<8x8xf32> -> vector<8x8xf32>
    %77 = vector.extract_strided_slice %23 {offsets = [0, 24], sizes = [8, 8], strides = [1, 1]} : vector<8x32xf32> to vector<8x8xf32>
    %78 = vector.extract_strided_slice %24 {offsets = [0, 24], sizes = [8, 8], strides = [1, 1]} : vector<8x32xf32> to vector<8x8xf32>
    %79 = vector.extract_strided_slice %25 {offsets = [0, 24], sizes = [8, 8], strides = [1, 1]} : vector<8x32xf32> to vector<8x8xf32>
    %cst_44 = arith.constant dense<0.000000e+00> : vector<8x8xf32>
    %80 = tpu.matmul %77, %78, %cst_44 {dimension_numbers = #tpu.dot_dimension_numbers<[1], [1], [0], [0], [0, 0, 1, 0], [], []>} : vector<8x8xf32>, vector<8x8xf32>, vector<8x8xf32> -> vector<8x8xf32>
    %cst_45 = arith.constant 0.353553385 : f32
    %81 = vector.broadcast %cst_45 : f32 to vector<8x8xf32>
    %82 = arith.mulf %80, %81 : vector<8x8xf32>
    %83 = arith.addf %82, %5 : vector<8x8xf32>
    %cst_46 = arith.constant dense<0xFF800000> : vector<8xf32>
    %84 = vector.multi_reduction <maximumf>, %83, %cst_46 [1] : vector<8x8xf32> to vector<8xf32>
    %85 = vector.shape_cast %84 : vector<8xf32> to vector<8x1xf32>
    %86 = vector.broadcast %85 : vector<8x1xf32> to vector<8x8xf32>
    %87 = arith.subf %83, %86 : vector<8x8xf32>
    %88 = math.exp %87 : vector<8x8xf32>
    %cst_47 = arith.constant dense<0.000000e+00> : vector<8xf32>
    %89 = vector.multi_reduction <add>, %88, %cst_47 [1] : vector<8x8xf32> to vector<8xf32>
    %90 = vector.shape_cast %89 : vector<8xf32> to vector<8x1xf32>
    %91 = vector.broadcast %90 : vector<8x1xf32> to vector<8x8xf32>
    %92 = arith.divf %88, %91 : vector<8x8xf32>
    %cst_48 = arith.constant dense<0.000000e+00> : vector<8x8xf32>
    %93 = tpu.matmul %92, %79, %cst_48 {dimension_numbers = #tpu.dot_dimension_numbers<[1], [0], [0], [1], [0, 0, 1, 1], [], []>} : vector<8x8xf32>, vector<8x8xf32>, vector<8x8xf32> -> vector<8x8xf32>
    %94 = tpu.concatenate %42, %59, %76, %93 in 1 : vector<8x8xf32>, vector<8x8xf32>, vector<8x8xf32>, vector<8x8xf32> -> vector<8x32xf32>
    %cst_49 = arith.constant dense<0.000000e+00> : vector<8x32xf32>
    %95 = tpu.matmul %94, %13, %cst_49 {dimension_numbers = #tpu.dot_dimension_numbers<[1], [0], [0], [1], [0, 0, 1, 1], [], []>} : vector<8x32xf32>, vector<32x32xf32>, vector<8x32xf32> -> vector<8x32xf32>
    %96 = vector.broadcast %15 : vector<1x32xf32> to vector<8x32xf32>
    %97 = arith.addf %95, %96 : vector<8x32xf32>
    %98 = arith.addf %1, %97 : vector<8x32xf32>
    %cst_50 = arith.constant dense<0.000000e+00> : vector<8xf32>
    %99 = vector.multi_reduction <add>, %98, %cst_50 [1] : vector<8x32xf32> to vector<8xf32>
    %100 = vector.shape_cast %99 : vector<8xf32> to vector<8x1xf32>
    %cst_51 = arith.constant 3.200000e+01 : f32
    %101 = vector.broadcast %cst_51 : f32 to vector<8x1xf32>
    %102 = arith.divf %100, %101 : vector<8x1xf32>
    %103 = vector.broadcast %102 : vector<8x1xf32> to vector<8x32xf32>
    %104 = arith.subf %98, %103 : vector<8x32xf32>
    %105 = arith.mulf %104, %104 : vector<8x32xf32>
    %cst_52 = arith.constant dense<0.000000e+00> : vector<8xf32>
    %106 = vector.multi_reduction <add>, %105, %cst_52 [1] : vector<8x32xf32> to vector<8xf32>
    %107 = vector.shape_cast %106 : vector<8xf32> to vector<8x1xf32>
    %cst_53 = arith.constant 3.200000e+01 : f32
    %108 = vector.broadcast %cst_53 : f32 to vector<8x1xf32>
    %109 = arith.divf %107, %108 : vector<8x1xf32>
    %110 = vector.broadcast %102 : vector<8x1xf32> to vector<8x32xf32>
    %111 = arith.subf %98, %110 : vector<8x32xf32>
    %cst_54 = arith.constant 9.99999974E-6 : f32
    %112 = vector.broadcast %cst_54 : f32 to vector<8x1xf32>
    %113 = arith.addf %109, %112 : vector<8x1xf32>
    %114 = math.rsqrt %113 : vector<8x1xf32>
    %115 = vector.broadcast %114 : vector<8x1xf32> to vector<8x32xf32>
    %116 = arith.mulf %111, %115 : vector<8x32xf32>
    %117 = vector.broadcast %17 : vector<1x32xf32> to vector<8x32xf32>
    %118 = arith.mulf %116, %117 : vector<8x32xf32>
    %119 = vector.broadcast %19 : vector<1x32xf32> to vector<8x32xf32>
    %120 = arith.addf %118, %119 : vector<8x32xf32>
    %c0_55 = arith.constant 0 : index
    %c0_56 = arith.constant 0 : index
    %c0_57 = arith.constant 0 : index
    %121 = vector.load %arg11[%c0_55, %c0_56, %c0_57] : memref<2x32x96xf32, #tpu.memory_space<vmem>>, vector<1x32x96xf32>
    %122 = vector.shape_cast %121 : vector<1x32x96xf32> to vector<32x96xf32>
    %c0_58 = arith.constant 0 : index
    %c0_59 = arith.constant 0 : index
    %c0_60 = arith.constant 0 : index
    %123 = vector.load %arg12[%c0_58, %c0_59, %c0_60] : memref<2x1x96xf32, #tpu.memory_space<vmem>>, vector<1x1x96xf32>
    %124 = vector.shape_cast %123 : vector<1x1x96xf32> to vector<1x96xf32>
    %c0_61 = arith.constant 0 : index
    %c0_62 = arith.constant 0 : index
    %c0_63 = arith.constant 0 : index
    %125 = vector.load %arg13[%c0_61, %c0_62, %c0_63] : memref<2x32x32xf32, #tpu.memory_space<vmem>>, vector<1x32x32xf32>
    %126 = vector.shape_cast %125 : vector<1x32x32xf32> to vector<32x32xf32>
    %c0_64 = arith.constant 0 : index
    %c0_65 = arith.constant 0 : index
    %c0_66 = arith.constant 0 : index
    %127 = vector.load %arg14[%c0_64, %c0_65, %c0_66] : memref<2x1x32xf32, #tpu.memory_space<vmem>>, vector<1x1x32xf32>
    %128 = vector.shape_cast %127 : vector<1x1x32xf32> to vector<1x32xf32>
    %c0_67 = arith.constant 0 : index
    %c0_68 = arith.constant 0 : index
    %c0_69 = arith.constant 0 : index
    %129 = vector.load %arg15[%c0_67, %c0_68, %c0_69] : memref<2x1x32xf32, #tpu.memory_space<vmem>>, vector<1x1x32xf32>
    %130 = vector.shape_cast %129 : vector<1x1x32xf32> to vector<1x32xf32>
    %c0_70 = arith.constant 0 : index
    %c0_71 = arith.constant 0 : index
    %c0_72 = arith.constant 0 : index
    %131 = vector.load %arg16[%c0_70, %c0_71, %c0_72] : memref<2x1x32xf32, #tpu.memory_space<vmem>>, vector<1x1x32xf32>
    %132 = vector.shape_cast %131 : vector<1x1x32xf32> to vector<1x32xf32>
    %133 = vector.extract_strided_slice %122 {offsets = [0, 0], sizes = [32, 32], strides = [1, 1]} : vector<32x96xf32> to vector<32x32xf32>
    %cst_73 = arith.constant dense<0.000000e+00> : vector<8x32xf32>
    %134 = tpu.matmul %120, %133, %cst_73 {dimension_numbers = #tpu.dot_dimension_numbers<[1], [0], [0], [1], [0, 0, 1, 1], [], []>} : vector<8x32xf32>, vector<32x32xf32>, vector<8x32xf32> -> vector<8x32xf32>
    %135 = vector.extract_strided_slice %124 {offsets = [0, 0], sizes = [1, 32], strides = [1, 1]} : vector<1x96xf32> to vector<1x32xf32>
    %136 = vector.broadcast %135 : vector<1x32xf32> to vector<8x32xf32>
    %137 = arith.addf %134, %136 : vector<8x32xf32>
    %138 = vector.extract_strided_slice %122 {offsets = [0, 32], sizes = [32, 64], strides = [1, 1]} : vector<32x96xf32> to vector<32x64xf32>
    %cst_74 = arith.constant dense<0.000000e+00> : vector<8x64xf32>
    %139 = tpu.matmul %3, %138, %cst_74 {dimension_numbers = #tpu.dot_dimension_numbers<[1], [0], [0], [1], [0, 0, 1, 1], [], []>} : vector<8x32xf32>, vector<32x64xf32>, vector<8x64xf32> -> vector<8x64xf32>
    %140 = vector.extract_strided_slice %124 {offsets = [0, 32], sizes = [1, 64], strides = [1, 1]} : vector<1x96xf32> to vector<1x64xf32>
    %141 = vector.broadcast %140 : vector<1x64xf32> to vector<8x64xf32>
    %142 = arith.addf %139, %141 : vector<8x64xf32>
    %143 = vector.extract_strided_slice %142 {offsets = [0, 0], sizes = [8, 32], strides = [1, 1]} : vector<8x64xf32> to vector<8x32xf32>
    %144 = vector.extract_strided_slice %142 {offsets = [0, 32], sizes = [8, 32], strides = [1, 1]} : vector<8x64xf32> to vector<8x32xf32>
    %145 = vector.extract_strided_slice %137 {offsets = [0, 0], sizes = [8, 8], strides = [1, 1]} : vector<8x32xf32> to vector<8x8xf32>
    %146 = vector.extract_strided_slice %143 {offsets = [0, 0], sizes = [8, 8], strides = [1, 1]} : vector<8x32xf32> to vector<8x8xf32>
    %147 = vector.extract_strided_slice %144 {offsets = [0, 0], sizes = [8, 8], strides = [1, 1]} : vector<8x32xf32> to vector<8x8xf32>
    %cst_75 = arith.constant dense<0.000000e+00> : vector<8x8xf32>
    %148 = tpu.matmul %145, %146, %cst_75 {dimension_numbers = #tpu.dot_dimension_numbers<[1], [1], [0], [0], [0, 0, 1, 0], [], []>} : vector<8x8xf32>, vector<8x8xf32>, vector<8x8xf32> -> vector<8x8xf32>
    %cst_76 = arith.constant 0.353553385 : f32
    %149 = vector.broadcast %cst_76 : f32 to vector<8x8xf32>
    %150 = arith.mulf %148, %149 : vector<8x8xf32>
    %151 = arith.addf %150, %7 : vector<8x8xf32>
    %cst_77 = arith.constant dense<0xFF800000> : vector<8xf32>
    %152 = vector.multi_reduction <maximumf>, %151, %cst_77 [1] : vector<8x8xf32> to vector<8xf32>
    %153 = vector.shape_cast %152 : vector<8xf32> to vector<8x1xf32>
    %154 = vector.broadcast %153 : vector<8x1xf32> to vector<8x8xf32>
    %155 = arith.subf %151, %154 : vector<8x8xf32>
    %156 = math.exp %155 : vector<8x8xf32>
    %cst_78 = arith.constant dense<0.000000e+00> : vector<8xf32>
    %157 = vector.multi_reduction <add>, %156, %cst_78 [1] : vector<8x8xf32> to vector<8xf32>
    %158 = vector.shape_cast %157 : vector<8xf32> to vector<8x1xf32>
    %159 = vector.broadcast %158 : vector<8x1xf32> to vector<8x8xf32>
    %160 = arith.divf %156, %159 : vector<8x8xf32>
    %cst_79 = arith.constant dense<0.000000e+00> : vector<8x8xf32>
    %161 = tpu.matmul %160, %147, %cst_79 {dimension_numbers = #tpu.dot_dimension_numbers<[1], [0], [0], [1], [0, 0, 1, 1], [], []>} : vector<8x8xf32>, vector<8x8xf32>, vector<8x8xf32> -> vector<8x8xf32>
    %162 = vector.extract_strided_slice %137 {offsets = [0, 8], sizes = [8, 8], strides = [1, 1]} : vector<8x32xf32> to vector<8x8xf32>
    %163 = vector.extract_strided_slice %143 {offsets = [0, 8], sizes = [8, 8], strides = [1, 1]} : vector<8x32xf32> to vector<8x8xf32>
    %164 = vector.extract_strided_slice %144 {offsets = [0, 8], sizes = [8, 8], strides = [1, 1]} : vector<8x32xf32> to vector<8x8xf32>
    %cst_80 = arith.constant dense<0.000000e+00> : vector<8x8xf32>
    %165 = tpu.matmul %162, %163, %cst_80 {dimension_numbers = #tpu.dot_dimension_numbers<[1], [1], [0], [0], [0, 0, 1, 0], [], []>} : vector<8x8xf32>, vector<8x8xf32>, vector<8x8xf32> -> vector<8x8xf32>
    %cst_81 = arith.constant 0.353553385 : f32
    %166 = vector.broadcast %cst_81 : f32 to vector<8x8xf32>
    %167 = arith.mulf %165, %166 : vector<8x8xf32>
    %168 = arith.addf %167, %7 : vector<8x8xf32>
    %cst_82 = arith.constant dense<0xFF800000> : vector<8xf32>
    %169 = vector.multi_reduction <maximumf>, %168, %cst_82 [1] : vector<8x8xf32> to vector<8xf32>
    %170 = vector.shape_cast %169 : vector<8xf32> to vector<8x1xf32>
    %171 = vector.broadcast %170 : vector<8x1xf32> to vector<8x8xf32>
    %172 = arith.subf %168, %171 : vector<8x8xf32>
    %173 = math.exp %172 : vector<8x8xf32>
    %cst_83 = arith.constant dense<0.000000e+00> : vector<8xf32>
    %174 = vector.multi_reduction <add>, %173, %cst_83 [1] : vector<8x8xf32> to vector<8xf32>
    %175 = vector.shape_cast %174 : vector<8xf32> to vector<8x1xf32>
    %176 = vector.broadcast %175 : vector<8x1xf32> to vector<8x8xf32>
    %177 = arith.divf %173, %176 : vector<8x8xf32>
    %cst_84 = arith.constant dense<0.000000e+00> : vector<8x8xf32>
    %178 = tpu.matmul %177, %164, %cst_84 {dimension_numbers = #tpu.dot_dimension_numbers<[1], [0], [0], [1], [0, 0, 1, 1], [], []>} : vector<8x8xf32>, vector<8x8xf32>, vector<8x8xf32> -> vector<8x8xf32>
    %179 = vector.extract_strided_slice %137 {offsets = [0, 16], sizes = [8, 8], strides = [1, 1]} : vector<8x32xf32> to vector<8x8xf32>
    %180 = vector.extract_strided_slice %143 {offsets = [0, 16], sizes = [8, 8], strides = [1, 1]} : vector<8x32xf32> to vector<8x8xf32>
    %181 = vector.extract_strided_slice %144 {offsets = [0, 16], sizes = [8, 8], strides = [1, 1]} : vector<8x32xf32> to vector<8x8xf32>
    %cst_85 = arith.constant dense<0.000000e+00> : vector<8x8xf32>
    %182 = tpu.matmul %179, %180, %cst_85 {dimension_numbers = #tpu.dot_dimension_numbers<[1], [1], [0], [0], [0, 0, 1, 0], [], []>} : vector<8x8xf32>, vector<8x8xf32>, vector<8x8xf32> -> vector<8x8xf32>
    %cst_86 = arith.constant 0.353553385 : f32
    %183 = vector.broadcast %cst_86 : f32 to vector<8x8xf32>
    %184 = arith.mulf %182, %183 : vector<8x8xf32>
    %185 = arith.addf %184, %7 : vector<8x8xf32>
    %cst_87 = arith.constant dense<0xFF800000> : vector<8xf32>
    %186 = vector.multi_reduction <maximumf>, %185, %cst_87 [1] : vector<8x8xf32> to vector<8xf32>
    %187 = vector.shape_cast %186 : vector<8xf32> to vector<8x1xf32>
    %188 = vector.broadcast %187 : vector<8x1xf32> to vector<8x8xf32>
    %189 = arith.subf %185, %188 : vector<8x8xf32>
    %190 = math.exp %189 : vector<8x8xf32>
    %cst_88 = arith.constant dense<0.000000e+00> : vector<8xf32>
    %191 = vector.multi_reduction <add>, %190, %cst_88 [1] : vector<8x8xf32> to vector<8xf32>
    %192 = vector.shape_cast %191 : vector<8xf32> to vector<8x1xf32>
    %193 = vector.broadcast %192 : vector<8x1xf32> to vector<8x8xf32>
    %194 = arith.divf %190, %193 : vector<8x8xf32>
    %cst_89 = arith.constant dense<0.000000e+00> : vector<8x8xf32>
    %195 = tpu.matmul %194, %181, %cst_89 {dimension_numbers = #tpu.dot_dimension_numbers<[1], [0], [0], [1], [0, 0, 1, 1], [], []>} : vector<8x8xf32>, vector<8x8xf32>, vector<8x8xf32> -> vector<8x8xf32>
    %196 = vector.extract_strided_slice %137 {offsets = [0, 24], sizes = [8, 8], strides = [1, 1]} : vector<8x32xf32> to vector<8x8xf32>
    %197 = vector.extract_strided_slice %143 {offsets = [0, 24], sizes = [8, 8], strides = [1, 1]} : vector<8x32xf32> to vector<8x8xf32>
    %198 = vector.extract_strided_slice %144 {offsets = [0, 24], sizes = [8, 8], strides = [1, 1]} : vector<8x32xf32> to vector<8x8xf32>
    %cst_90 = arith.constant dense<0.000000e+00> : vector<8x8xf32>
    %199 = tpu.matmul %196, %197, %cst_90 {dimension_numbers = #tpu.dot_dimension_numbers<[1], [1], [0], [0], [0, 0, 1, 0], [], []>} : vector<8x8xf32>, vector<8x8xf32>, vector<8x8xf32> -> vector<8x8xf32>
    %cst_91 = arith.constant 0.353553385 : f32
    %200 = vector.broadcast %cst_91 : f32 to vector<8x8xf32>
    %201 = arith.mulf %199, %200 : vector<8x8xf32>
    %202 = arith.addf %201, %7 : vector<8x8xf32>
    %cst_92 = arith.constant dense<0xFF800000> : vector<8xf32>
    %203 = vector.multi_reduction <maximumf>, %202, %cst_92 [1] : vector<8x8xf32> to vector<8xf32>
    %204 = vector.shape_cast %203 : vector<8xf32> to vector<8x1xf32>
    %205 = vector.broadcast %204 : vector<8x1xf32> to vector<8x8xf32>
    %206 = arith.subf %202, %205 : vector<8x8xf32>
    %207 = math.exp %206 : vector<8x8xf32>
    %cst_93 = arith.constant dense<0.000000e+00> : vector<8xf32>
    %208 = vector.multi_reduction <add>, %207, %cst_93 [1] : vector<8x8xf32> to vector<8xf32>
    %209 = vector.shape_cast %208 : vector<8xf32> to vector<8x1xf32>
    %210 = vector.broadcast %209 : vector<8x1xf32> to vector<8x8xf32>
    %211 = arith.divf %207, %210 : vector<8x8xf32>
    %cst_94 = arith.constant dense<0.000000e+00> : vector<8x8xf32>
    %212 = tpu.matmul %211, %198, %cst_94 {dimension_numbers = #tpu.dot_dimension_numbers<[1], [0], [0], [1], [0, 0, 1, 1], [], []>} : vector<8x8xf32>, vector<8x8xf32>, vector<8x8xf32> -> vector<8x8xf32>
    %213 = tpu.concatenate %161, %178, %195, %212 in 1 : vector<8x8xf32>, vector<8x8xf32>, vector<8x8xf32>, vector<8x8xf32> -> vector<8x32xf32>
    %cst_95 = arith.constant dense<0.000000e+00> : vector<8x32xf32>
    %214 = tpu.matmul %213, %126, %cst_95 {dimension_numbers = #tpu.dot_dimension_numbers<[1], [0], [0], [1], [0, 0, 1, 1], [], []>} : vector<8x32xf32>, vector<32x32xf32>, vector<8x32xf32> -> vector<8x32xf32>
    %215 = vector.broadcast %128 : vector<1x32xf32> to vector<8x32xf32>
    %216 = arith.addf %214, %215 : vector<8x32xf32>
    %217 = arith.addf %120, %216 : vector<8x32xf32>
    %cst_96 = arith.constant dense<0.000000e+00> : vector<8xf32>
    %218 = vector.multi_reduction <add>, %217, %cst_96 [1] : vector<8x32xf32> to vector<8xf32>
    %219 = vector.shape_cast %218 : vector<8xf32> to vector<8x1xf32>
    %cst_97 = arith.constant 3.200000e+01 : f32
    %220 = vector.broadcast %cst_97 : f32 to vector<8x1xf32>
    %221 = arith.divf %219, %220 : vector<8x1xf32>
    %222 = vector.broadcast %221 : vector<8x1xf32> to vector<8x32xf32>
    %223 = arith.subf %217, %222 : vector<8x32xf32>
    %224 = arith.mulf %223, %223 : vector<8x32xf32>
    %cst_98 = arith.constant dense<0.000000e+00> : vector<8xf32>
    %225 = vector.multi_reduction <add>, %224, %cst_98 [1] : vector<8x32xf32> to vector<8xf32>
    %226 = vector.shape_cast %225 : vector<8xf32> to vector<8x1xf32>
    %cst_99 = arith.constant 3.200000e+01 : f32
    %227 = vector.broadcast %cst_99 : f32 to vector<8x1xf32>
    %228 = arith.divf %226, %227 : vector<8x1xf32>
    %229 = vector.broadcast %221 : vector<8x1xf32> to vector<8x32xf32>
    %230 = arith.subf %217, %229 : vector<8x32xf32>
    %cst_100 = arith.constant 9.99999974E-6 : f32
    %231 = vector.broadcast %cst_100 : f32 to vector<8x1xf32>
    %232 = arith.addf %228, %231 : vector<8x1xf32>
    %233 = math.rsqrt %232 : vector<8x1xf32>
    %234 = vector.broadcast %233 : vector<8x1xf32> to vector<8x32xf32>
    %235 = arith.mulf %230, %234 : vector<8x32xf32>
    %236 = vector.broadcast %130 : vector<1x32xf32> to vector<8x32xf32>
    %237 = arith.mulf %235, %236 : vector<8x32xf32>
    %238 = vector.broadcast %132 : vector<1x32xf32> to vector<8x32xf32>
    %239 = arith.addf %237, %238 : vector<8x32xf32>
    %c0_101 = arith.constant 0 : index
    %c0_102 = arith.constant 0 : index
    %c0_103 = arith.constant 0 : index
    %240 = vector.load %arg17[%c0_101, %c0_102, %c0_103] : memref<2x32x64xf32, #tpu.memory_space<vmem>>, vector<1x32x64xf32>
    %241 = vector.shape_cast %240 : vector<1x32x64xf32> to vector<32x64xf32>
    %c0_104 = arith.constant 0 : index
    %c0_105 = arith.constant 0 : index
    %c0_106 = arith.constant 0 : index
    %242 = vector.load %arg18[%c0_104, %c0_105, %c0_106] : memref<2x1x64xf32, #tpu.memory_space<vmem>>, vector<1x1x64xf32>
    %243 = vector.shape_cast %242 : vector<1x1x64xf32> to vector<1x64xf32>
    %c0_107 = arith.constant 0 : index
    %c0_108 = arith.constant 0 : index
    %c0_109 = arith.constant 0 : index
    %244 = vector.load %arg19[%c0_107, %c0_108, %c0_109] : memref<2x64x32xf32, #tpu.memory_space<vmem>>, vector<1x64x32xf32>
    %245 = vector.shape_cast %244 : vector<1x64x32xf32> to vector<64x32xf32>
    %c0_110 = arith.constant 0 : index
    %c0_111 = arith.constant 0 : index
    %c0_112 = arith.constant 0 : index
    %246 = vector.load %arg20[%c0_110, %c0_111, %c0_112] : memref<2x1x32xf32, #tpu.memory_space<vmem>>, vector<1x1x32xf32>
    %247 = vector.shape_cast %246 : vector<1x1x32xf32> to vector<1x32xf32>
    %c0_113 = arith.constant 0 : index
    %c0_114 = arith.constant 0 : index
    %c0_115 = arith.constant 0 : index
    %248 = vector.load %arg21[%c0_113, %c0_114, %c0_115] : memref<2x1x32xf32, #tpu.memory_space<vmem>>, vector<1x1x32xf32>
    %249 = vector.shape_cast %248 : vector<1x1x32xf32> to vector<1x32xf32>
    %c0_116 = arith.constant 0 : index
    %c0_117 = arith.constant 0 : index
    %c0_118 = arith.constant 0 : index
    %250 = vector.load %arg22[%c0_116, %c0_117, %c0_118] : memref<2x1x32xf32, #tpu.memory_space<vmem>>, vector<1x1x32xf32>
    %251 = vector.shape_cast %250 : vector<1x1x32xf32> to vector<1x32xf32>
    %cst_119 = arith.constant dense<0.000000e+00> : vector<8x64xf32>
    %252 = tpu.matmul %239, %241, %cst_119 {dimension_numbers = #tpu.dot_dimension_numbers<[1], [0], [0], [1], [0, 0, 1, 1], [], []>} : vector<8x32xf32>, vector<32x64xf32>, vector<8x64xf32> -> vector<8x64xf32>
    %253 = vector.broadcast %243 : vector<1x64xf32> to vector<8x64xf32>
    %254 = arith.addf %252, %253 : vector<8x64xf32>
    %cst_120 = arith.constant 0.000000e+00 : f32
    %255 = vector.broadcast %cst_120 : f32 to vector<8x64xf32>
    %256 = arith.maximumf %254, %255 : vector<8x64xf32>
    %cst_121 = arith.constant dense<0.000000e+00> : vector<8x32xf32>
    %257 = tpu.matmul %256, %245, %cst_121 {dimension_numbers = #tpu.dot_dimension_numbers<[1], [0], [0], [1], [0, 0, 1, 1], [], []>} : vector<8x64xf32>, vector<64x32xf32>, vector<8x32xf32> -> vector<8x32xf32>
    %258 = vector.broadcast %247 : vector<1x32xf32> to vector<8x32xf32>
    %259 = arith.addf %257, %258 : vector<8x32xf32>
    %260 = arith.addf %239, %259 : vector<8x32xf32>
    %cst_122 = arith.constant dense<0.000000e+00> : vector<8xf32>
    %261 = vector.multi_reduction <add>, %260, %cst_122 [1] : vector<8x32xf32> to vector<8xf32>
    %262 = vector.shape_cast %261 : vector<8xf32> to vector<8x1xf32>
    %cst_123 = arith.constant 3.200000e+01 : f32
    %263 = vector.broadcast %cst_123 : f32 to vector<8x1xf32>
    %264 = arith.divf %262, %263 : vector<8x1xf32>
    %265 = vector.broadcast %264 : vector<8x1xf32> to vector<8x32xf32>
    %266 = arith.subf %260, %265 : vector<8x32xf32>
    %267 = arith.mulf %266, %266 : vector<8x32xf32>
    %cst_124 = arith.constant dense<0.000000e+00> : vector<8xf32>
    %268 = vector.multi_reduction <add>, %267, %cst_124 [1] : vector<8x32xf32> to vector<8xf32>
    %269 = vector.shape_cast %268 : vector<8xf32> to vector<8x1xf32>
    %cst_125 = arith.constant 3.200000e+01 : f32
    %270 = vector.broadcast %cst_125 : f32 to vector<8x1xf32>
    %271 = arith.divf %269, %270 : vector<8x1xf32>
    %272 = vector.broadcast %264 : vector<8x1xf32> to vector<8x32xf32>
    %273 = arith.subf %260, %272 : vector<8x32xf32>
    %cst_126 = arith.constant 9.99999974E-6 : f32
    %274 = vector.broadcast %cst_126 : f32 to vector<8x1xf32>
    %275 = arith.addf %271, %274 : vector<8x1xf32>
    %276 = math.rsqrt %275 : vector<8x1xf32>
    %277 = vector.broadcast %276 : vector<8x1xf32> to vector<8x32xf32>
    %278 = arith.mulf %273, %277 : vector<8x32xf32>
    %279 = vector.broadcast %249 : vector<1x32xf32> to vector<8x32xf32>
    %280 = arith.mulf %278, %279 : vector<8x32xf32>
    %281 = vector.broadcast %251 : vector<1x32xf32> to vector<8x32xf32>
    %282 = arith.addf %280, %281 : vector<8x32xf32>
    %c1 = arith.constant 1 : index
    %c0_127 = arith.constant 0 : index
    %c0_128 = arith.constant 0 : index
    %283 = vector.load %arg5[%c1, %c0_127, %c0_128] : memref<2x32x96xf32, #tpu.memory_space<vmem>>, vector<1x32x96xf32>
    %284 = vector.shape_cast %283 : vector<1x32x96xf32> to vector<32x96xf32>
    %c1_129 = arith.constant 1 : index
    %c0_130 = arith.constant 0 : index
    %c0_131 = arith.constant 0 : index
    %285 = vector.load %arg6[%c1_129, %c0_130, %c0_131] : memref<2x1x96xf32, #tpu.memory_space<vmem>>, vector<1x1x96xf32>
    %286 = vector.shape_cast %285 : vector<1x1x96xf32> to vector<1x96xf32>
    %c1_132 = arith.constant 1 : index
    %c0_133 = arith.constant 0 : index
    %c0_134 = arith.constant 0 : index
    %287 = vector.load %arg7[%c1_132, %c0_133, %c0_134] : memref<2x32x32xf32, #tpu.memory_space<vmem>>, vector<1x32x32xf32>
    %288 = vector.shape_cast %287 : vector<1x32x32xf32> to vector<32x32xf32>
    %c1_135 = arith.constant 1 : index
    %c0_136 = arith.constant 0 : index
    %c0_137 = arith.constant 0 : index
    %289 = vector.load %arg8[%c1_135, %c0_136, %c0_137] : memref<2x1x32xf32, #tpu.memory_space<vmem>>, vector<1x1x32xf32>
    %290 = vector.shape_cast %289 : vector<1x1x32xf32> to vector<1x32xf32>
    %c1_138 = arith.constant 1 : index
    %c0_139 = arith.constant 0 : index
    %c0_140 = arith.constant 0 : index
    %291 = vector.load %arg9[%c1_138, %c0_139, %c0_140] : memref<2x1x32xf32, #tpu.memory_space<vmem>>, vector<1x1x32xf32>
    %292 = vector.shape_cast %291 : vector<1x1x32xf32> to vector<1x32xf32>
    %c1_141 = arith.constant 1 : index
    %c0_142 = arith.constant 0 : index
    %c0_143 = arith.constant 0 : index
    %293 = vector.load %arg10[%c1_141, %c0_142, %c0_143] : memref<2x1x32xf32, #tpu.memory_space<vmem>>, vector<1x1x32xf32>
    %294 = vector.shape_cast %293 : vector<1x1x32xf32> to vector<1x32xf32>
    %cst_144 = arith.constant dense<0.000000e+00> : vector<8x96xf32>
    %295 = tpu.matmul %282, %284, %cst_144 {dimension_numbers = #tpu.dot_dimension_numbers<[1], [0], [0], [1], [0, 0, 1, 1], [], []>} : vector<8x32xf32>, vector<32x96xf32>, vector<8x96xf32> -> vector<8x96xf32>
    %296 = vector.broadcast %286 : vector<1x96xf32> to vector<8x96xf32>
    %297 = arith.addf %295, %296 : vector<8x96xf32>
    %298 = vector.extract_strided_slice %297 {offsets = [0, 0], sizes = [8, 32], strides = [1, 1]} : vector<8x96xf32> to vector<8x32xf32>
    %299 = vector.extract_strided_slice %297 {offsets = [0, 32], sizes = [8, 32], strides = [1, 1]} : vector<8x96xf32> to vector<8x32xf32>
    %300 = vector.extract_strided_slice %297 {offsets = [0, 64], sizes = [8, 32], strides = [1, 1]} : vector<8x96xf32> to vector<8x32xf32>
    %301 = vector.extract_strided_slice %298 {offsets = [0, 0], sizes = [8, 8], strides = [1, 1]} : vector<8x32xf32> to vector<8x8xf32>
    %302 = vector.extract_strided_slice %299 {offsets = [0, 0], sizes = [8, 8], strides = [1, 1]} : vector<8x32xf32> to vector<8x8xf32>
    %303 = vector.extract_strided_slice %300 {offsets = [0, 0], sizes = [8, 8], strides = [1, 1]} : vector<8x32xf32> to vector<8x8xf32>
    %cst_145 = arith.constant dense<0.000000e+00> : vector<8x8xf32>
    %304 = tpu.matmul %301, %302, %cst_145 {dimension_numbers = #tpu.dot_dimension_numbers<[1], [1], [0], [0], [0, 0, 1, 0], [], []>} : vector<8x8xf32>, vector<8x8xf32>, vector<8x8xf32> -> vector<8x8xf32>
    %cst_146 = arith.constant 0.353553385 : f32
    %305 = vector.broadcast %cst_146 : f32 to vector<8x8xf32>
    %306 = arith.mulf %304, %305 : vector<8x8xf32>
    %307 = arith.addf %306, %5 : vector<8x8xf32>
    %cst_147 = arith.constant dense<0xFF800000> : vector<8xf32>
    %308 = vector.multi_reduction <maximumf>, %307, %cst_147 [1] : vector<8x8xf32> to vector<8xf32>
    %309 = vector.shape_cast %308 : vector<8xf32> to vector<8x1xf32>
    %310 = vector.broadcast %309 : vector<8x1xf32> to vector<8x8xf32>
    %311 = arith.subf %307, %310 : vector<8x8xf32>
    %312 = math.exp %311 : vector<8x8xf32>
    %cst_148 = arith.constant dense<0.000000e+00> : vector<8xf32>
    %313 = vector.multi_reduction <add>, %312, %cst_148 [1] : vector<8x8xf32> to vector<8xf32>
    %314 = vector.shape_cast %313 : vector<8xf32> to vector<8x1xf32>
    %315 = vector.broadcast %314 : vector<8x1xf32> to vector<8x8xf32>
    %316 = arith.divf %312, %315 : vector<8x8xf32>
    %cst_149 = arith.constant dense<0.000000e+00> : vector<8x8xf32>
    %317 = tpu.matmul %316, %303, %cst_149 {dimension_numbers = #tpu.dot_dimension_numbers<[1], [0], [0], [1], [0, 0, 1, 1], [], []>} : vector<8x8xf32>, vector<8x8xf32>, vector<8x8xf32> -> vector<8x8xf32>
    %318 = vector.extract_strided_slice %298 {offsets = [0, 8], sizes = [8, 8], strides = [1, 1]} : vector<8x32xf32> to vector<8x8xf32>
    %319 = vector.extract_strided_slice %299 {offsets = [0, 8], sizes = [8, 8], strides = [1, 1]} : vector<8x32xf32> to vector<8x8xf32>
    %320 = vector.extract_strided_slice %300 {offsets = [0, 8], sizes = [8, 8], strides = [1, 1]} : vector<8x32xf32> to vector<8x8xf32>
    %cst_150 = arith.constant dense<0.000000e+00> : vector<8x8xf32>
    %321 = tpu.matmul %318, %319, %cst_150 {dimension_numbers = #tpu.dot_dimension_numbers<[1], [1], [0], [0], [0, 0, 1, 0], [], []>} : vector<8x8xf32>, vector<8x8xf32>, vector<8x8xf32> -> vector<8x8xf32>
    %cst_151 = arith.constant 0.353553385 : f32
    %322 = vector.broadcast %cst_151 : f32 to vector<8x8xf32>
    %323 = arith.mulf %321, %322 : vector<8x8xf32>
    %324 = arith.addf %323, %5 : vector<8x8xf32>
    %cst_152 = arith.constant dense<0xFF800000> : vector<8xf32>
    %325 = vector.multi_reduction <maximumf>, %324, %cst_152 [1] : vector<8x8xf32> to vector<8xf32>
    %326 = vector.shape_cast %325 : vector<8xf32> to vector<8x1xf32>
    %327 = vector.broadcast %326 : vector<8x1xf32> to vector<8x8xf32>
    %328 = arith.subf %324, %327 : vector<8x8xf32>
    %329 = math.exp %328 : vector<8x8xf32>
    %cst_153 = arith.constant dense<0.000000e+00> : vector<8xf32>
    %330 = vector.multi_reduction <add>, %329, %cst_153 [1] : vector<8x8xf32> to vector<8xf32>
    %331 = vector.shape_cast %330 : vector<8xf32> to vector<8x1xf32>
    %332 = vector.broadcast %331 : vector<8x1xf32> to vector<8x8xf32>
    %333 = arith.divf %329, %332 : vector<8x8xf32>
    %cst_154 = arith.constant dense<0.000000e+00> : vector<8x8xf32>
    %334 = tpu.matmul %333, %320, %cst_154 {dimension_numbers = #tpu.dot_dimension_numbers<[1], [0], [0], [1], [0, 0, 1, 1], [], []>} : vector<8x8xf32>, vector<8x8xf32>, vector<8x8xf32> -> vector<8x8xf32>
    %335 = vector.extract_strided_slice %298 {offsets = [0, 16], sizes = [8, 8], strides = [1, 1]} : vector<8x32xf32> to vector<8x8xf32>
    %336 = vector.extract_strided_slice %299 {offsets = [0, 16], sizes = [8, 8], strides = [1, 1]} : vector<8x32xf32> to vector<8x8xf32>
    %337 = vector.extract_strided_slice %300 {offsets = [0, 16], sizes = [8, 8], strides = [1, 1]} : vector<8x32xf32> to vector<8x8xf32>
    %cst_155 = arith.constant dense<0.000000e+00> : vector<8x8xf32>
    %338 = tpu.matmul %335, %336, %cst_155 {dimension_numbers = #tpu.dot_dimension_numbers<[1], [1], [0], [0], [0, 0, 1, 0], [], []>} : vector<8x8xf32>, vector<8x8xf32>, vector<8x8xf32> -> vector<8x8xf32>
    %cst_156 = arith.constant 0.353553385 : f32
    %339 = vector.broadcast %cst_156 : f32 to vector<8x8xf32>
    %340 = arith.mulf %338, %339 : vector<8x8xf32>
    %341 = arith.addf %340, %5 : vector<8x8xf32>
    %cst_157 = arith.constant dense<0xFF800000> : vector<8xf32>
    %342 = vector.multi_reduction <maximumf>, %341, %cst_157 [1] : vector<8x8xf32> to vector<8xf32>
    %343 = vector.shape_cast %342 : vector<8xf32> to vector<8x1xf32>
    %344 = vector.broadcast %343 : vector<8x1xf32> to vector<8x8xf32>
    %345 = arith.subf %341, %344 : vector<8x8xf32>
    %346 = math.exp %345 : vector<8x8xf32>
    %cst_158 = arith.constant dense<0.000000e+00> : vector<8xf32>
    %347 = vector.multi_reduction <add>, %346, %cst_158 [1] : vector<8x8xf32> to vector<8xf32>
    %348 = vector.shape_cast %347 : vector<8xf32> to vector<8x1xf32>
    %349 = vector.broadcast %348 : vector<8x1xf32> to vector<8x8xf32>
    %350 = arith.divf %346, %349 : vector<8x8xf32>
    %cst_159 = arith.constant dense<0.000000e+00> : vector<8x8xf32>
    %351 = tpu.matmul %350, %337, %cst_159 {dimension_numbers = #tpu.dot_dimension_numbers<[1], [0], [0], [1], [0, 0, 1, 1], [], []>} : vector<8x8xf32>, vector<8x8xf32>, vector<8x8xf32> -> vector<8x8xf32>
    %352 = vector.extract_strided_slice %298 {offsets = [0, 24], sizes = [8, 8], strides = [1, 1]} : vector<8x32xf32> to vector<8x8xf32>
    %353 = vector.extract_strided_slice %299 {offsets = [0, 24], sizes = [8, 8], strides = [1, 1]} : vector<8x32xf32> to vector<8x8xf32>
    %354 = vector.extract_strided_slice %300 {offsets = [0, 24], sizes = [8, 8], strides = [1, 1]} : vector<8x32xf32> to vector<8x8xf32>
    %cst_160 = arith.constant dense<0.000000e+00> : vector<8x8xf32>
    %355 = tpu.matmul %352, %353, %cst_160 {dimension_numbers = #tpu.dot_dimension_numbers<[1], [1], [0], [0], [0, 0, 1, 0], [], []>} : vector<8x8xf32>, vector<8x8xf32>, vector<8x8xf32> -> vector<8x8xf32>
    %cst_161 = arith.constant 0.353553385 : f32
    %356 = vector.broadcast %cst_161 : f32 to vector<8x8xf32>
    %357 = arith.mulf %355, %356 : vector<8x8xf32>
    %358 = arith.addf %357, %5 : vector<8x8xf32>
    %cst_162 = arith.constant dense<0xFF800000> : vector<8xf32>
    %359 = vector.multi_reduction <maximumf>, %358, %cst_162 [1] : vector<8x8xf32> to vector<8xf32>
    %360 = vector.shape_cast %359 : vector<8xf32> to vector<8x1xf32>
    %361 = vector.broadcast %360 : vector<8x1xf32> to vector<8x8xf32>
    %362 = arith.subf %358, %361 : vector<8x8xf32>
    %363 = math.exp %362 : vector<8x8xf32>
    %cst_163 = arith.constant dense<0.000000e+00> : vector<8xf32>
    %364 = vector.multi_reduction <add>, %363, %cst_163 [1] : vector<8x8xf32> to vector<8xf32>
    %365 = vector.shape_cast %364 : vector<8xf32> to vector<8x1xf32>
    %366 = vector.broadcast %365 : vector<8x1xf32> to vector<8x8xf32>
    %367 = arith.divf %363, %366 : vector<8x8xf32>
    %cst_164 = arith.constant dense<0.000000e+00> : vector<8x8xf32>
    %368 = tpu.matmul %367, %354, %cst_164 {dimension_numbers = #tpu.dot_dimension_numbers<[1], [0], [0], [1], [0, 0, 1, 1], [], []>} : vector<8x8xf32>, vector<8x8xf32>, vector<8x8xf32> -> vector<8x8xf32>
    %369 = tpu.concatenate %317, %334, %351, %368 in 1 : vector<8x8xf32>, vector<8x8xf32>, vector<8x8xf32>, vector<8x8xf32> -> vector<8x32xf32>
    %cst_165 = arith.constant dense<0.000000e+00> : vector<8x32xf32>
    %370 = tpu.matmul %369, %288, %cst_165 {dimension_numbers = #tpu.dot_dimension_numbers<[1], [0], [0], [1], [0, 0, 1, 1], [], []>} : vector<8x32xf32>, vector<32x32xf32>, vector<8x32xf32> -> vector<8x32xf32>
    %371 = vector.broadcast %290 : vector<1x32xf32> to vector<8x32xf32>
    %372 = arith.addf %370, %371 : vector<8x32xf32>
    %373 = arith.addf %282, %372 : vector<8x32xf32>
    %cst_166 = arith.constant dense<0.000000e+00> : vector<8xf32>
    %374 = vector.multi_reduction <add>, %373, %cst_166 [1] : vector<8x32xf32> to vector<8xf32>
    %375 = vector.shape_cast %374 : vector<8xf32> to vector<8x1xf32>
    %cst_167 = arith.constant 3.200000e+01 : f32
    %376 = vector.broadcast %cst_167 : f32 to vector<8x1xf32>
    %377 = arith.divf %375, %376 : vector<8x1xf32>
    %378 = vector.broadcast %377 : vector<8x1xf32> to vector<8x32xf32>
    %379 = arith.subf %373, %378 : vector<8x32xf32>
    %380 = arith.mulf %379, %379 : vector<8x32xf32>
    %cst_168 = arith.constant dense<0.000000e+00> : vector<8xf32>
    %381 = vector.multi_reduction <add>, %380, %cst_168 [1] : vector<8x32xf32> to vector<8xf32>
    %382 = vector.shape_cast %381 : vector<8xf32> to vector<8x1xf32>
    %cst_169 = arith.constant 3.200000e+01 : f32
    %383 = vector.broadcast %cst_169 : f32 to vector<8x1xf32>
    %384 = arith.divf %382, %383 : vector<8x1xf32>
    %385 = vector.broadcast %377 : vector<8x1xf32> to vector<8x32xf32>
    %386 = arith.subf %373, %385 : vector<8x32xf32>
    %cst_170 = arith.constant 9.99999974E-6 : f32
    %387 = vector.broadcast %cst_170 : f32 to vector<8x1xf32>
    %388 = arith.addf %384, %387 : vector<8x1xf32>
    %389 = math.rsqrt %388 : vector<8x1xf32>
    %390 = vector.broadcast %389 : vector<8x1xf32> to vector<8x32xf32>
    %391 = arith.mulf %386, %390 : vector<8x32xf32>
    %392 = vector.broadcast %292 : vector<1x32xf32> to vector<8x32xf32>
    %393 = arith.mulf %391, %392 : vector<8x32xf32>
    %394 = vector.broadcast %294 : vector<1x32xf32> to vector<8x32xf32>
    %395 = arith.addf %393, %394 : vector<8x32xf32>
    %c1_171 = arith.constant 1 : index
    %c0_172 = arith.constant 0 : index
    %c0_173 = arith.constant 0 : index
    %396 = vector.load %arg11[%c1_171, %c0_172, %c0_173] : memref<2x32x96xf32, #tpu.memory_space<vmem>>, vector<1x32x96xf32>
    %397 = vector.shape_cast %396 : vector<1x32x96xf32> to vector<32x96xf32>
    %c1_174 = arith.constant 1 : index
    %c0_175 = arith.constant 0 : index
    %c0_176 = arith.constant 0 : index
    %398 = vector.load %arg12[%c1_174, %c0_175, %c0_176] : memref<2x1x96xf32, #tpu.memory_space<vmem>>, vector<1x1x96xf32>
    %399 = vector.shape_cast %398 : vector<1x1x96xf32> to vector<1x96xf32>
    %c1_177 = arith.constant 1 : index
    %c0_178 = arith.constant 0 : index
    %c0_179 = arith.constant 0 : index
    %400 = vector.load %arg13[%c1_177, %c0_178, %c0_179] : memref<2x32x32xf32, #tpu.memory_space<vmem>>, vector<1x32x32xf32>
    %401 = vector.shape_cast %400 : vector<1x32x32xf32> to vector<32x32xf32>
    %c1_180 = arith.constant 1 : index
    %c0_181 = arith.constant 0 : index
    %c0_182 = arith.constant 0 : index
    %402 = vector.load %arg14[%c1_180, %c0_181, %c0_182] : memref<2x1x32xf32, #tpu.memory_space<vmem>>, vector<1x1x32xf32>
    %403 = vector.shape_cast %402 : vector<1x1x32xf32> to vector<1x32xf32>
    %c1_183 = arith.constant 1 : index
    %c0_184 = arith.constant 0 : index
    %c0_185 = arith.constant 0 : index
    %404 = vector.load %arg15[%c1_183, %c0_184, %c0_185] : memref<2x1x32xf32, #tpu.memory_space<vmem>>, vector<1x1x32xf32>
    %405 = vector.shape_cast %404 : vector<1x1x32xf32> to vector<1x32xf32>
    %c1_186 = arith.constant 1 : index
    %c0_187 = arith.constant 0 : index
    %c0_188 = arith.constant 0 : index
    %406 = vector.load %arg16[%c1_186, %c0_187, %c0_188] : memref<2x1x32xf32, #tpu.memory_space<vmem>>, vector<1x1x32xf32>
    %407 = vector.shape_cast %406 : vector<1x1x32xf32> to vector<1x32xf32>
    %408 = vector.extract_strided_slice %397 {offsets = [0, 0], sizes = [32, 32], strides = [1, 1]} : vector<32x96xf32> to vector<32x32xf32>
    %cst_189 = arith.constant dense<0.000000e+00> : vector<8x32xf32>
    %409 = tpu.matmul %395, %408, %cst_189 {dimension_numbers = #tpu.dot_dimension_numbers<[1], [0], [0], [1], [0, 0, 1, 1], [], []>} : vector<8x32xf32>, vector<32x32xf32>, vector<8x32xf32> -> vector<8x32xf32>
    %410 = vector.extract_strided_slice %399 {offsets = [0, 0], sizes = [1, 32], strides = [1, 1]} : vector<1x96xf32> to vector<1x32xf32>
    %411 = vector.broadcast %410 : vector<1x32xf32> to vector<8x32xf32>
    %412 = arith.addf %409, %411 : vector<8x32xf32>
    %413 = vector.extract_strided_slice %397 {offsets = [0, 32], sizes = [32, 64], strides = [1, 1]} : vector<32x96xf32> to vector<32x64xf32>
    %cst_190 = arith.constant dense<0.000000e+00> : vector<8x64xf32>
    %414 = tpu.matmul %3, %413, %cst_190 {dimension_numbers = #tpu.dot_dimension_numbers<[1], [0], [0], [1], [0, 0, 1, 1], [], []>} : vector<8x32xf32>, vector<32x64xf32>, vector<8x64xf32> -> vector<8x64xf32>
    %415 = vector.extract_strided_slice %399 {offsets = [0, 32], sizes = [1, 64], strides = [1, 1]} : vector<1x96xf32> to vector<1x64xf32>
    %416 = vector.broadcast %415 : vector<1x64xf32> to vector<8x64xf32>
    %417 = arith.addf %414, %416 : vector<8x64xf32>
    %418 = vector.extract_strided_slice %417 {offsets = [0, 0], sizes = [8, 32], strides = [1, 1]} : vector<8x64xf32> to vector<8x32xf32>
    %419 = vector.extract_strided_slice %417 {offsets = [0, 32], sizes = [8, 32], strides = [1, 1]} : vector<8x64xf32> to vector<8x32xf32>
    %420 = vector.extract_strided_slice %412 {offsets = [0, 0], sizes = [8, 8], strides = [1, 1]} : vector<8x32xf32> to vector<8x8xf32>
    %421 = vector.extract_strided_slice %418 {offsets = [0, 0], sizes = [8, 8], strides = [1, 1]} : vector<8x32xf32> to vector<8x8xf32>
    %422 = vector.extract_strided_slice %419 {offsets = [0, 0], sizes = [8, 8], strides = [1, 1]} : vector<8x32xf32> to vector<8x8xf32>
    %cst_191 = arith.constant dense<0.000000e+00> : vector<8x8xf32>
    %423 = tpu.matmul %420, %421, %cst_191 {dimension_numbers = #tpu.dot_dimension_numbers<[1], [1], [0], [0], [0, 0, 1, 0], [], []>} : vector<8x8xf32>, vector<8x8xf32>, vector<8x8xf32> -> vector<8x8xf32>
    %cst_192 = arith.constant 0.353553385 : f32
    %424 = vector.broadcast %cst_192 : f32 to vector<8x8xf32>
    %425 = arith.mulf %423, %424 : vector<8x8xf32>
    %426 = arith.addf %425, %7 : vector<8x8xf32>
    %cst_193 = arith.constant dense<0xFF800000> : vector<8xf32>
    %427 = vector.multi_reduction <maximumf>, %426, %cst_193 [1] : vector<8x8xf32> to vector<8xf32>
    %428 = vector.shape_cast %427 : vector<8xf32> to vector<8x1xf32>
    %429 = vector.broadcast %428 : vector<8x1xf32> to vector<8x8xf32>
    %430 = arith.subf %426, %429 : vector<8x8xf32>
    %431 = math.exp %430 : vector<8x8xf32>
    %cst_194 = arith.constant dense<0.000000e+00> : vector<8xf32>
    %432 = vector.multi_reduction <add>, %431, %cst_194 [1] : vector<8x8xf32> to vector<8xf32>
    %433 = vector.shape_cast %432 : vector<8xf32> to vector<8x1xf32>
    %434 = vector.broadcast %433 : vector<8x1xf32> to vector<8x8xf32>
    %435 = arith.divf %431, %434 : vector<8x8xf32>
    %cst_195 = arith.constant dense<0.000000e+00> : vector<8x8xf32>
    %436 = tpu.matmul %435, %422, %cst_195 {dimension_numbers = #tpu.dot_dimension_numbers<[1], [0], [0], [1], [0, 0, 1, 1], [], []>} : vector<8x8xf32>, vector<8x8xf32>, vector<8x8xf32> -> vector<8x8xf32>
    %437 = vector.extract_strided_slice %412 {offsets = [0, 8], sizes = [8, 8], strides = [1, 1]} : vector<8x32xf32> to vector<8x8xf32>
    %438 = vector.extract_strided_slice %418 {offsets = [0, 8], sizes = [8, 8], strides = [1, 1]} : vector<8x32xf32> to vector<8x8xf32>
    %439 = vector.extract_strided_slice %419 {offsets = [0, 8], sizes = [8, 8], strides = [1, 1]} : vector<8x32xf32> to vector<8x8xf32>
    %cst_196 = arith.constant dense<0.000000e+00> : vector<8x8xf32>
    %440 = tpu.matmul %437, %438, %cst_196 {dimension_numbers = #tpu.dot_dimension_numbers<[1], [1], [0], [0], [0, 0, 1, 0], [], []>} : vector<8x8xf32>, vector<8x8xf32>, vector<8x8xf32> -> vector<8x8xf32>
    %cst_197 = arith.constant 0.353553385 : f32
    %441 = vector.broadcast %cst_197 : f32 to vector<8x8xf32>
    %442 = arith.mulf %440, %441 : vector<8x8xf32>
    %443 = arith.addf %442, %7 : vector<8x8xf32>
    %cst_198 = arith.constant dense<0xFF800000> : vector<8xf32>
    %444 = vector.multi_reduction <maximumf>, %443, %cst_198 [1] : vector<8x8xf32> to vector<8xf32>
    %445 = vector.shape_cast %444 : vector<8xf32> to vector<8x1xf32>
    %446 = vector.broadcast %445 : vector<8x1xf32> to vector<8x8xf32>
    %447 = arith.subf %443, %446 : vector<8x8xf32>
    %448 = math.exp %447 : vector<8x8xf32>
    %cst_199 = arith.constant dense<0.000000e+00> : vector<8xf32>
    %449 = vector.multi_reduction <add>, %448, %cst_199 [1] : vector<8x8xf32> to vector<8xf32>
    %450 = vector.shape_cast %449 : vector<8xf32> to vector<8x1xf32>
    %451 = vector.broadcast %450 : vector<8x1xf32> to vector<8x8xf32>
    %452 = arith.divf %448, %451 : vector<8x8xf32>
    %cst_200 = arith.constant dense<0.000000e+00> : vector<8x8xf32>
    %453 = tpu.matmul %452, %439, %cst_200 {dimension_numbers = #tpu.dot_dimension_numbers<[1], [0], [0], [1], [0, 0, 1, 1], [], []>} : vector<8x8xf32>, vector<8x8xf32>, vector<8x8xf32> -> vector<8x8xf32>
    %454 = vector.extract_strided_slice %412 {offsets = [0, 16], sizes = [8, 8], strides = [1, 1]} : vector<8x32xf32> to vector<8x8xf32>
    %455 = vector.extract_strided_slice %418 {offsets = [0, 16], sizes = [8, 8], strides = [1, 1]} : vector<8x32xf32> to vector<8x8xf32>
    %456 = vector.extract_strided_slice %419 {offsets = [0, 16], sizes = [8, 8], strides = [1, 1]} : vector<8x32xf32> to vector<8x8xf32>
    %cst_201 = arith.constant dense<0.000000e+00> : vector<8x8xf32>
    %457 = tpu.matmul %454, %455, %cst_201 {dimension_numbers = #tpu.dot_dimension_numbers<[1], [1], [0], [0], [0, 0, 1, 0], [], []>} : vector<8x8xf32>, vector<8x8xf32>, vector<8x8xf32> -> vector<8x8xf32>
    %cst_202 = arith.constant 0.353553385 : f32
    %458 = vector.broadcast %cst_202 : f32 to vector<8x8xf32>
    %459 = arith.mulf %457, %458 : vector<8x8xf32>
    %460 = arith.addf %459, %7 : vector<8x8xf32>
    %cst_203 = arith.constant dense<0xFF800000> : vector<8xf32>
    %461 = vector.multi_reduction <maximumf>, %460, %cst_203 [1] : vector<8x8xf32> to vector<8xf32>
    %462 = vector.shape_cast %461 : vector<8xf32> to vector<8x1xf32>
    %463 = vector.broadcast %462 : vector<8x1xf32> to vector<8x8xf32>
    %464 = arith.subf %460, %463 : vector<8x8xf32>
    %465 = math.exp %464 : vector<8x8xf32>
    %cst_204 = arith.constant dense<0.000000e+00> : vector<8xf32>
    %466 = vector.multi_reduction <add>, %465, %cst_204 [1] : vector<8x8xf32> to vector<8xf32>
    %467 = vector.shape_cast %466 : vector<8xf32> to vector<8x1xf32>
    %468 = vector.broadcast %467 : vector<8x1xf32> to vector<8x8xf32>
    %469 = arith.divf %465, %468 : vector<8x8xf32>
    %cst_205 = arith.constant dense<0.000000e+00> : vector<8x8xf32>
    %470 = tpu.matmul %469, %456, %cst_205 {dimension_numbers = #tpu.dot_dimension_numbers<[1], [0], [0], [1], [0, 0, 1, 1], [], []>} : vector<8x8xf32>, vector<8x8xf32>, vector<8x8xf32> -> vector<8x8xf32>
    %471 = vector.extract_strided_slice %412 {offsets = [0, 24], sizes = [8, 8], strides = [1, 1]} : vector<8x32xf32> to vector<8x8xf32>
    %472 = vector.extract_strided_slice %418 {offsets = [0, 24], sizes = [8, 8], strides = [1, 1]} : vector<8x32xf32> to vector<8x8xf32>
    %473 = vector.extract_strided_slice %419 {offsets = [0, 24], sizes = [8, 8], strides = [1, 1]} : vector<8x32xf32> to vector<8x8xf32>
    %cst_206 = arith.constant dense<0.000000e+00> : vector<8x8xf32>
    %474 = tpu.matmul %471, %472, %cst_206 {dimension_numbers = #tpu.dot_dimension_numbers<[1], [1], [0], [0], [0, 0, 1, 0], [], []>} : vector<8x8xf32>, vector<8x8xf32>, vector<8x8xf32> -> vector<8x8xf32>
    %cst_207 = arith.constant 0.353553385 : f32
    %475 = vector.broadcast %cst_207 : f32 to vector<8x8xf32>
    %476 = arith.mulf %474, %475 : vector<8x8xf32>
    %477 = arith.addf %476, %7 : vector<8x8xf32>
    %cst_208 = arith.constant dense<0xFF800000> : vector<8xf32>
    %478 = vector.multi_reduction <maximumf>, %477, %cst_208 [1] : vector<8x8xf32> to vector<8xf32>
    %479 = vector.shape_cast %478 : vector<8xf32> to vector<8x1xf32>
    %480 = vector.broadcast %479 : vector<8x1xf32> to vector<8x8xf32>
    %481 = arith.subf %477, %480 : vector<8x8xf32>
    %482 = math.exp %481 : vector<8x8xf32>
    %cst_209 = arith.constant dense<0.000000e+00> : vector<8xf32>
    %483 = vector.multi_reduction <add>, %482, %cst_209 [1] : vector<8x8xf32> to vector<8xf32>
    %484 = vector.shape_cast %483 : vector<8xf32> to vector<8x1xf32>
    %485 = vector.broadcast %484 : vector<8x1xf32> to vector<8x8xf32>
    %486 = arith.divf %482, %485 : vector<8x8xf32>
    %cst_210 = arith.constant dense<0.000000e+00> : vector<8x8xf32>
    %487 = tpu.matmul %486, %473, %cst_210 {dimension_numbers = #tpu.dot_dimension_numbers<[1], [0], [0], [1], [0, 0, 1, 1], [], []>} : vector<8x8xf32>, vector<8x8xf32>, vector<8x8xf32> -> vector<8x8xf32>
    %488 = tpu.concatenate %436, %453, %470, %487 in 1 : vector<8x8xf32>, vector<8x8xf32>, vector<8x8xf32>, vector<8x8xf32> -> vector<8x32xf32>
    %cst_211 = arith.constant dense<0.000000e+00> : vector<8x32xf32>
    %489 = tpu.matmul %488, %401, %cst_211 {dimension_numbers = #tpu.dot_dimension_numbers<[1], [0], [0], [1], [0, 0, 1, 1], [], []>} : vector<8x32xf32>, vector<32x32xf32>, vector<8x32xf32> -> vector<8x32xf32>
    %490 = vector.broadcast %403 : vector<1x32xf32> to vector<8x32xf32>
    %491 = arith.addf %489, %490 : vector<8x32xf32>
    %492 = arith.addf %395, %491 : vector<8x32xf32>
    %cst_212 = arith.constant dense<0.000000e+00> : vector<8xf32>
    %493 = vector.multi_reduction <add>, %492, %cst_212 [1] : vector<8x32xf32> to vector<8xf32>
    %494 = vector.shape_cast %493 : vector<8xf32> to vector<8x1xf32>
    %cst_213 = arith.constant 3.200000e+01 : f32
    %495 = vector.broadcast %cst_213 : f32 to vector<8x1xf32>
    %496 = arith.divf %494, %495 : vector<8x1xf32>
    %497 = vector.broadcast %496 : vector<8x1xf32> to vector<8x32xf32>
    %498 = arith.subf %492, %497 : vector<8x32xf32>
    %499 = arith.mulf %498, %498 : vector<8x32xf32>
    %cst_214 = arith.constant dense<0.000000e+00> : vector<8xf32>
    %500 = vector.multi_reduction <add>, %499, %cst_214 [1] : vector<8x32xf32> to vector<8xf32>
    %501 = vector.shape_cast %500 : vector<8xf32> to vector<8x1xf32>
    %cst_215 = arith.constant 3.200000e+01 : f32
    %502 = vector.broadcast %cst_215 : f32 to vector<8x1xf32>
    %503 = arith.divf %501, %502 : vector<8x1xf32>
    %504 = vector.broadcast %496 : vector<8x1xf32> to vector<8x32xf32>
    %505 = arith.subf %492, %504 : vector<8x32xf32>
    %cst_216 = arith.constant 9.99999974E-6 : f32
    %506 = vector.broadcast %cst_216 : f32 to vector<8x1xf32>
    %507 = arith.addf %503, %506 : vector<8x1xf32>
    %508 = math.rsqrt %507 : vector<8x1xf32>
    %509 = vector.broadcast %508 : vector<8x1xf32> to vector<8x32xf32>
    %510 = arith.mulf %505, %509 : vector<8x32xf32>
    %511 = vector.broadcast %405 : vector<1x32xf32> to vector<8x32xf32>
    %512 = arith.mulf %510, %511 : vector<8x32xf32>
    %513 = vector.broadcast %407 : vector<1x32xf32> to vector<8x32xf32>
    %514 = arith.addf %512, %513 : vector<8x32xf32>
    %c1_217 = arith.constant 1 : index
    %c0_218 = arith.constant 0 : index
    %c0_219 = arith.constant 0 : index
    %515 = vector.load %arg17[%c1_217, %c0_218, %c0_219] : memref<2x32x64xf32, #tpu.memory_space<vmem>>, vector<1x32x64xf32>
    %516 = vector.shape_cast %515 : vector<1x32x64xf32> to vector<32x64xf32>
    %c1_220 = arith.constant 1 : index
    %c0_221 = arith.constant 0 : index
    %c0_222 = arith.constant 0 : index
    %517 = vector.load %arg18[%c1_220, %c0_221, %c0_222] : memref<2x1x64xf32, #tpu.memory_space<vmem>>, vector<1x1x64xf32>
    %518 = vector.shape_cast %517 : vector<1x1x64xf32> to vector<1x64xf32>
    %c1_223 = arith.constant 1 : index
    %c0_224 = arith.constant 0 : index
    %c0_225 = arith.constant 0 : index
    %519 = vector.load %arg19[%c1_223, %c0_224, %c0_225] : memref<2x64x32xf32, #tpu.memory_space<vmem>>, vector<1x64x32xf32>
    %520 = vector.shape_cast %519 : vector<1x64x32xf32> to vector<64x32xf32>
    %c1_226 = arith.constant 1 : index
    %c0_227 = arith.constant 0 : index
    %c0_228 = arith.constant 0 : index
    %521 = vector.load %arg20[%c1_226, %c0_227, %c0_228] : memref<2x1x32xf32, #tpu.memory_space<vmem>>, vector<1x1x32xf32>
    %522 = vector.shape_cast %521 : vector<1x1x32xf32> to vector<1x32xf32>
    %c1_229 = arith.constant 1 : index
    %c0_230 = arith.constant 0 : index
    %c0_231 = arith.constant 0 : index
    %523 = vector.load %arg21[%c1_229, %c0_230, %c0_231] : memref<2x1x32xf32, #tpu.memory_space<vmem>>, vector<1x1x32xf32>
    %524 = vector.shape_cast %523 : vector<1x1x32xf32> to vector<1x32xf32>
    %c1_232 = arith.constant 1 : index
    %c0_233 = arith.constant 0 : index
    %c0_234 = arith.constant 0 : index
    %525 = vector.load %arg22[%c1_232, %c0_233, %c0_234] : memref<2x1x32xf32, #tpu.memory_space<vmem>>, vector<1x1x32xf32>
    %526 = vector.shape_cast %525 : vector<1x1x32xf32> to vector<1x32xf32>
    %cst_235 = arith.constant dense<0.000000e+00> : vector<8x64xf32>
    %527 = tpu.matmul %514, %516, %cst_235 {dimension_numbers = #tpu.dot_dimension_numbers<[1], [0], [0], [1], [0, 0, 1, 1], [], []>} : vector<8x32xf32>, vector<32x64xf32>, vector<8x64xf32> -> vector<8x64xf32>
    %528 = vector.broadcast %518 : vector<1x64xf32> to vector<8x64xf32>
    %529 = arith.addf %527, %528 : vector<8x64xf32>
    %cst_236 = arith.constant 0.000000e+00 : f32
    %530 = vector.broadcast %cst_236 : f32 to vector<8x64xf32>
    %531 = arith.maximumf %529, %530 : vector<8x64xf32>
    %cst_237 = arith.constant dense<0.000000e+00> : vector<8x32xf32>
    %532 = tpu.matmul %531, %520, %cst_237 {dimension_numbers = #tpu.dot_dimension_numbers<[1], [0], [0], [1], [0, 0, 1, 1], [], []>} : vector<8x64xf32>, vector<64x32xf32>, vector<8x32xf32> -> vector<8x32xf32>
    %533 = vector.broadcast %522 : vector<1x32xf32> to vector<8x32xf32>
    %534 = arith.addf %532, %533 : vector<8x32xf32>
    %535 = arith.addf %514, %534 : vector<8x32xf32>
    %cst_238 = arith.constant dense<0.000000e+00> : vector<8xf32>
    %536 = vector.multi_reduction <add>, %535, %cst_238 [1] : vector<8x32xf32> to vector<8xf32>
    %537 = vector.shape_cast %536 : vector<8xf32> to vector<8x1xf32>
    %cst_239 = arith.constant 3.200000e+01 : f32
    %538 = vector.broadcast %cst_239 : f32 to vector<8x1xf32>
    %539 = arith.divf %537, %538 : vector<8x1xf32>
    %540 = vector.broadcast %539 : vector<8x1xf32> to vector<8x32xf32>
    %541 = arith.subf %535, %540 : vector<8x32xf32>
    %542 = arith.mulf %541, %541 : vector<8x32xf32>
    %cst_240 = arith.constant dense<0.000000e+00> : vector<8xf32>
    %543 = vector.multi_reduction <add>, %542, %cst_240 [1] : vector<8x32xf32> to vector<8xf32>
    %544 = vector.shape_cast %543 : vector<8xf32> to vector<8x1xf32>
    %cst_241 = arith.constant 3.200000e+01 : f32
    %545 = vector.broadcast %cst_241 : f32 to vector<8x1xf32>
    %546 = arith.divf %544, %545 : vector<8x1xf32>
    %547 = vector.broadcast %539 : vector<8x1xf32> to vector<8x32xf32>
    %548 = arith.subf %535, %547 : vector<8x32xf32>
    %cst_242 = arith.constant 9.99999974E-6 : f32
    %549 = vector.broadcast %cst_242 : f32 to vector<8x1xf32>
    %550 = arith.addf %546, %549 : vector<8x1xf32>
    %551 = math.rsqrt %550 : vector<8x1xf32>
    %552 = vector.broadcast %551 : vector<8x1xf32> to vector<8x32xf32>
    %553 = arith.mulf %548, %552 : vector<8x32xf32>
    %554 = vector.broadcast %524 : vector<1x32xf32> to vector<8x32xf32>
    %555 = arith.mulf %553, %554 : vector<8x32xf32>
    %556 = vector.broadcast %526 : vector<1x32xf32> to vector<8x32xf32>
    %557 = arith.addf %555, %556 : vector<8x32xf32>
    %c0_243 = arith.constant 0 : index
    %c0_244 = arith.constant 0 : index
    %c0_245 = arith.constant 0 : index
    %558 = vector.load %arg23[%c0_243, %c0_244, %c0_245] : memref<1x8x32xf32, #tpu.memory_space<vmem>>, vector<1x8x32xf32>
    %559 = vector.shape_cast %558 : vector<1x8x32xf32> to vector<8x32xf32>
    %560 = vector.shape_cast %557 : vector<8x32xf32> to vector<1x8x32xf32>
    tpu.vector_store %arg23[%c0_243, %c0_244, %c0_245], %560 {strides = array<i32>} : memref<1x8x32xf32, #tpu.memory_space<vmem>>, vector<1x8x32xf32>,
    return
  }
  func.func @transform_0(%arg0: i32) -> (i32, i32, i32) {
    %c0_i32 = arith.constant 0 : i32
    %c0_i32_0 = arith.constant 0 : i32
    %c0_i32_1 = arith.constant 0 : i32
    return %arg0, %c0_i32, %c0_i32_0 : i32, i32, i32
  }
  func.func @transform_1(%arg0: i32) -> (i32, i32, i32) {
    %c0_i32 = arith.constant 0 : i32
    %c0_i32_0 = arith.constant 0 : i32
    %c0_i32_1 = arith.constant 0 : i32
    return %arg0, %c0_i32, %c0_i32_0 : i32, i32, i32
  }
  func.func @transform_2(%arg0: i32) -> (i32, i32, i32) {
    %c0_i32 = arith.constant 0 : i32
    %c0_i32_0 = arith.constant 0 : i32
    %c0_i32_1 = arith.constant 0 : i32
    return %arg0, %c0_i32, %c0_i32_0 : i32, i32, i32
  }
  func.func @transform_3(%arg0: i32) -> (i32, i32, i32) {
    %c0_i32 = arith.constant 0 : i32
    %c0_i32_0 = arith.constant 0 : i32
    %c0_i32_1 = arith.constant 0 : i32
    return %arg0, %c0_i32, %c0_i32_0 : i32, i32, i32
  }
  func.func @transform_4(%arg0: i32) -> (i32, i32, i32) {
    %c0_i32 = arith.constant 0 : i32
    %c0_i32_0 = arith.constant 0 : i32
    %c0_i32_1 = arith.constant 0 : i32
    %c0_i32_2 = arith.constant 0 : i32
    return %c0_i32, %c0_i32_0, %c0_i32_1 : i32, i32, i32
  }
  func.func @transform_5(%arg0: i32) -> (i32, i32, i32) {
    %c0_i32 = arith.constant 0 : i32
    %c0_i32_0 = arith.constant 0 : i32
    %c0_i32_1 = arith.constant 0 : i32
    %c0_i32_2 = arith.constant 0 : i32
    return %c0_i32, %c0_i32_0, %c0_i32_1 : i32, i32, i32
  }
  func.func @transform_6(%arg0: i32) -> (i32, i32, i32) {
    %c0_i32 = arith.constant 0 : i32
    %c0_i32_0 = arith.constant 0 : i32
    %c0_i32_1 = arith.constant 0 : i32
    %c0_i32_2 = arith.constant 0 : i32
    return %c0_i32, %c0_i32_0, %c0_i32_1 : i32, i32, i32
  }
  func.func @transform_7(%arg0: i32) -> (i32, i32, i32) {
    %c0_i32 = arith.constant 0 : i32
    %c0_i32_0 = arith.constant 0 : i32
    %c0_i32_1 = arith.constant 0 : i32
    %c0_i32_2 = arith.constant 0 : i32
    return %c0_i32, %c0_i32_0, %c0_i32_1 : i32, i32, i32
  }
  func.func @transform_8(%arg0: i32) -> (i32, i32, i32) {
    %c0_i32 = arith.constant 0 : i32
    %c0_i32_0 = arith.constant 0 : i32
    %c0_i32_1 = arith.constant 0 : i32
    %c0_i32_2 = arith.constant 0 : i32
    return %c0_i32, %c0_i32_0, %c0_i32_1 : i32, i32, i32
  }
  func.func @transform_9(%arg0: i32) -> (i32, i32, i32) {
    %c0_i32 = arith.constant 0 : i32
    %c0_i32_0 = arith.constant 0 : i32
    %c0_i32_1 = arith.constant 0 : i32
    %c0_i32_2 = arith.constant 0 : i32
    return %c0_i32, %c0_i32_0, %c0_i32_1 : i32, i32, i32
  }
  func.func @transform_10(%arg0: i32) -> (i32, i32, i32) {
    %c0_i32 = arith.constant 0 : i32
    %c0_i32_0 = arith.constant 0 : i32
    %c0_i32_1 = arith.constant 0 : i32
    %c0_i32_2 = arith.constant 0 : i32
    return %c0_i32, %c0_i32_0, %c0_i32_1 : i32, i32, i32
  }
  func.func @transform_11(%arg0: i32) -> (i32, i32, i32) {
    %c0_i32 = arith.constant 0 : i32
    %c0_i32_0 = arith.constant 0 : i32
    %c0_i32_1 = arith.constant 0 : i32
    %c0_i32_2 = arith.constant 0 : i32
    return %c0_i32, %c0_i32_0, %c0_i32_1 : i32, i32, i32
  }
  func.func @transform_12(%arg0: i32) -> (i32, i32, i32) {
    %c0_i32 = arith.constant 0 : i32
    %c0_i32_0 = arith.constant 0 : i32
    %c0_i32_1 = arith.constant 0 : i32
    %c0_i32_2 = arith.constant 0 : i32
    return %c0_i32, %c0_i32_0, %c0_i32_1 : i32, i32, i32
  }
  func.func @transform_13(%arg0: i32) -> (i32, i32, i32) {
    %c0_i32 = arith.constant 0 : i32
    %c0_i32_0 = arith.constant 0 : i32
    %c0_i32_1 = arith.constant 0 : i32
    %c0_i32_2 = arith.constant 0 : i32
    return %c0_i32, %c0_i32_0, %c0_i32_1 : i32, i32, i32
  }
  func.func @transform_14(%arg0: i32) -> (i32, i32, i32) {
    %c0_i32 = arith.constant 0 : i32
    %c0_i32_0 = arith.constant 0 : i32
    %c0_i32_1 = arith.constant 0 : i32
    %c0_i32_2 = arith.constant 0 : i32
    return %c0_i32, %c0_i32_0, %c0_i32_1 : i32, i32, i32
  }
  func.func @transform_15(%arg0: i32) -> (i32, i32, i32) {
    %c0_i32 = arith.constant 0 : i32
    %c0_i32_0 = arith.constant 0 : i32
    %c0_i32_1 = arith.constant 0 : i32
    %c0_i32_2 = arith.constant 0 : i32
    return %c0_i32, %c0_i32_0, %c0_i32_1 : i32, i32, i32
  }
  func.func @transform_16(%arg0: i32) -> (i32, i32, i32) {
    %c0_i32 = arith.constant 0 : i32
    %c0_i32_0 = arith.constant 0 : i32
    %c0_i32_1 = arith.constant 0 : i32
    %c0_i32_2 = arith.constant 0 : i32
    return %c0_i32, %c0_i32_0, %c0_i32_1 : i32, i32, i32
  }
  func.func @transform_17(%arg0: i32) -> (i32, i32, i32) {
    %c0_i32 = arith.constant 0 : i32
    %c0_i32_0 = arith.constant 0 : i32
    %c0_i32_1 = arith.constant 0 : i32
    %c0_i32_2 = arith.constant 0 : i32
    return %c0_i32, %c0_i32_0, %c0_i32_1 : i32, i32, i32
  }
  func.func @transform_18(%arg0: i32) -> (i32, i32, i32) {
    %c0_i32 = arith.constant 0 : i32
    %c0_i32_0 = arith.constant 0 : i32
    %c0_i32_1 = arith.constant 0 : i32
    %c0_i32_2 = arith.constant 0 : i32
    return %c0_i32, %c0_i32_0, %c0_i32_1 : i32, i32, i32
  }
  func.func @transform_19(%arg0: i32) -> (i32, i32, i32) {
    %c0_i32 = arith.constant 0 : i32
    %c0_i32_0 = arith.constant 0 : i32
    %c0_i32_1 = arith.constant 0 : i32
    %c0_i32_2 = arith.constant 0 : i32
    return %c0_i32, %c0_i32_0, %c0_i32_1 : i32, i32, i32
  }
  func.func @transform_20(%arg0: i32) -> (i32, i32, i32) {
    %c0_i32 = arith.constant 0 : i32
    %c0_i32_0 = arith.constant 0 : i32
    %c0_i32_1 = arith.constant 0 : i32
    %c0_i32_2 = arith.constant 0 : i32
    return %c0_i32, %c0_i32_0, %c0_i32_1 : i32, i32, i32
  }
  func.func @transform_21(%arg0: i32) -> (i32, i32, i32) {
    %c0_i32 = arith.constant 0 : i32
    %c0_i32_0 = arith.constant 0 : i32
    %c0_i32_1 = arith.constant 0 : i32
    %c0_i32_2 = arith.constant 0 : i32
    return %c0_i32, %c0_i32_0, %c0_i32_1 : i32, i32, i32
  }
  func.func @transform_22(%arg0: i32) -> (i32, i32, i32) {
    %c0_i32 = arith.constant 0 : i32
    %c0_i32_0 = arith.constant 0 : i32
    %c0_i32_1 = arith.constant 0 : i32
    return %arg0, %c0_i32, %c0_i32_0 : i32, i32, i32
  }
}

</mosaic_0001>

<bundles_post_ra>
// kernel: decoder_forward.1
= control target key start
LH: loop header
LB: loop body
LE: loop exit
PB: predicated region body
PF: predicated region fallthrough
CT: control target
= control target key end

     0   :  { %s4020_s0 = inlined_call_operand.vmem [shape: f32[2,8,32], index: 0, kind: input, shape index: {}]   ;;  %s4021_s1 = inlined_call_operand.vmem [shape: f32[2,8,32], index: 1, kind: input, shape index: {}]   ;;  %s4022_s2 = inlined_call_operand.vmem [shape: f32[2,8,8], index: 2, kind: input, shape index: {}]   ;;  %s4023_s3 = inlined_call_operand.vmem [shape: f32[2,8,8], index: 3, kind: input, shape index: {}]   ;;  %s4024_s4 = inlined_call_operand.vmem [shape: f32[2,32,96], index: 4, kind: input, shape index: {}]   ;;  %s4025_s5 = inlined_call_operand.vmem [shape: f32[2,1,96], index: 5, kind: input, shape index: {}]   ;;  %s4026_s6 = inlined_call_operand.vmem [shape: f32[2,32,32], index: 6, kind: input, shape index: {}]   ;;  %s4027_s7 = inlined_call_operand.vmem [shape: f32[2,1,32], index: 7, kind: input, shape index: {}]   ;;  %s4028_s8 = inlined_call_operand.vmem [shape: f32[2,1,32], index: 8, kind: input, shape index: {}]   ;;  %s4029_s9 = inlined_call_operand.vmem [shape: f32[2,1,32], index: 9, kind: input, shape index: {}]   ;;  %s4030_s10 = inlined_call_operand.vmem [shape: f32[2,32,96], index: 10, kind: input, shape index: {}]   ;;  %s4031_s11 = inlined_call_operand.vmem [shape: f32[2,1,96], index: 11, kind: input, shape index: {}]   ;;  %s4032_s12 = inlined_call_operand.vmem [shape: f32[2,32,32], index: 12, kind: input, shape index: {}]   ;;  %s4033_s13 = inlined_call_operand.vmem [shape: f32[2,1,32], index: 13, kind: input, shape index: {}]   ;;  %s4034_s14 = inlined_call_operand.vmem [shape: f32[2,1,32], index: 14, kind: input, shape index: {}]   ;;  %s4035_s15 = inlined_call_operand.vmem [shape: f32[2,1,32], index: 15, kind: input, shape index: {}]   ;;  %s4036_s16 = inlined_call_operand.vmem [shape: f32[2,32,64], index: 16, kind: input, shape index: {}]   ;;  %s4037_s17 = inlined_call_operand.vmem [shape: f32[2,1,64], index: 17, kind: input, shape index: {}]   ;;  %s4038_s18 = inlined_call_operand.vmem [shape: f32[2,64,32], index: 18, kind: input, shape index: {}]   ;;  %s4039_s19 = inlined_call_operand.vmem [shape: f32[2,1,32], index: 19, kind: input, shape index: {}]   ;;  %s4040_s20 = inlined_call_operand.vmem [shape: f32[2,1,32], index: 20, kind: input, shape index: {}]   ;;  %s4041_s21 = inlined_call_operand.vmem [shape: f32[2,1,32], index: 21, kind: input, shape index: {}]   ;;  %s4042_s22 = inlined_call_operand.hbm [shape: f32[2,8,32], index: 22, kind: output, shape index: {}]  }
   0x1   :  { %4086 = sst [smem:[#allocation16_spill]] %s4020_s0 }
   0x2   :  { %4087 = sst [smem:[#allocation17_spill]] %s4021_s1 }
   0x3   :  { %4088 = sst [smem:[#allocation18_spill]] %s4022_s2 }
   0x4   :  { %4089 = sst [smem:[#allocation19_spill]] %s4023_s3 }
   0x5   :  { %4090 = sst [smem:[#allocation20_spill]] %s4024_s4 }
   0x6   :  { %4091 = sst [smem:[#allocation21_spill]] %s4025_s5 }
   0x7   :  { %4092 = sst [smem:[#allocation22_spill]] %s4026_s6 }
   0x8   :  { %4093 = sst [smem:[#allocation23_spill]] %s4027_s7 }
   0x9   :  { %4094 = sst [smem:[#allocation24_spill]] %s4028_s8 }
   0xa   :  { %4095 = sst [smem:[#allocation25_spill]] %s4029_s9 }
   0xb   :  { %4096 = sst [smem:[#allocation26_spill]] %s4030_s10 }
   0xc   :  { %4097 = sst [smem:[#allocation27_spill]] %s4031_s11 }
   0xd   :  { %4098 = sst [smem:[#allocation28_spill]] %s4032_s12 }
   0xe   :  { %4099 = sst [smem:[#allocation29_spill]] %s4033_s13 }
   0xf   :  { %4100 = sst [smem:[#allocation30_spill]] %s4042_s22 }
  0x10   :  { %27 = vsyncpa [#allocation3], 0 }
  0x11   :  { %29 = vsyncpa [#allocation3 + $0x1], 0  ;;  %s3359_s3 = smov 0   ;;  %s3361_s28 = smov 0  }
  0x12   :  { %s3363_s29 = smov 0   ;;  %s3365_s30 = smov 0  }
  0x13 LB: > { %4101 = sst [smem:[#allocation5_spill]] %s3215_s3  ;;  %s3380_s4 = sadd.s32 4294967295, %s3227_s30   ;;  %s3227_s30 = sphi %s3365_s30, %s4160_s30   ;;  %s3223_s29 = sphi %s3363_s29, %s4163_s29   ;;  %s3219_s28 = sphi %s3361_s28, %s4162_s28   ;;  %s3215_s3 = sphi %s3359_s3, %s4161_s3  }
  0x14   : > { %4102 = sst [smem:[#allocation6_spill]] %s3219_s28  ;;  %s2871_s0 = sadd.s32 4294967294, %s3227_s30  }
  0x15   : > { %4103 = sst [smem:[#allocation7_spill]] %s3223_s29  ;;  %s3384_s23 = sadd.s32 1, %s3227_s30  }
  0x16   : > { %4104 = sst [smem:[#allocation8_spill]] %s3227_s30  ;;  %s524_s1 = sadd.s32 1, %s3223_s29 }
  0x17   : > { %4105 = sst [smem:[#allocation9_spill]] %s3380_s4  ;;  %s521_s5 = ssub.s32 %s3227_s30, %s3384_s23 }
  0x18   : > { %4106 = sst [smem:[#allocation10_spill]] %s3384_s23  ;;  %p534_p0 = scmp.ne.s32.totalorder %s3223_s29, %s3219_s28 }
  0x19   : > { %p522_p1 = scmp.eq.s32.totalorder %s521_s5, 0  ;;  %p535_p2 = scmp.eq.s32.totalorder %s3380_s4, 1 }
  0x1a   : > { %p540_p3 = scmp.ne.s32.totalorder %s3219_s28, %s3215_s3  ;;  %p541_p4 = scmp.eq.s32.totalorder %s2871_s0, 1 }
  0x1b   : > { %s3395_s24 = scalar_select %p522_p1, %s3223_s29, %s524_s1  }
  0x1c   : > { %p3397_p5 = por %p535_p2, %p534_p0  ;;  %p3401_p6 = por %p541_p4, %p540_p3 }
  0x1d   : > { %4107 = sst [smem:[#allocation11_spill]] %s3395_s24  ;;  %p2874_p7 = scmp.ge.s32.totalorder %s3227_s30, 1 }
  0x1e   : > { %s4108_s6 = scalar_select %p3397_p5, 1, 0 }
  0x1f   : > { %s4110_s25 = scalar_select %p3401_p6, 1, 0 }
  0x20   : > { %4109 = sst [smem:[#allocation12_spill]] %s4108_s6  ;;  %p641_p8 = scmp.lt.s32.totalorder %s3227_s30, 3 }
  0x21   : > { %4111 = sst [smem:[#allocation13_spill]] %s4110_s25 }
  0x22   : > { %p642_p9 = pnand %p2874_p7, %p641_p8 }
  0x24   : > { %645 = sbr.rel (%p642_p9) target bundleno = 6713 (0x1a39), region = 108 }
  0x29   : > { %s4112_s27 = sld [smem:[#allocation20_spill]]  ;;  %p714_p10 = scmp.lt.s32.totalorder %s3380_s4, 1  ;;  %vm749_vm0 = vcmask 261120   ;;  %vm776_vm1 = vcmask 64512  }
  0x2a   : > { %s4113_s1 = sld [smem:[#allocation16_spill]]  ;;  %s4068_s23 = smov 120  }
  0x2b   : > { %s715_s29 = scalar_select %p714_p10, %s3380_s4, 1 }
  0x2c   : > { %s4114_s30 = sld [smem:[#allocation21_spill]]  ;;  %s4064_s25 = smov 112  }
  0x2d   : > { %s3421_s26 = sshll.u32 %s715_s29, 3  ;;  %s4062_s29 = smov 72  }
  0x2e   : > { %s4060_s2 = smov 88   ;;  %s4066_s0 = smov 104  }
  0x2f   : > { %v737_v0 = vld [vmem:[%s4112_s27 + $0x18] sm:$0xff]  ;;  %v736_v1 = vld [vmem:[%s4112_s27 + $0x10] sm:$0xff]  ;;  %v735_v2 = vld [vmem:[%s4112_s27 + $0x8] sm:$0xff]  ;;  %s4116_s5 = sld [smem:[#allocation18_spill]]  ;;  %s4057_s24 = smov 40  }
  0x30   : > { %765 = vmatpush.msra.mxu0 %v737_v0  ;;  %v734_v3 = vld [vmem:[%s4112_s27] sm:$0xff]  ;;  %s717_s3 = scalar_lea.vmem %s4113_s1, %s3421_s26  ;;  %s4056_s1 = smov 56  }
  0x31   : > { %v3427_v4 = vld [vmem:[%s717_s3] sm:$0xff]  ;;  %s4070_s3 = smov 96   ;;  %s4118_s7 = sld [smem:[#allocation23_spill]] }
  0x32   : > { %766 = vmatpush.msra.mxu0 %v736_v1  ;;  %s4115_s6 = smov %s4114_s30  ;;  %v3060_v5 = vld [vmem:[%s4114_s30] ss:$0 sm:$0xff]  ;;  %s4054_s30 = smov 80  }
  0x33   : > { %s4119_s10 = sld [smem:[#allocation26_spill]]  ;;  %s4132_s22 = smov 88  }
  0x34   : > { %767 = vmatpush.msra.mxu0 %v735_v2  ;;  %s4123_s11 = sld [smem:[#allocation27_spill]]  ;;  %s4135_s4 = smov 8  }
  0x35   : > { %s4124_s8 = sld [smem:[#allocation24_spill]]  ;;  %s4136_s28 = smov 24  }
  0x36   : > { %768 = vmatpush.msra.mxu0 %v734_v3  ;;  %s4125_s9 = sld [smem:[#allocation25_spill]] }
  0x37   : > { %2880 = vmatmul.msk.f32.vlgmr.msra.gmra.mxu0 %vm749_vm0, %v3427_v4  ;;  %s4137_s12 = sld [smem:[#allocation28_spill]] }
  0x38   : > { %s4138_s13 = sld [smem:[#allocation29_spill]] }
  0xb4   : > { %v770_v6 = vpop.f32.mrf.mxu0 }
  0xb5   : > { %v3434_v7 = vadd.f32 %v3060_v5, %v770_v6 }
  0xb7   : > { %1015 = vrot.lane.b32.xlu2 %v3434_v7, %s4062_s29  ;;  %853 = vrot.lane.b32.xlu1 %v3434_v7, %s4068_s23  ;;  %s4133_s29 = smov 80  }
  0xb8   : > { %774 = vrot.lane.b32.xlu0 %v3434_v7, %s4070_s3  ;;  %s4121_s3 = sld [smem:[#allocation17_spill]] }
  0xbf   : > { %933 = vrot.lane.b32.xlu2 %v3434_v7, %s4064_s25  ;;  %935 = vrot.lane.b32.xlu1 %v3434_v7, %s4054_s30  ;;  %s3463_s30 = scalar_lea.vmem %s4116_s5, %s3421_s26  ;;  %s4059_s5 = smov 64  }
  0xc0   : > { %855 = vrot.lane.b32.xlu0 %v3434_v7, %s4060_s2  ;;  %v732_v15 = vld [vmem:[%s3463_s30] sm:$0xff]  ;;  %s4117_s25 = sld [smem:[#allocation22_spill]]  ;;  %s3551_s2 = scalar_lea.vmem %s4121_s3, %s3421_s26 }
  0xc1   : > { %4122 = sst [smem:[#allocation14_spill]] %s3551_s2  ;;  %s4126_s3 = smov 120  }
  0xc8   : > { %1013 = vrot.lane.b32.xlu0 %v3434_v7, %s4066_s0  ;;  %s4127_s0 = smov 104  }
 0x111   : > { %v1016_v10 = vpop.permute.xlu2 %1015 }
 0x119   : > { %v934_v13 = vpop.permute.xlu2 %933 }
 0x129   : > { %v854_v8 = vpop.permute.xlu1 %853 }
 0x12a   : > { %v775_v9 = vpop.permute.xlu0 %774 }
 0x12b   : > { %2881 = vmatpush.xpose.msk.msra.mxu1 %vm776_vm1, %v775_v9 }
 0x12e   : > { %2882 = vmatmul.msk.f32.vlgmr.msra.gmra.mxu1 %vm776_vm1, %v3434_v7 }
 0x131   : > { %v936_v11 = vpop.permute.xlu1 %935 }
 0x132   : > { %v856_v12 = vpop.permute.xlu0 %855  ;;  %2887 = vmatpush.xpose.msk.msrb.mxu1 %vm776_vm1, %v936_v11 }
 0x133   : > { %2884 = vmatpush.xpose.msk.msrb.mxu0 %vm776_vm1, %v856_v12 }
 0x136   : > { %2885 = vmatmul.msk.f32.vlgmr.msrb.gmra.mxu0 %vm776_vm1, %v854_v8  ;;  %2888 = vmatmul.msk.f32.vlgmr.msrb.gmra.mxu1 %vm776_vm1, %v934_v13 }
 0x137   : > { %2890 = vmatpush.xpose.msk.msra.mxu0 %vm776_vm1, %v1016_v10 }
 0x13a   : > { %v1014_v14 = vpop.permute.xlu0 %1013 }
 0x13e   : > { %2891 = vmatmul.msk.f32.vlgmr.msra.gmra.mxu0 %vm776_vm1, %v1014_v14 }
 0x1ab   : > { %v798_v16 = vpop.f32.mrf.mxu1 }
 0x1ac   : > { %v801_v17 = vmul.f32 0.35355338, %v798_v16 }
 0x1ae   : > { %v802_v18 = vadd.f32 %v801_v17, %v732_v15 }
 0x1b0   : > { %v803_v19 = vsel %vm776_vm1, %v802_v18, -inf }
 0x1b1   : > { %804 = vmax.xlane.f32.xlu1 %v803_v19 }
 0x1b3   : > { %v878_v20 = vpop.f32.mrf.mxu0  ;;  %v958_v21 = vpop.f32.mrf.mxu1 }
 0x1b4   : > { %v881_v22 = vmul.f32 0.35355338, %v878_v20  ;;  %v961_v23 = vmul.f32 0.35355338, %v958_v21 }
 0x1b6   : > { %v962_v24 = vadd.f32 %v961_v23, %v732_v15  ;;  %v882_v25 = vadd.f32 %v881_v22, %v732_v15 }
 0x1b8   : > { %v963_v26 = vsel %vm776_vm1, %v962_v24, -inf  ;;  %v883_v27 = vsel %vm776_vm1, %v882_v25, -inf }
 0x1b9   : > { %964 = vmax.xlane.f32.xlu0 %v963_v26  ;;  %884 = vmax.xlane.f32.xlu2 %v883_v27 }
 0x1bb   : > { %v1038_v28 = vpop.f32.mrf.mxu0 }
 0x1bc   : > { %v1041_v29 = vmul.f32 0.35355338, %v1038_v28 }
 0x1be   : > { %v1042_v30 = vadd.f32 %v1041_v29, %v732_v15 }
 0x1c0   : > { %v1043_v31 = vsel %vm776_vm1, %v1042_v30, -inf }
 0x1c1   : > { %1044 = vmax.xlane.f32.xlu2 %v1043_v31 }
 0x1cd   : > { %907 = vrot.lane.b32.xlu0 %v3434_v7, %s4056_s1  ;;  %s4058_s1 = smov 48  }
 0x224   : > { %v805_v32 = vpop.xlane.xlu1 %804 }
 0x225   : > { %v806_v33 = vsub.f32 %v802_v18, %v805_v32 }
 0x227   : > { %v807_v34 = vmul.f32 1.442695, %v806_v33 }
 0x229   : > { %3084 = vpow2.f32 %v807_v34 }
 0x22c   : > { %v885_v35 = vpop.xlane.xlu2 %884  ;;  %v965_v36 = vpop.xlane.xlu0 %964 }
 0x22d   : > { %v886_v37 = vsub.f32 %v882_v25, %v885_v35  ;;  %v966_v38 = vsub.f32 %v962_v24, %v965_v36 }
 0x22f   : > { %v3085_v39 = vpop.eup %3084  ;;  %v887_v40 = vmul.f32 1.442695, %v886_v37  ;;  %v967_v41 = vmul.f32 1.442695, %v966_v38 }
 0x230   : > { %v809_v42 = vsel %vm776_vm1, %v3085_v39, 0.0 }
 0x231   : > { %3086 = vpow2.f32 %v887_v40  ;;  %810 = vadd.xlane.f32.xlu1 %v809_v42 }
 0x232   : > { %3088 = vpow2.f32 %v967_v41 }
 0x234   : > { %v1045_v43 = vpop.xlane.xlu2 %1044 }
 0x235   : > { %v1046_v44 = vsub.f32 %v1042_v30, %v1045_v43 }
 0x237   : > { %v3473_v45 = vpop.eup %3086  ;;  %v1047_v46 = vmul.f32 1.442695, %v1046_v44 }
 0x238   : > { %v3475_v47 = vpop.eup %3088  ;;  %v889_v48 = vsel %vm776_vm1, %v3473_v45, 0.0 }
 0x239   : > { %3090 = vpow2.f32 %v1047_v46  ;;  %890 = vadd.xlane.f32.xlu2 %v889_v48  ;;  %v969_v49 = vsel %vm776_vm1, %v3475_v47, 0.0  ;;  %v741_v46 = vld [vmem:[%s4117_s25 + $0x10] sm:$0xff]  ;;  %v739_v48 = vld [vmem:[%s4117_s25] sm:$0xff] }
 0x23a   : > { %970 = vadd.xlane.f32.xlu0 %v969_v49 }
 0x23f   : > { %v3481_v50 = vpop.eup %3090  ;;  %v908_v53 = vpop.permute.xlu0 %907 }
 0x240   : > { %v1049_v51 = vsel %vm776_vm1, %v3481_v50, 0.0 }
 0x241   : > { %1050 = vadd.xlane.f32.xlu1 %v1049_v51 }
 0x24e   : > { %1067 = vrot.lane.b32.xlu0 %v3434_v7, %s4057_s24  ;;  %s4075_s24 = smov 8  }
 0x251   : > { %827 = vrot.lane.b32.xlu2 %v3434_v7, %s4059_s5  ;;  %s4077_s5 = smov 16  }
 0x25a   : > { %987 = vrot.lane.b32.xlu1 %v3434_v7, %s4058_s1  ;;  %s4073_s1 = smov 24  }
 0x2a4   : > { %v811_v52 = vpop.xlane.xlu1 %810 }
 0x2a5   : > { %3092 = vrcp.f32 %v811_v52  ;;  %v823_v60 = vand.u32 2147483648, %v811_v52  ;;  %v821_v61 = vand.u32 2147483647, %v811_v52  ;;  %vm817_vm3 = vweird.f32 %v811_v52 }
 0x2a7   : > { %v824_v1 = vor.u32 1.1754944e-38, %v823_v60  ;;  %vm822_vm5 = vcmp.eq.f32.partialorder %v821_v61, 8.507059e+37  ;;  %v3243_v60 = vmov 32.0   ;;  %v1176_v61 = vld [vmem:[%s4119_s10 + $0x10] sm:$0xff] }
 0x2ab   : > { %v3093_v54 = vpop.eup %3092 }
 0x2ac   : > { %v813_v55 = vmul.f32 %v3093_v54, %v811_v52  ;;  %v891_v56 = vpop.xlane.xlu2 %890  ;;  %vm818_vm2 = vweird.f32 %v3093_v54 }
 0x2ad   : > { %3094 = vrcp.f32 %v891_v56  ;;  %v3491_v57 = vpop.xlane.xlu0 %970  ;;  %vm819_vm4 = vmor %vm817_vm3, %vm818_vm2  ;;  %v903_v10 = vand.u32 2147483648, %v891_v56  ;;  %v901_v13 = vand.u32 2147483647, %v891_v56  ;;  %vm897_vm7 = vweird.f32 %v891_v56 }
 0x2ae   : > { %v814_v58 = vsub.f32 1.0, %v813_v55  ;;  %3096 = vrcp.f32 %v3491_v57  ;;  %v983_v30 = vand.u32 2147483648, %v3491_v57  ;;  %vm977_vm14 = vweird.f32 %v3491_v57  ;;  %v3061_v55 = vld [vmem:[%s4118_s7] ss:$0 sm:$0xff] }
 0x2af   : > { %v904_v17 = vor.u32 1.1754944e-38, %v903_v10  ;;  %vm902_vm9 = vcmp.eq.f32.partialorder %v901_v13, 8.507059e+37  ;;  %v981_v33 = vand.u32 2147483647, %v3491_v57 }
 0x2b0   : > { %v815_v59 = vmul.f32 %v3093_v54, %v814_v58  ;;  %v984_v37 = vor.u32 1.1754944e-38, %v983_v30 }
 0x2b1   : > { %vm982_vm3 = vcmp.eq.f32.partialorder %v981_v33, 8.507059e+37 }
 0x2b2   : > { %v816_v62 = vadd.f32 %v3093_v54, %v815_v59 }
 0x2b3   : > { %v3095_v63 = vpop.eup %3094 }
 0x2b4   : > { %v3097_v0 = vpop.eup %3096  ;;  %v893_v2 = vmul.f32 %v3095_v63, %v891_v56  ;;  %v1051_v3 = vpop.xlane.xlu1 %1050  ;;  %v820_v6 = vsel %vm819_vm4, %v3093_v54, %v816_v62  ;;  %vm898_vm6 = vweird.f32 %v3095_v63  ;;  %vm1106_vm4 = vcmask 130048   ;;  %v1177_v62 = vld [vmem:[%s4119_s10 + $0x18] sm:$0xff] }
 0x2b5   : > { %v828_v5 = vpop.permute.xlu2 %827  ;;  %3098 = vrcp.f32 %v1051_v3  ;;  %v973_v8 = vmul.f32 %v3097_v0, %v3491_v57  ;;  %v825_v9 = vsel %vm822_vm5, %v824_v1, %v820_v6  ;;  %vm899_vm8 = vmor %vm897_vm7, %vm898_vm6  ;;  %v1063_v24 = vand.u32 2147483648, %v1051_v3  ;;  %v1175_v1 = vld [vmem:[%s4119_s10 + $0x8] sm:$0xff] }
 0x2b6   : > { %848 = vmatpush.msra.mxu2 %v828_v5  ;;  %v894_v7 = vsub.f32 1.0, %v893_v2  ;;  %v826_v11 = vmul.f32 %v3085_v39, %v825_v9  ;;  %v1061_v26 = vand.u32 2147483647, %v1051_v3  ;;  %vm1057_vm11 = vweird.f32 %v1051_v3 }
 0x2b7   : > { %v974_v15 = vsub.f32 1.0, %v973_v8  ;;  %vm978_vm12 = vweird.f32 %v3097_v0  ;;  %v1064_v31 = vor.u32 1.1754944e-38, %v1063_v24  ;;  %vm1108_vm5 = vcmask 195584  }
 0x2b8   : > { %928 = vmatpush.msrb.mxu2 %v908_v53  ;;  %v895_v12 = vmul.f32 %v3095_v63, %v894_v7  ;;  %vm1062_vm15 = vcmp.eq.f32.partialorder %v1061_v26, 8.507059e+37  ;;  %vm979_vm2 = vmor %vm977_vm14, %vm978_vm12  ;;  %3100 = vrcp.f32 %v3243_v60 }
 0x2b9   : > { %2883 = vmatmul.msk.f32.vlgmr.msra.gmra.mxu2 %vm776_vm1, %v826_v11  ;;  %v975_v21 = vmul.f32 %v3097_v0, %v974_v15 }
 0x2ba   : > { %v896_v14 = vadd.f32 %v3095_v63, %v895_v12 }
 0x2bb   : > { %v3099_v16 = vpop.eup %3098  ;;  %v976_v29 = vadd.f32 %v3097_v0, %v975_v21  ;;  %v3064_v21 = vld [vmem:[%s4123_s11] ss:$0 sm:$0xff]  ;;  %s4152_s11 = sld [smem:[#allocation29_spill]] }
 0x2bc   : > { %v1053_v18 = vmul.f32 %v3099_v16, %v1051_v3  ;;  %v900_v19 = vsel %vm899_vm8, %v3095_v63, %v896_v14  ;;  %vm1058_vm10 = vweird.f32 %v3099_v16  ;;  %v3040_v63 = vpack.i.bf16 %v1176_v61, %v1177_v62 }
 0x2bd   : > { %v905_v20 = vsel %vm902_vm9, %v904_v17, %v900_v19  ;;  %vm1059_vm13 = vmor %vm1057_vm11, %vm1058_vm10  ;;  %v980_v36 = vsel %vm979_vm2, %v3097_v0, %v976_v29 }
 0x2be   : > { %v1054_v22 = vsub.f32 1.0, %v1053_v18  ;;  %v906_v23 = vmul.f32 %v3473_v45, %v905_v20  ;;  %v985_v38 = vsel %vm982_vm3, %v984_v37, %v980_v36  ;;  %v742_v45 = vld [vmem:[%s4117_s25 + $0x18] sm:$0xff]  ;;  %v3101_v0 = vpop.eup %3100  ;;  %v731_v20 = vld [vmem:[%s3551_s2] sm:$0xff]  ;;  %s4155_s2 = sld [smem:[#allocation30_spill]] }
 0x2bf   : > { %v986_v40 = vmul.f32 %v3475_v47, %v985_v38  ;;  %1128 = vmatpush.msra.mxu1 %v742_v45  ;;  %v740_v47 = vld [vmem:[%s4117_s25 + $0x8] sm:$0xff]  ;;  %v1141_v2 = vmul.f32 32.0, %v3101_v0  ;;  %vm1145_vm6 = vweird.f32 %v3101_v0  ;;  %s4145_s25 = sld [smem:[#allocation26_spill]] }
 0x2c0   : > { %v1055_v25 = vmul.f32 %v3099_v16, %v1054_v22  ;;  %v1068_v27 = vpop.permute.xlu0 %1067 }
 0x2c1   : > { %2886 = vmatmul.msk.f32.vlgmr.msrb.gmra.mxu2 %vm776_vm1, %v906_v23  ;;  %1129 = vmatpush.msra.mxu1 %v741_v46  ;;  %v1142_v5 = vsub.f32 1.0, %v1141_v2 }
 0x2c2   : > { %v1056_v28 = vadd.f32 %v3099_v16, %v1055_v25  ;;  %1088 = vmatpush.msra.mxu2 %v1068_v27 }
 0x2c3   : > { %1130 = vmatpush.msra.mxu1 %v740_v47  ;;  %v1143_v6 = vmul.f32 %v3101_v0, %v1142_v5 }
 0x2c4   : > { %v1060_v32 = vsel %vm1059_vm13, %v3099_v16, %v1056_v28 }
 0x2c5   : > { %v1065_v34 = vsel %vm1062_vm15, %v1064_v31, %v1060_v32  ;;  %1131 = vmatpush.msra.mxu1 %v739_v48  ;;  %v1144_v7 = vadd.f32 %v3101_v0, %v1143_v6  ;;  %v3062_v31 = vld [vmem:[%s4124_s8] ss:$0 sm:$0xff]  ;;  %s4142_s8 = smov 40  }
 0x2c6   : > { %v1066_v35 = vmul.f32 %v3481_v50, %v1065_v34  ;;  %v3063_v34 = vld [vmem:[%s4125_s9] ss:$0 sm:$0xff]  ;;  %s4144_s9 = sld [smem:[#allocation23_spill]] }
 0x2c7   : > { %v3543_v8 = vsel %vm1145_vm6, %v3101_v0, %v1144_v7 }
 0x2c9   : > { %2892 = vmatmul.msk.f32.vlgmr.msra.gmra.mxu2 %vm776_vm1, %v1066_v35 }
 0x2cc   : > { %v988_v39 = vpop.permute.xlu1 %987 }
 0x2cd   : > { %1008 = vmatpush.msra.mxu3 %v988_v39 }
 0x2ce   : > { %2889 = vmatmul.msk.f32.vlgmr.msra.gmra.mxu3 %vm776_vm1, %v986_v40 }
 0x2cf   : > { %1204 = vmatpush.msrb.mxu3 %v1177_v62 }
 0x2d1   : > { %1205 = vmatpush.msrb.mxu3 %v1176_v61 }
 0x2d3   : > { %1206 = vmatpush.msrb.mxu3 %v1175_v1 }
 0x33c   : > { %v850_v41 = vpop.f32.mrf.mxu2 }
 0x344   : > { %v930_v42 = vpop.f32.mrf.mxu2 }
 0x345   : > { %1094 = vrot.lane.b32.xlu2 %v930_v42, %s4075_s24  ;;  %s4128_s24 = smov 112  }
 0x34c   : > { %v1090_v43 = vpop.f32.mrf.mxu2 }
 0x34d   : > { %1102 = vrot.lane.b32.xlu0 %v1090_v43, %s4073_s1  ;;  %s4120_s1 = smov 96  }
 0x351   : > { %v1010_v44 = vpop.f32.mrf.mxu3 }
 0x352   : > { %1098 = vrot.lane.b32.xlu1 %v1010_v44, %s4077_s5  ;;  %s4129_s5 = sld [smem:[#allocation19_spill]] }
 0x355   : > { %3041 = vrot.lane.b32.xlu0 %v3040_v63, %s4120_s1 }
 0x358   : > { %s3593_s23 = scalar_lea.vmem %s4129_s5, %s3421_s26  ;;  %s4131_s26 = smov 72  }
 0x359   : > { %4130 = sst [smem:[#allocation15_spill]] %s3593_s23  ;;  %v733_v48 = vld [vmem:[%s3593_s23] sm:$0xff]  ;;  %s4134_s5 = smov 16  }
 0x39f   : > { %v1095_v49 = vpop.permute.xlu2 %1094 }
 0x3a0   : > { %v1105_v50 = vsel %vm776_vm1, %v850_v41, %v1095_v49 }
 0x3bf   : > { %v1103_v52 = vpop.permute.xlu0 %1102 }
 0x3c4   : > { %v1099_v51 = vpop.permute.xlu1 %1098 }
 0x3c5   : > { %v1107_v53 = vsel %vm1106_vm4, %v1105_v50, %v1099_v51 }
 0x3c6   : > { %v1109_v54 = vsel %vm1108_vm5, %v1107_v53, %v1103_v52 }
 0x3c7   : > { %2893 = vmatmul.msk.f32.vlgmr.msra.gmra.mxu1 %vm749_vm0, %v1109_v54  ;;  %v3042_v14 = vpop.permute.xlu0 %3041 }
 0x3c8   : > { %v3043_v15 = vunpack.i.l.bf16 %v3042_v14  ;;  %v3044_v16 = vunpack.i.h.bf16 %v3042_v14 }
 0x3ca   : > { %1246 = vmatpush.msrb.mxu0 %v3043_v15 }
 0x3cc   : > { %1247 = vmatpush.msrb.mxu0 %v3044_v16 }
 0x444   : > { %v1133_v56 = vpop.f32.mrf.mxu1 }
 0x445   : > { %v1134_v57 = vadd.f32 %v3061_v55, %v1133_v56 }
 0x447   : > { %v1136_v58 = vadd.f32 %v1134_v57, %v3427_v4  ;;  %v1174_v4 = vld [vmem:[%s4119_s10] sm:$0xff]  ;;  %s4143_s10 = sld [smem:[#allocation22_spill]] }
 0x448   : > { %v3045_v3 = vpack.i.bf16 %v1174_v4, %v1175_v1  ;;  %1207 = vmatpush.msrb.mxu3 %v1174_v4 }
 0x449   : > { %v1137_v59 = vsel %vm749_vm0, %v1136_v58, 0.0 }
 0x44a   : > { %1138 = vadd.xlane.f32.xlu2 %v1137_v59  ;;  %3046 = vrot.lane.b32.xlu0 %v3045_v3, %s4120_s1 }
 0x452   : > { %1228 = vrot.lane.b32.xlu0 %v3064_v21, %s4120_s1 }
 0x4bc   : > { %v3047_v17 = vpop.permute.xlu0 %3046 }
 0x4bd   : > { %v1139_v9 = vpop.xlane.xlu2 %1138  ;;  %v3048_v18 = vunpack.i.l.bf16 %v3047_v17  ;;  %v3049_v19 = vunpack.i.h.bf16 %v3047_v17 }
 0x4be   : > { %v1147_v10 = vmul.f32 %v3543_v8, %v1139_v9 }
 0x4bf   : > { %1248 = vmatpush.msrb.mxu0 %v3048_v18 }
 0x4c0   : > { %v1148_v11 = vsub.f32 %v1136_v58, %v1147_v10 }
 0x4c1   : > { %1249 = vmatpush.msrb.mxu0 %v3049_v19 }
 0x4c2   : > { %v1149_v12 = vmul.f32 %v1148_v11, %v1148_v11  ;;  %2895 = vmatmul.msk.f32.vlgmr.msrb.gmra.mxu0 %vm749_vm0, %v731_v20 }
 0x4c4   : > { %v1150_v13 = vsel %vm749_vm0, %v1149_v12, 0.0  ;;  %v1229_v37 = vpop.permute.xlu0 %1228 }
 0x4c5   : > { %1151 = vadd.xlane.f32.xlu1 %v1150_v13 }
 0x538   : > { %v1152_v22 = vpop.xlane.xlu1 %1151 }
 0x539   : > { %v1153_v23 = vmul.f32 %v1152_v22, %v3543_v8 }
 0x53b   : > { %v1154_v24 = vadd.f32 1e-05, %v1153_v23 }
 0x53d   : > { %3102 = vrsqrt.f32 %v1154_v24  ;;  %vm1161_vm8 = vweird.f32 %v1154_v24 }
 0x53f   : > { %v1251_v38 = vpop.f32.mrf.mxu0 }
 0x540   : > { %v3570_v39 = vadd.f32 %v1251_v38, %v1229_v37 }
 0x542   : > { %1334 = vrot.lane.b32.xlu0 %v3570_v39, %s4126_s3  ;;  %1494 = vrot.lane.b32.xlu1 %v3570_v39, %s4127_s0 }
 0x543   : > { %v3103_v25 = vpop.eup %3102  ;;  %1414 = vrot.lane.b32.xlu2 %v3570_v39, %s4128_s24  ;;  %2896 = vmatpush.xpose.msk.msrb.mxu2 %vm776_vm1, %v3570_v39 }
 0x544   : > { %v1156_v26 = vmul.f32 %v3103_v25, %v1154_v24  ;;  %vm1162_vm7 = vweird.f32 %v3103_v25 }
 0x545   : > { %vm1163_vm9 = vmor %vm1161_vm8, %vm1162_vm7 }
 0x546   : > { %v1157_v27 = vmul.f32 %v3103_v25, %v1156_v26 }
 0x548   : > { %v1158_v28 = vmul.f32 0.5, %v1157_v27 }
 0x54a   : > { %v1159_v29 = vsub.f32 1.5, %v1158_v28 }
 0x54c   : > { %v1160_v30 = vmul.f32 %v3103_v25, %v1159_v29 }
 0x54e   : > { %v1164_v32 = vsel %vm1163_vm9, %v3103_v25, %v1160_v30 }
 0x54f   : > { %v1165_v33 = vmul.f32 %v1164_v32, %v1148_v11 }
 0x551   : > { %v1169_v35 = vmul.f32 %v3062_v31, %v1165_v33 }
 0x553   : > { %v3566_v36 = vadd.f32 %v3063_v34, %v1169_v35 }
 0x555   : > { %2894 = vmatmul.msk.f32.vlgmr.msrb.gmra.mxu3 %vm749_vm0, %v3566_v36 }
 0x59d   : > { %v1415_v42 = vpop.permute.xlu2 %1414 }
 0x59e   : > { %2902 = vmatpush.xpose.msk.msra.mxu2 %vm776_vm1, %v1415_v42 }
 0x5b4   : > { %v1335_v43 = vpop.permute.xlu0 %1334  ;;  %v1495_v44 = vpop.permute.xlu1 %1494 }
 0x5b5   : > { %2899 = vmatpush.xpose.msk.msra.mxu3 %vm776_vm1, %v1335_v43 }
 0x5b9   : > { %2905 = vmatpush.xpose.msk.msrb.mxu3 %vm776_vm1, %v1495_v44 }
 0x5d8   : > { %v1209_v40 = vpop.f32.mrf.mxu3 }
 0x5d9   : > { %v1210_v41 = vadd.f32 %v3064_v21, %v1209_v40 }
 0x5db   : > { %1332 = vrot.lane.b32.xlu0 %v1210_v41, %s4126_s3  ;;  %2897 = vmatmul.msk.f32.vlgmr.msrb.gmra.mxu2 %vm776_vm1, %v1210_v41 }
 0x5e3   : > { %1412 = vrot.lane.b32.xlu0 %v1210_v41, %s4128_s24 }
 0x5eb   : > { %1492 = vrot.lane.b32.xlu0 %v1210_v41, %s4127_s0 }
 0x64d   : > { %v1333_v45 = vpop.permute.xlu0 %1332 }
 0x64e   : > { %2900 = vmatmul.msk.f32.vlgmr.msra.gmra.mxu3 %vm776_vm1, %v1333_v45 }
 0x655   : > { %v1413_v46 = vpop.permute.xlu0 %1412 }
 0x656   : > { %2903 = vmatmul.msk.f32.vlgmr.msra.gmra.mxu2 %vm776_vm1, %v1413_v46 }
 0x65d   : > { %v1493_v47 = vpop.permute.xlu0 %1492 }
 0x65e   : > { %v1277_v49 = vpop.f32.mrf.mxu2  ;;  %2906 = vmatmul.msk.f32.vlgmr.msrb.gmra.mxu3 %vm776_vm1, %v1493_v47 }
 0x65f   : > { %v1280_v50 = vmul.f32 0.35355338, %v1277_v49 }
 0x661   : > { %v1281_v51 = vadd.f32 %v1280_v50, %v733_v48 }
 0x663   : > { %v1282_v52 = vsel %vm776_vm1, %v1281_v51, -inf }
 0x664   : > { %1283 = vmax.xlane.f32.xlu0 %v1282_v52 }
 0x6d1   : > { %v1357_v53 = vpop.f32.mrf.mxu3 }
 0x6d2   : > { %v1360_v54 = vmul.f32 0.35355338, %v1357_v53 }
 0x6d4   : > { %v1361_v55 = vadd.f32 %v1360_v54, %v733_v48 }
 0x6d6   : > { %v1362_v56 = vsel %vm776_vm1, %v1361_v55, -inf }
 0x6d7   : > { %1363 = vmax.xlane.f32.xlu2 %v1362_v56  ;;  %v1284_v57 = vpop.xlane.xlu0 %1283 }
 0x6d8   : > { %v1285_v58 = vsub.f32 %v1281_v51, %v1284_v57 }
 0x6d9   : > { %v1437_v59 = vpop.f32.mrf.mxu2 }
 0x6da   : > { %v1286_v60 = vmul.f32 1.442695, %v1285_v58  ;;  %v1440_v61 = vmul.f32 0.35355338, %v1437_v59 }
 0x6dc   : > { %3104 = vpow2.f32 %v1286_v60  ;;  %v1441_v62 = vadd.f32 %v1440_v61, %v733_v48 }
 0x6de   : > { %v1442_v63 = vsel %vm776_vm1, %v1441_v62, -inf }
 0x6df   : > { %1443 = vmax.xlane.f32.xlu1 %v1442_v63 }
 0x6e1   : > { %v1517_v0 = vpop.f32.mrf.mxu3 }
 0x6e2   : > { %v3105_v4 = vpop.eup %3104  ;;  %v1520_v1 = vmul.f32 0.35355338, %v1517_v0 }
 0x6e3   : > { %v1288_v2 = vsel %vm776_vm1, %v3105_v4, 0.0 }
 0x6e4   : > { %1289 = vadd.xlane.f32.xlu2 %v1288_v2  ;;  %v1521_v3 = vadd.f32 %v1520_v1, %v733_v48 }
 0x6e6   : > { %v1522_v5 = vsel %vm776_vm1, %v1521_v3, -inf }
 0x6e7   : > { %1523 = vmax.xlane.f32.xlu0 %v1522_v5 }
 0x6fb   : > { %1306 = vrot.lane.b32.xlu0 %v3570_v39, %s4120_s1 }
 0x74a   : > { %v1364_v6 = vpop.xlane.xlu2 %1363 }
 0x74b   : > { %v1365_v7 = vsub.f32 %v1361_v55, %v1364_v6 }
 0x74d   : > { %v1366_v9 = vmul.f32 1.442695, %v1365_v7 }
 0x74f   : > { %3106 = vpow2.f32 %v1366_v9 }
 0x752   : > { %v1444_v10 = vpop.xlane.xlu1 %1443 }
 0x753   : > { %v1445_v11 = vsub.f32 %v1441_v62, %v1444_v10 }
 0x755   : > { %v3604_v12 = vpop.eup %3106  ;;  %v1446_v13 = vmul.f32 1.442695, %v1445_v11 }
 0x756   : > { %v1368_v14 = vsel %vm776_vm1, %v3604_v12, 0.0 }
 0x757   : > { %3108 = vpow2.f32 %v1446_v13  ;;  %1369 = vadd.xlane.f32.xlu0 %v1368_v14  ;;  %v1290_v15 = vpop.xlane.xlu2 %1289 }
 0x758   : > { %3110 = vrcp.f32 %v1290_v15  ;;  %v1302_v25 = vand.u32 2147483648, %v1290_v15  ;;  %vm1296_vm11 = vweird.f32 %v1290_v15  ;;  %v1300_v28 = vand.u32 2147483647, %v1290_v15 }
 0x75a   : > { %v1524_v16 = vpop.xlane.xlu0 %1523  ;;  %v1303_v31 = vor.u32 1.1754944e-38, %v1302_v25  ;;  %vm1301_vm13 = vcmp.eq.f32.partialorder %v1300_v28, 8.507059e+37 }
 0x75b   : > { %v1525_v17 = vsub.f32 %v1521_v3, %v1524_v16  ;;  %v1182_v16 = vld [vmem:[%s4137_s12 + $0x18] sm:$0xff] }
 0x75c   : > { %1605 = vmatpush.msrb.mxu2 %v1182_v16  ;;  %v2912_v16 = vld [vmem:[%s4112_s27 + $0x28] sm:$0xff] }
 0x75d   : > { %v3608_v18 = vpop.eup %3108  ;;  %v1526_v19 = vmul.f32 1.442695, %v1525_v17  ;;  %v1181_v17 = vld [vmem:[%s4137_s12 + $0x10] sm:$0xff] }
 0x75e   : > { %v3111_v20 = vpop.eup %3110  ;;  %v1448_v21 = vsel %vm776_vm1, %v3608_v18, 0.0  ;;  %1606 = vmatpush.msrb.mxu2 %v1181_v17  ;;  %v2911_v17 = vld [vmem:[%s4112_s27 + $0x20] sm:$0xff] }
 0x75f   : > { %v1292_v22 = vmul.f32 %v3111_v20, %v1290_v15  ;;  %3112 = vpow2.f32 %v1526_v19  ;;  %1449 = vadd.xlane.f32.xlu1 %v1448_v21  ;;  %vm1297_vm10 = vweird.f32 %v3111_v20  ;;  %v1179_v19 = vld [vmem:[%s4137_s12] sm:$0xff] }
 0x760   : > { %vm1298_vm12 = vmor %vm1296_vm11, %vm1297_vm10 }
 0x761   : > { %v1293_v23 = vsub.f32 1.0, %v1292_v22 }
 0x763   : > { %v1294_v24 = vmul.f32 %v3111_v20, %v1293_v23 }
 0x765   : > { %v3612_v26 = vpop.eup %3112  ;;  %v1295_v27 = vadd.f32 %v3111_v20, %v1294_v24 }
 0x766   : > { %v1528_v29 = vsel %vm776_vm1, %v3612_v26, 0.0 }
 0x767   : > { %v1299_v30 = vsel %vm1298_vm12, %v3111_v20, %v1295_v27  ;;  %1529 = vadd.xlane.f32.xlu2 %v1528_v29 }
 0x768   : > { %v1304_v32 = vsel %vm1301_vm13, %v1303_v31, %v1299_v30 }
 0x769   : > { %v1305_v34 = vmul.f32 %v3105_v4, %v1304_v32 }
 0x76b   : > { %1546 = vrot.lane.b32.xlu0 %v3570_v39, %s4131_s26 }
 0x76d   : > { %v1307_v33 = vpop.permute.xlu0 %1306 }
 0x76e   : > { %1327 = vmatpush.msrb.mxu1 %v1307_v33 }
 0x76f   : > { %2898 = vmatmul.msk.f32.vlgmr.msrb.gmra.mxu1 %vm776_vm1, %v1305_v34 }
 0x778   : > { %1386 = vrot.lane.b32.xlu1 %v3570_v39, %s4132_s22 }
 0x77f   : > { %1466 = vrot.lane.b32.xlu2 %v3570_v39, %s4133_s29 }
 0x7ca   : > { %v1370_v35 = vpop.xlane.xlu0 %1369 }
 0x7cb   : > { %3114 = vrcp.f32 %v1370_v35  ;;  %vm1376_vm3 = vweird.f32 %v1370_v35  ;;  %v1382_v52 = vand.u32 2147483648, %v1370_v35  ;;  %v1380_v54 = vand.u32 2147483647, %v1370_v35 }
 0x7cd   : > { %v1383_v62 = vor.u32 1.1754944e-38, %v1382_v52  ;;  %vm1381_vm9 = vcmp.eq.f32.partialorder %v1380_v54, 8.507059e+37  ;;  %v3066_v54 = vld [vmem:[%s4034_s14] ss:$0 sm:$0xff] }
 0x7d1   : > { %v3115_v37 = vpop.eup %3114 }
 0x7d2   : > { %v1450_v38 = vpop.xlane.xlu1 %1449  ;;  %v1372_v40 = vmul.f32 %v3115_v37, %v1370_v35  ;;  %vm1377_vm15 = vweird.f32 %v3115_v37 }
 0x7d3   : > { %3116 = vrcp.f32 %v1450_v38  ;;  %v1462_v47 = vand.u32 2147483648, %v1450_v38  ;;  %v1460_v49 = vand.u32 2147483647, %v1450_v38  ;;  %vm1456_vm2 = vweird.f32 %v1450_v38  ;;  %vm1378_vm8 = vmor %vm1376_vm3, %vm1377_vm15 }
 0x7d4   : > { %v1373_v41 = vsub.f32 1.0, %v1372_v40  ;;  %v1644_v40 = vld [vmem:[%s4036_s16] sm:$0xff]  ;;  %vm1690_vm3 = vcmask 523264  }
 0x7d5   : > { %v1463_v53 = vor.u32 1.1754944e-38, %v1462_v47  ;;  %vm1461_vm7 = vcmp.eq.f32.partialorder %v1460_v49, 8.507059e+37 }
 0x7d6   : > { %v1374_v45 = vmul.f32 %v3115_v37, %v1373_v41  ;;  %v1656_v41 = vld [vmem:[%s4038_s18 + $0x38] sm:$0xff] }
 0x7d7   : > { %1702 = vmatpush.msra.mxu3 %v1656_v41  ;;  %v3749_v41 = vld [vmem:[%s3463_s30] sm:$0xff]  ;;  %s4140_s30 = smov 56  }
 0x7d8   : > { %v1375_v50 = vadd.f32 %v3115_v37, %v1374_v45 }
 0x7d9   : > { %v3117_v42 = vpop.eup %3116 }
 0x7da   : > { %v1452_v43 = vmul.f32 %v3117_v42, %v1450_v38  ;;  %v1530_v44 = vpop.xlane.xlu2 %1529  ;;  %vm1457_vm14 = vweird.f32 %v3117_v42  ;;  %v1379_v59 = vsel %vm1378_vm8, %v3115_v37, %v1375_v50  ;;  %v1647_v37 = vld [vmem:[%s4036_s16 + $0x18] sm:$0xff]  ;;  %v1645_v38 = vld [vmem:[%s4036_s16 + $0x8] sm:$0xff] }
 0x7db   : > { %3118 = vrcp.f32 %v1530_v44  ;;  %vm1458_vm6 = vmor %vm1456_vm2, %vm1457_vm14  ;;  %v1384_v0 = vsel %vm1381_vm9, %v1383_v62, %v1379_v59  ;;  %v1542_v1 = vand.u32 2147483648, %v1530_v44  ;;  %vm1536_vm11 = vweird.f32 %v1530_v44  ;;  %v1649_v62 = vld [vmem:[%s4038_s18] sm:$0xff] }
 0x7dc   : > { %v1453_v46 = vsub.f32 1.0, %v1452_v43  ;;  %v1540_v2 = vand.u32 2147483647, %v1530_v44  ;;  %v1385_v5 = vmul.f32 %v3604_v12, %v1384_v0  ;;  %v1654_v43 = vld [vmem:[%s4038_s18 + $0x28] sm:$0xff] }
 0x7dd   : > { %v1547_v7 = vpop.permute.xlu0 %1546  ;;  %v1543_v9 = vor.u32 1.1754944e-38, %v1542_v1 }
 0x7de   : > { %v1454_v48 = vmul.f32 %v3117_v42, %v1453_v46  ;;  %vm1541_vm13 = vcmp.eq.f32.partialorder %v1540_v2, 8.507059e+37  ;;  %v1653_v46 = vld [vmem:[%s4038_s18 + $0x20] sm:$0xff] }
 0x7df   : > { %v3069_v2 = vld [vmem:[%s4039_s19] ss:$0 sm:$0xff] }
 0x7e0   : > { %v1455_v39 = vadd.f32 %v3117_v42, %v1454_v48  ;;  %v1652_v48 = vld [vmem:[%s4038_s18 + $0x18] sm:$0xff] }
 0x7e1   : > { %v3119_v51 = vpop.eup %3118 }
 0x7e2   : > { %v1459_v55 = vsel %vm1458_vm6, %v3117_v42, %v1455_v39  ;;  %v1532_v56 = vmul.f32 %v3119_v51, %v1530_v44  ;;  %v1467_v57 = vpop.permute.xlu2 %1466  ;;  %vm1537_vm10 = vweird.f32 %v3119_v51  ;;  %v1655_v42 = vld [vmem:[%s4038_s18 + $0x30] sm:$0xff] }
 0x7e3   : > { %v1464_v58 = vsel %vm1461_vm7, %v1463_v53, %v1459_v55  ;;  %1487 = vmatpush.msra.mxu1 %v1467_v57  ;;  %vm1538_vm12 = vmor %vm1536_vm11, %vm1537_vm10  ;;  %1703 = vmatpush.msra.mxu3 %v1655_v42  ;;  %v3067_v57 = vld [vmem:[%s4035_s15] ss:$0 sm:$0xff] }
 0x7e4   : > { %v1533_v60 = vsub.f32 1.0, %v1532_v56  ;;  %v1465_v61 = vmul.f32 %v3608_v18, %v1464_v58  ;;  %v1180_v18 = vld [vmem:[%s4137_s12 + $0x8] sm:$0xff]  ;;  %s4139_s12 = smov 64  }
 0x7e5   : > { %1607 = vmatpush.msrb.mxu2 %v1180_v18  ;;  %1678 = vmatpush.msrb.mxu1 %v1647_v37 }
 0x7e6   : > { %v1534_v63 = vmul.f32 %v3119_v51, %v1533_v60  ;;  %2904 = vmatmul.msk.f32.vlgmr.msra.gmra.mxu1 %vm776_vm1, %v1465_v61  ;;  %1704 = vmatpush.msra.mxu3 %v1654_v43  ;;  %v1651_v60 = vld [vmem:[%s4038_s18 + $0x10] sm:$0xff]  ;;  %v1650_v61 = vld [vmem:[%s4038_s18 + $0x8] sm:$0xff] }
 0x7e7   : > { %1608 = vmatpush.msrb.mxu2 %v1179_v19 }
 0x7e8   : > { %v1535_v4 = vadd.f32 %v3119_v51, %v1534_v63  ;;  %1705 = vmatpush.msra.mxu3 %v1653_v46  ;;  %v3068_v63 = vld [vmem:[%s4037_s17] ss:$0 sm:$0xff] }
 0x7ea   : > { %v1387_v3 = vpop.permute.xlu1 %1386  ;;  %v1539_v6 = vsel %vm1538_vm12, %v3119_v51, %v1535_v4  ;;  %1706 = vmatpush.msra.mxu3 %v1652_v48 }
 0x7eb   : > { %1407 = vmatpush.msra.mxu0 %v1387_v3  ;;  %v1544_v10 = vsel %vm1541_vm13, %v1543_v9, %v1539_v6 }
 0x7ec   : > { %2901 = vmatmul.msk.f32.vlgmr.msra.gmra.mxu0 %vm776_vm1, %v1385_v5  ;;  %v1545_v11 = vmul.f32 %v3612_v26, %v1544_v10  ;;  %v1329_v13 = vpop.f32.mrf.mxu1  ;;  %v3065_v26 = vld [vmem:[%s4138_s13] ss:$0 sm:$0xff]  ;;  %1707 = vmatpush.msra.mxu3 %v1651_v60  ;;  %s4141_s13 = smov 48  }
 0x7ed   : > { %1567 = vmatpush.msrb.mxu0 %v1547_v7 }
 0x7ee   : > { %1708 = vmatpush.msra.mxu3 %v1650_v61 }
 0x7f0   : > { %1709 = vmatpush.msra.mxu3 %v1649_v62 }
 0x7f4   : > { %2907 = vmatmul.msk.f32.vlgmr.msrb.gmra.mxu0 %vm776_vm1, %v1545_v11 }
 0x863   : > { %v1489_v14 = vpop.f32.mrf.mxu1 }
 0x864   : > { %1577 = vrot.lane.b32.xlu2 %v1489_v14, %s4134_s5 }
 0x869   : > { %v1409_v15 = vpop.f32.mrf.mxu0 }
 0x86a   : > { %1573 = vrot.lane.b32.xlu1 %v1409_v15, %s4135_s4  ;;  %v2914_v15 = vld [vmem:[%s4112_s27 + $0x38] sm:$0xff] }
 0x86b   : > { %1781 = vmatpush.msra.mxu0 %v2914_v15 }
 0x871   : > { %v1569_v12 = vpop.f32.mrf.mxu0 }
 0x872   : > { %1581 = vrot.lane.b32.xlu0 %v1569_v12, %s4136_s28  ;;  %v2913_v12 = vld [vmem:[%s4112_s27 + $0x30] sm:$0xff] }
 0x873   : > { %1782 = vmatpush.msra.mxu0 %v2913_v12 }
 0x875   : > { %1783 = vmatpush.msra.mxu0 %v2912_v16 }
 0x877   : > { %1784 = vmatpush.msra.mxu0 %v2911_v17 }
 0x8be   : > { %v1578_v22 = vpop.permute.xlu2 %1577 }
 0x8dc   : > { %v1574_v20 = vpop.permute.xlu1 %1573 }
 0x8dd   : > { %v1584_v21 = vsel %vm776_vm1, %v1329_v13, %v1574_v20 }
 0x8de   : > { %v1585_v23 = vsel %vm1106_vm4, %v1584_v21, %v1578_v22 }
 0x8e4   : > { %v1582_v24 = vpop.permute.xlu0 %1581 }
 0x8e5   : > { %v1586_v25 = vsel %vm1108_vm5, %v1585_v23, %v1582_v24 }
 0x8e6   : > { %2908 = vmatmul.msk.f32.vlgmr.msrb.gmra.mxu2 %vm749_vm0, %v1586_v25 }
 0x969   : > { %v1610_v27 = vpop.f32.mrf.mxu2 }
 0x96a   : > { %v1611_v28 = vadd.f32 %v3065_v26, %v1610_v27  ;;  %v3070_v27 = vld [vmem:[%s4040_s20] ss:$0 sm:$0xff] }
 0x96c   : > { %v1613_v29 = vadd.f32 %v1611_v28, %v3566_v36  ;;  %v1646_v36 = vld [vmem:[%s4036_s16 + $0x10] sm:$0xff] }
 0x96d   : > { %1679 = vmatpush.msrb.mxu1 %v1646_v36 }
 0x96e   : > { %v1614_v30 = vsel %vm749_vm0, %v1613_v29, 0.0 }
 0x96f   : > { %1615 = vadd.xlane.f32.xlu1 %v1614_v30  ;;  %1680 = vmatpush.msrb.mxu1 %v1645_v38  ;;  %v3071_v30 = vld [vmem:[%s4041_s21] ss:$0 sm:$0xff] }
 0x971   : > { %1681 = vmatpush.msrb.mxu1 %v1644_v40 }
 0x9e2   : > { %v1616_v31 = vpop.xlane.xlu1 %1615 }
 0x9e3   : > { %v1617_v32 = vmul.f32 %v1616_v31, %v3543_v8 }
 0x9e5   : > { %v1618_v33 = vsub.f32 %v1613_v29, %v1617_v32 }
 0x9e7   : > { %v1619_v34 = vmul.f32 %v1618_v33, %v1618_v33 }
 0x9e9   : > { %v1620_v35 = vsel %vm749_vm0, %v1619_v34, 0.0 }
 0x9ea   : > { %1621 = vadd.xlane.f32.xlu2 %v1620_v35 }
 0xa5d   : > { %v1622_v44 = vpop.xlane.xlu2 %1621 }
 0xa5e   : > { %v1623_v45 = vmul.f32 %v1622_v44, %v3543_v8 }
 0xa60   : > { %v1624_v47 = vadd.f32 1e-05, %v1623_v45 }
 0xa62   : > { %3120 = vrsqrt.f32 %v1624_v47  ;;  %vm1631_vm15 = vweird.f32 %v1624_v47 }
 0xa68   : > { %v3121_v49 = vpop.eup %3120 }
 0xa69   : > { %v1626_v50 = vmul.f32 %v3121_v49, %v1624_v47  ;;  %vm1632_vm14 = vweird.f32 %v3121_v49 }
 0xa6a   : > { %vm1633_vm2 = vmor %vm1631_vm15, %vm1632_vm14 }
 0xa6b   : > { %v1627_v39 = vmul.f32 %v3121_v49, %v1626_v50 }
 0xa6d   : > { %v1628_v51 = vmul.f32 0.5, %v1627_v39 }
 0xa6f   : > { %v1629_v52 = vsub.f32 1.5, %v1628_v51 }
 0xa71   : > { %v1630_v53 = vmul.f32 %v3121_v49, %v1629_v52 }
 0xa73   : > { %v1634_v55 = vsel %vm1633_vm2, %v3121_v49, %v1630_v53 }
 0xa74   : > { %v1635_v56 = vmul.f32 %v1634_v55, %v1618_v33  ;;  %v3072_v33 = vld [vmem:[%s4115_s6 + $0x1] ss:$0 sm:$0xff] }
 0xa76   : > { %v1639_v58 = vmul.f32 %v3066_v54, %v1635_v56 }
 0xa78   : > { %v1643_v59 = vadd.f32 %v3067_v57, %v1639_v58 }
 0xa7a   : > { %2909 = vmatmul.msk.f32.vlgmr.msrb.gmra.mxu1 %vm749_vm0, %v1643_v59 }
 0xaf7   : > { %v1683_v0 = vpop.f32.mrf.mxu1 }
 0xaf8   : > { %v1684_v4 = vadd.f32 %v3068_v63, %v1683_v0 }
 0xafa   : > { %v1686_v1 = vmax.f32 %v1684_v4, 0.0 }
 0xafc   : > { %2910 = vmatmul.msk.f32.vlgmr.msra.gmra.mxu3 %vm1690_vm3, %v1686_v1 }
 0xb7f   : > { %v1711_v3 = vpop.f32.mrf.mxu3 }
 0xb80   : > { %v1712_v5 = vadd.f32 %v3069_v2, %v1711_v3 }
 0xb82   : > { %v1714_v6 = vadd.f32 %v1712_v5, %v1643_v59 }
 0xb84   : > { %v1715_v7 = vsel %vm749_vm0, %v1714_v6, 0.0 }
 0xb85   : > { %1716 = vadd.xlane.f32.xlu0 %v1715_v7 }
 0xbf8   : > { %v1717_v9 = vpop.xlane.xlu0 %1716 }
 0xbf9   : > { %v1718_v10 = vmul.f32 %v1717_v9, %v3543_v8 }
 0xbfb   : > { %v1719_v11 = vsub.f32 %v1714_v6, %v1718_v10 }
 0xbfd   : > { %v1720_v13 = vmul.f32 %v1719_v11, %v1719_v11 }
 0xbff   : > { %v1721_v14 = vsel %vm749_vm0, %v1720_v13, 0.0 }
 0xc00   : > { %1722 = vadd.xlane.f32.xlu1 %v1721_v14 }
 0xc73   : > { %v1723_v18 = vpop.xlane.xlu1 %1722 }
 0xc74   : > { %v1724_v19 = vmul.f32 %v1723_v18, %v3543_v8 }
 0xc76   : > { %v1725_v20 = vadd.f32 1e-05, %v1724_v19 }
 0xc78   : > { %3122 = vrsqrt.f32 %v1725_v20  ;;  %vm1732_vm7 = vweird.f32 %v1725_v20 }
 0xc7e   : > { %v3123_v21 = vpop.eup %3122 }
 0xc7f   : > { %v1727_v22 = vmul.f32 %v3123_v21, %v1725_v20  ;;  %vm1733_vm6 = vweird.f32 %v3123_v21 }
 0xc80   : > { %vm1734_vm8 = vmor %vm1732_vm7, %vm1733_vm6 }
 0xc81   : > { %v1728_v23 = vmul.f32 %v3123_v21, %v1727_v22 }
 0xc83   : > { %v1729_v24 = vmul.f32 0.5, %v1728_v23 }
 0xc85   : > { %v1730_v25 = vsub.f32 1.5, %v1729_v24 }
 0xc87   : > { %v1731_v26 = vmul.f32 %v3123_v21, %v1730_v25 }
 0xc89   : > { %v1735_v28 = vsel %vm1734_vm8, %v3123_v21, %v1731_v26 }
 0xc8a   : > { %v1736_v29 = vmul.f32 %v1735_v28, %v1719_v11 }
 0xc8c   : > { %v1740_v31 = vmul.f32 %v3070_v27, %v1736_v29 }
 0xc8e   : > { %v3728_v32 = vadd.f32 %v3071_v30, %v1740_v31 }
 0xc90   : > { %2923 = vmatmul.msk.f32.vlgmr.msra.gmra.mxu0 %vm749_vm0, %v3728_v32 }
 0xd0d   : > { %v1786_v34 = vpop.f32.mrf.mxu0 }
 0xd0e   : > { %v3735_v35 = vadd.f32 %v3072_v33, %v1786_v34 }
 0xd10   : > { %1842 = vrot.lane.b32.xlu1 %v3735_v35, %s4139_s12  ;;  %1790 = vrot.lane.b32.xlu2 %v3735_v35, %s4120_s1  ;;  %s4148_s12 = sld [smem:[#allocation24_spill]] }
 0xd18   : > { %1868 = vrot.lane.b32.xlu2 %v3735_v35, %s4126_s3 }
 0xd20   : > { %2030 = vrot.lane.b32.xlu2 %v3735_v35, %s4131_s26 }
 0xd6a   : > { %v1791_v37 = vpop.permute.xlu2 %1790 }
 0xd6b   : > { %2924 = vmatpush.xpose.msk.msra.mxu2 %vm776_vm1, %v1791_v37 }
 0xd6e   : > { %2925 = vmatmul.msk.f32.vlgmr.msra.gmra.mxu2 %vm776_vm1, %v3735_v35 }
 0xd72   : > { %v1869_v47 = vpop.permute.xlu2 %1868 }
 0xd7a   : > { %v2031_v39 = vpop.permute.xlu2 %2030 }
 0xd82   : > { %v1843_v36 = vpop.permute.xlu1 %1842 }
 0xd83   : > { %1863 = vmatpush.msra.mxu1 %v1843_v36 }
 0xdf1   : > { %v1813_v38 = vpop.f32.mrf.mxu2 }
 0xdf2   : > { %v1816_v40 = vmul.f32 0.35355338, %v1813_v38 }
 0xdf4   : > { %v1817_v42 = vadd.f32 %v3749_v41, %v1816_v40 }
 0xdf6   : > { %v1818_v43 = vsel %vm776_vm1, %v1817_v42, -inf }
 0xdf7   : > { %1819 = vmax.xlane.f32.xlu0 %v1818_v43 }
 0xe0b   : > { %1870 = vrot.lane.b32.xlu0 %v3735_v35, %s4132_s22 }
 0xe13   : > { %1950 = vrot.lane.b32.xlu0 %v3735_v35, %s4133_s29 }
 0xe1b   : > { %1948 = vrot.lane.b32.xlu0 %v3735_v35, %s4128_s24 }
 0xe6a   : > { %v1820_v44 = vpop.xlane.xlu0 %1819 }
 0xe6b   : > { %v1821_v45 = vsub.f32 %v1817_v42, %v1820_v44 }
 0xe6d   : > { %v1822_v46 = vmul.f32 1.442695, %v1821_v45 }
 0xe6f   : > { %3124 = vpow2.f32 %v1822_v46 }
 0xe75   : > { %v3125_v48 = vpop.eup %3124 }
 0xe76   : > { %v1824_v49 = vsel %vm776_vm1, %v3125_v48, 0.0 }
 0xe77   : > { %1825 = vadd.xlane.f32.xlu1 %v1824_v49 }
 0xe7d   : > { %v1871_v50 = vpop.permute.xlu0 %1870 }
 0xe7e   : > { %2927 = vmatpush.xpose.msk.msrb.mxu0 %vm776_vm1, %v1871_v50 }
 0xe81   : > { %2928 = vmatmul.msk.f32.vlgmr.msrb.gmra.mxu0 %vm776_vm1, %v1869_v47 }
 0xe82   : > { %2933 = vmatpush.xpose.msk.msra.mxu0 %vm776_vm1, %v2031_v39 }
 0xe85   : > { %v1951_v51 = vpop.permute.xlu0 %1950 }
 0xe86   : > { %2930 = vmatpush.xpose.msk.msrb.mxu1 %vm776_vm1, %v1951_v51 }
 0xe8d   : > { %v1949_v5 = vpop.permute.xlu0 %1948 }
 0xe90   : > { %2028 = vrot.lane.b32.xlu1 %v3735_v35, %s4127_s0 }
 0xeea   : > { %v1826_v52 = vpop.xlane.xlu1 %1825 }
 0xeeb   : > { %3126 = vrcp.f32 %v1826_v52  ;;  %v1838_v56 = vand.u32 2147483648, %v1826_v52  ;;  %v1836_v58 = vand.u32 2147483647, %v1826_v52  ;;  %vm1832_vm10 = vweird.f32 %v1826_v52 }
 0xeed   : > { %v1839_v60 = vor.u32 1.1754944e-38, %v1838_v56  ;;  %vm1837_vm12 = vcmp.eq.f32.partialorder %v1836_v58, 8.507059e+37 }
 0xef1   : > { %v3127_v53 = vpop.eup %3126 }
 0xef2   : > { %v1828_v54 = vmul.f32 %v3127_v53, %v1826_v52  ;;  %vm1833_vm9 = vweird.f32 %v3127_v53 }
 0xef3   : > { %vm1834_vm11 = vmor %vm1832_vm10, %vm1833_vm9 }
 0xef4   : > { %v1829_v55 = vsub.f32 1.0, %v1828_v54 }
 0xef6   : > { %v1830_v57 = vmul.f32 %v3127_v53, %v1829_v55 }
 0xef8   : > { %v1831_v59 = vadd.f32 %v3127_v53, %v1830_v57 }
 0xefa   : > { %v1835_v61 = vsel %vm1834_vm11, %v3127_v53, %v1831_v59 }
 0xefb   : > { %v1840_v62 = vsel %vm1837_vm12, %v1839_v60, %v1835_v61 }
 0xefc   : > { %v1841_v63 = vmul.f32 %v3125_v48, %v1840_v62 }
 0xefe   : > { %2926 = vmatmul.msk.f32.vlgmr.msra.gmra.mxu1 %vm776_vm1, %v1841_v63  ;;  %v1893_v0 = vpop.f32.mrf.mxu0 }
 0xeff   : > { %v1896_v4 = vmul.f32 0.35355338, %v1893_v0 }
 0xf01   : > { %v1897_v1 = vadd.f32 %v3749_v41, %v1896_v4 }
 0xf02   : > { %v2029_v2 = vpop.permute.xlu1 %2028 }
 0xf03   : > { %2934 = vmatmul.msk.f32.vlgmr.msra.gmra.mxu0 %vm776_vm1, %v2029_v2  ;;  %v1898_v3 = vsel %vm776_vm1, %v1897_v1, -inf }
 0xf04   : > { %1899 = vmax.xlane.f32.xlu2 %v1898_v3 }
 0xf06   : > { %2931 = vmatmul.msk.f32.vlgmr.msrb.gmra.mxu1 %vm776_vm1, %v1949_v5 }
 0xf77   : > { %v1900_v6 = vpop.xlane.xlu2 %1899 }
 0xf78   : > { %v1901_v7 = vsub.f32 %v1897_v1, %v1900_v6 }
 0xf7a   : > { %v1902_v9 = vmul.f32 1.442695, %v1901_v7 }
 0xf7b   : > { %v3771_v10 = vpop.f32.mrf.mxu1 }
 0xf7c   : > { %3128 = vpow2.f32 %v1902_v9 }
 0xf80   : > { %v2053_v11 = vpop.f32.mrf.mxu0 }
 0xf81   : > { %v2056_v13 = vmul.f32 0.35355338, %v2053_v11 }
 0xf82   : > { %v3129_v14 = vpop.eup %3128 }
 0xf83   : > { %v1973_v15 = vpop.f32.mrf.mxu1  ;;  %v1904_v12 = vsel %vm776_vm1, %v3129_v14, 0.0  ;;  %v2057_v16 = vadd.f32 %v3749_v41, %v2056_v13  ;;  %v2919_v13 = vld [vmem:[%s4143_s10 + $0x38] sm:$0xff] }
 0xf84   : > { %v1976_v17 = vmul.f32 0.35355338, %v1973_v15  ;;  %1905 = vadd.xlane.f32.xlu2 %v1904_v12  ;;  %2141 = vmatpush.msra.mxu1 %v2919_v13  ;;  %v2917_v15 = vld [vmem:[%s4143_s10 + $0x28] sm:$0xff]  ;;  %v2916_v12 = vld [vmem:[%s4143_s10 + $0x20] sm:$0xff] }
 0xf85   : > { %v2058_v18 = vsel %vm776_vm1, %v2057_v16, -inf }
 0xf86   : > { %2059 = vmax.xlane.f32.xlu1 %v2058_v18  ;;  %v1977_v19 = vadd.f32 %v3749_v41, %v1976_v17 }
 0xf88   : > { %v1978_v20 = vsel %vm776_vm1, %v1977_v19, -inf }
 0xf89   : > { %1979 = vmax.xlane.f32.xlu0 %v1978_v20 }
 0xf9f   : > { %1922 = vrot.lane.b32.xlu1 %v3735_v35, %s4140_s30 }
 0xff7   : > { %v1906_v21 = vpop.xlane.xlu2 %1905 }
 0xff8   : > { %3130 = vrcp.f32 %v1906_v21  ;;  %v1918_v38 = vand.u32 2147483648, %v1906_v21  ;;  %vm1912_vm14 = vweird.f32 %v1906_v21  ;;  %v1916_v41 = vand.u32 2147483647, %v1906_v21 }
 0xff9   : > { %v2060_v22 = vpop.xlane.xlu1 %2059 }
 0xffa   : > { %v2061_v23 = vsub.f32 %v2057_v16, %v2060_v22  ;;  %v1919_v43 = vor.u32 1.1754944e-38, %v1918_v38  ;;  %vm1917_vm2 = vcmp.eq.f32.partialorder %v1916_v41, 8.507059e+37  ;;  %v3073_v22 = vld [vmem:[%s4144_s9 + $0x1] ss:$0 sm:$0xff]  ;;  %s4146_s9 = sld [smem:[#allocation14_spill]] }
 0xffc   : > { %v2062_v24 = vmul.f32 1.442695, %v2061_v23  ;;  %v1980_v25 = vpop.xlane.xlu0 %1979 }
 0xffd   : > { %v1981_v26 = vsub.f32 %v1977_v19, %v1980_v25 }
 0xffe   : > { %v3131_v27 = vpop.eup %3130  ;;  %3132 = vpow2.f32 %v2062_v24 }
 0xfff   : > { %v1908_v28 = vmul.f32 %v3131_v27, %v1906_v21  ;;  %v1982_v29 = vmul.f32 1.442695, %v1981_v26  ;;  %vm1913_vm13 = vweird.f32 %v3131_v27 }
0x1000   : > { %vm1914_vm15 = vmor %vm1912_vm14, %vm1913_vm13 }
0x1001   : > { %v1909_v30 = vsub.f32 1.0, %v1908_v28  ;;  %3134 = vpow2.f32 %v1982_v29  ;;  %v2938_v29 = vld [vmem:[%s4145_s25 + $0x28] sm:$0xff] }
0x1003   : > { %v1910_v31 = vmul.f32 %v3131_v27, %v1909_v30 }
0x1004   : > { %v3133_v33 = vpop.eup %3132 }
0x1005   : > { %v2064_v34 = vsel %vm776_vm1, %v3133_v33, 0.0  ;;  %v1911_v36 = vadd.f32 %v3131_v27, %v1910_v31 }
0x1006   : > { %2065 = vadd.xlane.f32.xlu2 %v2064_v34 }
0x1007   : > { %v3135_v37 = vpop.eup %3134  ;;  %v1915_v42 = vsel %vm1914_vm15, %v3131_v27, %v1911_v36  ;;  %v2940_v27 = vld [vmem:[%s4145_s25 + $0x38] sm:$0xff] }
0x1008   : > { %v1984_v40 = vsel %vm776_vm1, %v3135_v37, 0.0  ;;  %v1920_v44 = vsel %vm1917_vm2, %v1919_v43, %v1915_v42 }
0x1009   : > { %1985 = vadd.xlane.f32.xlu0 %v1984_v40  ;;  %v1921_v46 = vmul.f32 %v3129_v14, %v1920_v44  ;;  %v2918_v14 = vld [vmem:[%s4143_s10 + $0x30] sm:$0xff] }
0x100a   : > { %2142 = vmatpush.msra.mxu1 %v2918_v14 }
0x100c   : > { %2143 = vmatpush.msra.mxu1 %v2917_v15 }
0x100e   : > { %2144 = vmatpush.msra.mxu1 %v2916_v12 }
0x1011   : > { %v1923_v45 = vpop.permute.xlu1 %1922 }
0x1012   : > { %1943 = vmatpush.msrb.mxu2 %v1923_v45  ;;  %v3163_v45 = vld [vmem:[%s4146_s9] sm:$0xff]  ;;  %s4150_s9 = sld [smem:[#allocation15_spill]] }
0x1013   : > { %2929 = vmatmul.msk.f32.vlgmr.msrb.gmra.mxu2 %vm776_vm1, %v1921_v46 }
0x101d   : > { %2002 = vrot.lane.b32.xlu0 %v3735_v35, %s4141_s13 }
0x101e   : > { %2082 = vrot.lane.b32.xlu2 %v3735_v35, %s4142_s8  ;;  %s4149_s8 = sld [smem:[#allocation25_spill]] }
0x1079   : > { %v2066_v47 = vpop.xlane.xlu2 %2065 }
0x107a   : > { %3136 = vrcp.f32 %v2066_v47  ;;  %v2078_v53 = vand.u32 2147483648, %v2066_v47  ;;  %v2076_v56 = vand.u32 2147483647, %v2066_v47  ;;  %vm2072_vm7 = vweird.f32 %v2066_v47 }
0x107c   : > { %v1986_v48 = vpop.xlane.xlu0 %1985  ;;  %v2079_v35 = vor.u32 1.1754944e-38, %v2078_v53  ;;  %vm2077_vm10 = vcmp.eq.f32.partialorder %v2076_v56, 8.507059e+37 }
0x107d   : > { %3138 = vrcp.f32 %v1986_v48  ;;  %v1998_v59 = vand.u32 2147483648, %v1986_v48  ;;  %v1996_v61 = vand.u32 2147483647, %v1986_v48  ;;  %vm1992_vm11 = vweird.f32 %v1986_v48 }
0x107f   : > { %v1999_v4 = vor.u32 1.1754944e-38, %v1998_v59  ;;  %vm1997_vm13 = vcmp.eq.f32.partialorder %v1996_v61, 8.507059e+37 }
0x1080   : > { %v3137_v49 = vpop.eup %3136 }
0x1081   : > { %v2068_v50 = vmul.f32 %v3137_v49, %v2066_v47  ;;  %v2083_v39 = vpop.permute.xlu2 %2082  ;;  %vm2073_vm6 = vweird.f32 %v3137_v49 }
0x1082   : > { %2103 = vmatpush.msra.mxu2 %v2083_v39  ;;  %vm2074_vm8 = vmor %vm2072_vm7, %vm2073_vm6 }
0x1083   : > { %v3139_v51 = vpop.eup %3138  ;;  %v2069_v52 = vsub.f32 1.0, %v2068_v50 }
0x1084   : > { %v1988_v54 = vmul.f32 %v3139_v51, %v1986_v48  ;;  %vm1993_vm9 = vweird.f32 %v3139_v51 }
0x1085   : > { %v2070_v55 = vmul.f32 %v3137_v49, %v2069_v52  ;;  %vm1994_vm12 = vmor %vm1992_vm11, %vm1993_vm9 }
0x1086   : > { %v1989_v57 = vsub.f32 1.0, %v1988_v54 }
0x1087   : > { %v2071_v58 = vadd.f32 %v3137_v49, %v2070_v55  ;;  %v3074_v55 = vld [vmem:[%s4148_s12 + $0x1] ss:$0 sm:$0xff] }
0x1088   : > { %v1990_v60 = vmul.f32 %v3139_v51, %v1989_v57 }
0x1089   : > { %v2075_v62 = vsel %vm2074_vm8, %v3137_v49, %v2071_v58  ;;  %v3075_v58 = vld [vmem:[%s4149_s8 + $0x1] ss:$0 sm:$0xff] }
0x108a   : > { %v2080_v63 = vsel %vm2077_vm10, %v2079_v35, %v2075_v62  ;;  %v1991_v0 = vadd.f32 %v3139_v51, %v1990_v60 }
0x108b   : > { %v2081_v1 = vmul.f32 %v3133_v33, %v2080_v63 }
0x108c   : > { %v1995_v2 = vsel %vm1994_vm12, %v3139_v51, %v1991_v0 }
0x108d   : > { %v2000_v3 = vsel %vm1997_vm13, %v1999_v4, %v1995_v2  ;;  %2935 = vmatmul.msk.f32.vlgmr.msra.gmra.mxu2 %vm776_vm1, %v2081_v1 }
0x108e   : > { %v2001_v5 = vmul.f32 %v3135_v37, %v2000_v3 }
0x108f   : > { %v2003_v6 = vpop.permute.xlu0 %2002 }
0x1090   : > { %2023 = vmatpush.msrb.mxu3 %v2003_v6 }
0x1091   : > { %2932 = vmatmul.msk.f32.vlgmr.msrb.gmra.mxu3 %vm776_vm1, %v2001_v5 }
0x1092   : > { %2216 = vmatpush.msra.mxu3 %v2940_v27 }
0x1096   : > { %v1945_v7 = vpop.f32.mrf.mxu2 }
0x1097   : > { %2109 = vrot.lane.b32.xlu1 %v1945_v7, %s4135_s4 }
0x1109   : > { %v2110_v16 = vpop.permute.xlu1 %2109 }
0x110a   : > { %v2120_v17 = vsel %vm776_vm1, %v3771_v10, %v2110_v16  ;;  %v2939_v10 = vld [vmem:[%s4145_s25 + $0x30] sm:$0xff] }
0x110b   : > { %v3050_v28 = vpack.i.bf16 %v2939_v10, %v2940_v27  ;;  %2217 = vmatpush.msra.mxu3 %v2939_v10 }
0x110d   : > { %2218 = vmatpush.msra.mxu3 %v2938_v29 }
0x1110   : > { %v2105_v9 = vpop.f32.mrf.mxu2 }
0x1111   : > { %2117 = vrot.lane.b32.xlu2 %v2105_v9, %s4136_s28 }
0x1114   : > { %v2025_v11 = vpop.f32.mrf.mxu3 }
0x1115   : > { %2113 = vrot.lane.b32.xlu0 %v2025_v11, %s4134_s5  ;;  %v3164_v11 = vld [vmem:[%s4150_s9] sm:$0xff] }
0x1119   : > { %3051 = vrot.lane.b32.xlu2 %v3050_v28, %s4120_s1 }
0x116b   : > { %v2118_v19 = vpop.permute.xlu2 %2117 }
0x1173   : > { %v3052_v38 = vpop.permute.xlu2 %3051 }
0x1174   : > { %v3053_v40 = vunpack.i.l.bf16 %v3052_v38  ;;  %v3054_v41 = vunpack.i.h.bf16 %v3052_v38 }
0x1176   : > { %2255 = vmatpush.msrb.mxu0 %v3053_v40 }
0x1178   : > { %2256 = vmatpush.msrb.mxu0 %v3054_v41 }
0x1187   : > { %v2114_v18 = vpop.permute.xlu0 %2113 }
0x1188   : > { %v2121_v20 = vsel %vm1106_vm4, %v2120_v17, %v2114_v18 }
0x1189   : > { %v2122_v21 = vsel %vm1108_vm5, %v2121_v20, %v2118_v19 }
0x118a   : > { %2936 = vmatmul.msk.f32.vlgmr.msra.gmra.mxu1 %vm749_vm0, %v2122_v21 }
0x1207   : > { %v2146_v23 = vpop.f32.mrf.mxu1 }
0x1208   : > { %v2147_v24 = vadd.f32 %v3073_v22, %v2146_v23 }
0x120a   : > { %v2149_v25 = vadd.f32 %v2147_v24, %v3728_v32  ;;  %v2937_v32 = vld [vmem:[%s4145_s25 + $0x20] sm:$0xff]  ;;  %s4147_s25 = sld [smem:[#allocation27_spill]] }
0x120b   : > { %v3055_v30 = vpack.i.bf16 %v2937_v32, %v2938_v29  ;;  %2219 = vmatpush.msra.mxu3 %v2937_v32 }
0x120c   : > { %v2150_v26 = vsel %vm749_vm0, %v2149_v25, 0.0 }
0x120d   : > { %2151 = vadd.xlane.f32.xlu1 %v2150_v26  ;;  %3056 = vrot.lane.b32.xlu2 %v3055_v30, %s4120_s1 }
0x1210   : > { %v3076_v46 = vld [vmem:[%s4147_s25 + $0x1] ss:$0 sm:$0xff] }
0x1215   : > { %2240 = vrot.lane.b32.xlu2 %v3076_v46, %s4120_s1 }
0x1267   : > { %v3057_v42 = vpop.permute.xlu2 %3056 }
0x1268   : > { %v3058_v43 = vunpack.i.l.bf16 %v3057_v42  ;;  %v3059_v44 = vunpack.i.h.bf16 %v3057_v42 }
0x126a   : > { %2257 = vmatpush.msrb.mxu0 %v3058_v43 }
0x126c   : > { %2258 = vmatpush.msrb.mxu0 %v3059_v44 }
0x126d   : > { %2950 = vmatmul.msk.f32.vlgmr.msrb.gmra.mxu0 %vm749_vm0, %v3163_v45 }
0x126f   : > { %v2241_v60 = vpop.permute.xlu2 %2240 }
0x1280   : > { %v2152_v31 = vpop.xlane.xlu1 %2151 }
0x1281   : > { %v2153_v33 = vmul.f32 %v2152_v31, %v3543_v8 }
0x1283   : > { %v2154_v34 = vsub.f32 %v2149_v25, %v2153_v33 }
0x1285   : > { %v2155_v37 = vmul.f32 %v2154_v34, %v2154_v34 }
0x1287   : > { %v2156_v36 = vsel %vm749_vm0, %v2155_v37, 0.0 }
0x1288   : > { %2157 = vadd.xlane.f32.xlu0 %v2156_v36 }
0x12ea   : > { %v2260_v61 = vpop.f32.mrf.mxu0 }
0x12eb   : > { %v3847_v62 = vadd.f32 %v2260_v61, %v2241_v60 }
0x12ed   : > { %2423 = vrot.lane.b32.xlu1 %v3847_v62, %s4128_s24  ;;  %2503 = vrot.lane.b32.xlu0 %v3847_v62, %s4127_s0 }
0x12ee   : > { %2343 = vrot.lane.b32.xlu2 %v3847_v62, %s4126_s3  ;;  %2951 = vmatpush.xpose.msk.msrb.mxu2 %vm776_vm1, %v3847_v62 }
0x12fb   : > { %v2158_v47 = vpop.xlane.xlu0 %2157 }
0x12fc   : > { %v2159_v48 = vmul.f32 %v2158_v47, %v3543_v8 }
0x12fe   : > { %v2160_v49 = vadd.f32 1e-05, %v2159_v48 }
0x1300   : > { %3140 = vrsqrt.f32 %v2160_v49  ;;  %vm2167_vm15 = vweird.f32 %v2160_v49 }
0x1306   : > { %v3141_v50 = vpop.eup %3140 }
0x1307   : > { %v2162_v39 = vmul.f32 %v3141_v50, %v2160_v49  ;;  %vm2168_vm14 = vweird.f32 %v3141_v50 }
0x1308   : > { %vm2169_vm2 = vmor %vm2167_vm15, %vm2168_vm14 }
0x1309   : > { %v2163_v51 = vmul.f32 %v3141_v50, %v2162_v39 }
0x130b   : > { %v2164_v52 = vmul.f32 0.5, %v2163_v51 }
0x130d   : > { %v2165_v53 = vsub.f32 1.5, %v2164_v52 }
0x130f   : > { %v2166_v54 = vmul.f32 %v3141_v50, %v2165_v53 }
0x1311   : > { %v2170_v56 = vsel %vm2169_vm2, %v3141_v50, %v2166_v54 }
0x1312   : > { %v2171_v57 = vmul.f32 %v2170_v56, %v2154_v34 }
0x1314   : > { %v2175_v59 = vmul.f32 %v3074_v55, %v2171_v57 }
0x1316   : > { %v3843_v35 = vadd.f32 %v3075_v58, %v2175_v59 }
0x1318   : > { %2949 = vmatmul.msk.f32.vlgmr.msra.gmra.mxu3 %vm749_vm0, %v3843_v35 }
0x1348   : > { %v2344_v4 = vpop.permute.xlu2 %2343 }
0x1349   : > { %2954 = vmatpush.xpose.msk.msrb.mxu3 %vm776_vm1, %v2344_v4 }
0x135f   : > { %v2424_v1 = vpop.permute.xlu1 %2423  ;;  %v2504_v2 = vpop.permute.xlu0 %2503 }
0x1360   : > { %2957 = vmatpush.xpose.msk.msra.mxu2 %vm776_vm1, %v2424_v1  ;;  %2960 = vmatpush.xpose.msk.msra.mxu3 %vm776_vm1, %v2504_v2 }
0x139b   : > { %v2221_v63 = vpop.f32.mrf.mxu3 }
0x139c   : > { %v2222_v0 = vadd.f32 %v3076_v46, %v2221_v63 }
0x139e   : > { %2341 = vrot.lane.b32.xlu2 %v2222_v0, %s4126_s3  ;;  %2952 = vmatmul.msk.f32.vlgmr.msrb.gmra.mxu2 %vm776_vm1, %v2222_v0 }
0x13a6   : > { %2421 = vrot.lane.b32.xlu2 %v2222_v0, %s4128_s24 }
0x13ae   : > { %2501 = vrot.lane.b32.xlu2 %v2222_v0, %s4127_s0  ;;  %s4151_s0 = sld [smem:[#allocation28_spill]] }
0x13f8   : > { %v2342_v3 = vpop.permute.xlu2 %2341 }
0x13f9   : > { %2955 = vmatmul.msk.f32.vlgmr.msrb.gmra.mxu3 %vm776_vm1, %v2342_v3 }
0x1400   : > { %v2422_v5 = vpop.permute.xlu2 %2421 }
0x1401   : > { %2958 = vmatmul.msk.f32.vlgmr.msra.gmra.mxu2 %vm776_vm1, %v2422_v5 }
0x1408   : > { %v2502_v6 = vpop.permute.xlu2 %2501 }
0x1409   : > { %2961 = vmatmul.msk.f32.vlgmr.msra.gmra.mxu3 %vm776_vm1, %v2502_v6 }
0x1421   : > { %v2286_v7 = vpop.f32.mrf.mxu2 }
0x1422   : > { %v2289_v9 = vmul.f32 0.35355338, %v2286_v7 }
0x1424   : > { %v2290_v13 = vadd.f32 %v3164_v11, %v2289_v9 }
0x1426   : > { %v2291_v14 = vsel %vm776_vm1, %v2290_v13, -inf }
0x1427   : > { %2292 = vmax.xlane.f32.xlu2 %v2291_v14 }
0x147c   : > { %v2366_v15 = vpop.f32.mrf.mxu3 }
0x147d   : > { %v2369_v12 = vmul.f32 0.35355338, %v2366_v15 }
0x147f   : > { %v2370_v16 = vadd.f32 %v3164_v11, %v2369_v12 }
0x1481   : > { %v2371_v17 = vsel %vm776_vm1, %v2370_v16, -inf }
0x1482   : > { %2372 = vmax.xlane.f32.xlu0 %v2371_v17 }
0x1484   : > { %v2446_v18 = vpop.f32.mrf.mxu2 }
0x1485   : > { %v2449_v19 = vmul.f32 0.35355338, %v2446_v18 }
0x1487   : > { %v2450_v20 = vadd.f32 %v3164_v11, %v2449_v19 }
0x1489   : > { %v2451_v21 = vsel %vm776_vm1, %v2450_v20, -inf }
0x148a   : > { %2452 = vmax.xlane.f32.xlu1 %v2451_v21 }
0x148c   : > { %v2526_v22 = vpop.f32.mrf.mxu3 }
0x148d   : > { %v2529_v23 = vmul.f32 0.35355338, %v2526_v22 }
0x148f   : > { %v2530_v24 = vadd.f32 %v3164_v11, %v2529_v23 }
0x1491   : > { %v2531_v25 = vsel %vm776_vm1, %v2530_v24, -inf }
0x1492   : > { %2532 = vmax.xlane.f32.xlu2 %v2531_v25 }
0x149a   : > { %v2293_v26 = vpop.xlane.xlu2 %2292 }
0x149b   : > { %v2294_v10 = vsub.f32 %v2290_v13, %v2293_v26 }
0x149d   : > { %v2295_v27 = vmul.f32 1.442695, %v2294_v10 }
0x149f   : > { %3142 = vpow2.f32 %v2295_v27 }
0x14a5   : > { %v3872_v28 = vpop.eup %3142 }
0x14a6   : > { %v2297_v32 = vsel %vm776_vm1, %v3872_v28, 0.0 }
0x14a7   : > { %2298 = vadd.xlane.f32.xlu0 %v2297_v32 }
0x14bb   : > { %2475 = vrot.lane.b32.xlu0 %v3847_v62, %s4133_s29 }
0x14f5   : > { %v2373_v29 = vpop.xlane.xlu0 %2372 }
0x14f6   : > { %v2374_v30 = vsub.f32 %v2370_v16, %v2373_v29 }
0x14f8   : > { %v2375_v31 = vmul.f32 1.442695, %v2374_v30 }
0x14fa   : > { %3144 = vpow2.f32 %v2375_v31 }
0x14fd   : > { %v2453_v33 = vpop.xlane.xlu1 %2452 }
0x14fe   : > { %v2454_v34 = vsub.f32 %v2450_v20, %v2453_v33 }
0x1500   : > { %v3145_v37 = vpop.eup %3144  ;;  %v2455_v36 = vmul.f32 1.442695, %v2454_v34 }
0x1501   : > { %v2377_v38 = vsel %vm776_vm1, %v3145_v37, 0.0 }
0x1502   : > { %3146 = vpow2.f32 %v2455_v36  ;;  %2378 = vadd.xlane.f32.xlu1 %v2377_v38 }
0x1505   : > { %v2533_v40 = vpop.xlane.xlu2 %2532 }
0x1506   : > { %v2534_v41 = vsub.f32 %v2530_v24, %v2533_v40 }
0x1508   : > { %v3879_v42 = vpop.eup %3146  ;;  %v2535_v43 = vmul.f32 1.442695, %v2534_v41  ;;  %v2945_v41 = vld [vmem:[%s4151_s0 + $0x38] sm:$0xff] }
0x1509   : > { %v2457_v44 = vsel %vm776_vm1, %v3879_v42, 0.0  ;;  %2614 = vmatpush.msrb.mxu2 %v2945_v41 }
0x150a   : > { %3148 = vpow2.f32 %v2535_v43  ;;  %2458 = vadd.xlane.f32.xlu2 %v2457_v44  ;;  %v2943_v43 = vld [vmem:[%s4151_s0 + $0x28] sm:$0xff]  ;;  %v2942_v44 = vld [vmem:[%s4151_s0 + $0x20] sm:$0xff] }
0x1510   : > { %v3883_v45 = vpop.eup %3148 }
0x1511   : > { %v2537_v46 = vsel %vm776_vm1, %v3883_v45, 0.0 }
0x1512   : > { %2538 = vadd.xlane.f32.xlu0 %v2537_v46 }
0x151a   : > { %v2299_v47 = vpop.xlane.xlu0 %2298 }
0x151b   : > { %2315 = vrot.lane.b32.xlu1 %v3847_v62, %s4120_s1  ;;  %3150 = vrcp.f32 %v2299_v47  ;;  %vm2305_vm9 = vweird.f32 %v2299_v47  ;;  %v2311_v63 = vand.u32 2147483648, %v2299_v47  ;;  %v2309_v4 = vand.u32 2147483647, %v2299_v47 }
0x151d   : > { %v2312_v13 = vor.u32 1.1754944e-38, %v2311_v63  ;;  %vm2310_vm13 = vcmp.eq.f32.partialorder %v2309_v4, 8.507059e+37  ;;  %v2976_v63 = vld [vmem:[%s4038_s18 + $0x78] sm:$0xff]  ;;  %v2974_v4 = vld [vmem:[%s4038_s18 + $0x68] sm:$0xff] }
0x151e   : > { %2716 = vmatpush.msrb.mxu3 %v2976_v63 }
0x1521   : > { %v3151_v48 = vpop.eup %3150 }
0x1522   : > { %2395 = vrot.lane.b32.xlu2 %v3847_v62, %s4132_s22  ;;  %v2301_v50 = vmul.f32 %v3151_v48, %v2299_v47  ;;  %vm2306_vm7 = vweird.f32 %v3151_v48  ;;  %s4154_s22 = sld [smem:[#allocation9_spill]] }
0x1523   : > { %vm2307_vm12 = vmor %vm2305_vm9, %vm2306_vm7 }
0x1524   : > { %v2302_v39 = vsub.f32 1.0, %v2301_v50 }
0x1526   : > { %2555 = vrot.lane.b32.xlu0 %v3847_v62, %s4131_s26  ;;  %v2303_v55 = vmul.f32 %v3151_v48, %v2302_v39  ;;  %v3077_v39 = vld [vmem:[%s4152_s11 + $0x1] ss:$0 sm:$0xff]  ;;  %s4153_s26 = sld [smem:[#allocation6_spill]] }
0x1528   : > { %v2304_v60 = vadd.f32 %v3151_v48, %v2303_v55 }
0x152a   : > { %v2308_v7 = vsel %vm2307_vm12, %v3151_v48, %v2304_v60  ;;  %v2967_v60 = vld [vmem:[%s4036_s16 + $0x38] sm:$0xff] }
0x152b   : > { %v2313_v15 = vsel %vm2310_vm13, %v2312_v13, %v2308_v7 }
0x152c   : > { %v2314_v21 = vmul.f32 %v3872_v28, %v2313_v15  ;;  %s711_s29 = sand.u32 1, %s4153_s26  }
0x152d   : > { %v2476_v52 = vpop.permute.xlu0 %2475  ;;  %s2761_s3 = scalar_lea.sflag [#allocation3], %s711_s29 }
0x1575   : > { %v2379_v49 = vpop.xlane.xlu1 %2378 }
0x1576   : > { %3152 = vrcp.f32 %v2379_v49  ;;  %v2391_v57 = vand.u32 2147483648, %v2379_v49  ;;  %v2389_v59 = vand.u32 2147483647, %v2379_v49  ;;  %vm2385_vm8 = vweird.f32 %v2379_v49 }
0x1578   : > { %v2392_v0 = vor.u32 1.1754944e-38, %v2391_v57  ;;  %vm2390_vm11 = vcmp.eq.f32.partialorder %v2389_v59, 8.507059e+37 }
0x157c   : > { %v3153_v51 = vpop.eup %3152 }
0x157d   : > { %v2381_v53 = vmul.f32 %v3153_v51, %v2379_v49  ;;  %v2459_v54 = vpop.xlane.xlu2 %2458  ;;  %vm2386_vm6 = vweird.f32 %v3153_v51 }
0x157e   : > { %3154 = vrcp.f32 %v2459_v54  ;;  %vm2387_vm10 = vmor %vm2385_vm8, %vm2386_vm6  ;;  %v2471_v17 = vand.u32 2147483648, %v2459_v54  ;;  %vm2465_vm15 = vweird.f32 %v2459_v54  ;;  %v2469_v18 = vand.u32 2147483647, %v2459_v54 }
0x157f   : > { %v2382_v56 = vsub.f32 1.0, %v2381_v53 }
0x1580   : > { %v2472_v24 = vor.u32 1.1754944e-38, %v2471_v17  ;;  %vm2470_vm6 = vcmp.eq.f32.partialorder %v2469_v18, 8.507059e+37  ;;  %v3079_v18 = vld [vmem:[%s4035_s15 + $0x1] ss:$0 sm:$0xff] }
0x1581   : > { %v2383_v58 = vmul.f32 %v3153_v51, %v2382_v56 }
0x1583   : > { %v2384_v61 = vadd.f32 %v3153_v51, %v2383_v58 }
0x1584   : > { %v3155_v62 = vpop.eup %3154 }
0x1585   : > { %v2388_v1 = vsel %vm2387_vm10, %v3153_v51, %v2384_v61  ;;  %v2461_v2 = vmul.f32 %v3155_v62, %v2459_v54  ;;  %v2539_v3 = vpop.xlane.xlu0 %2538  ;;  %v2396_v5 = vpop.permute.xlu2 %2395  ;;  %vm2466_vm14 = vweird.f32 %v3155_v62  ;;  %v2965_v61 = vld [vmem:[%s4036_s16 + $0x28] sm:$0xff] }
0x1586   : > { %v2393_v6 = vsel %vm2390_vm11, %v2392_v0, %v2388_v1  ;;  %3156 = vrcp.f32 %v2539_v3  ;;  %2416 = vmatpush.msra.mxu0 %v2396_v5  ;;  %vm2467_vm2 = vmor %vm2465_vm15, %vm2466_vm14  ;;  %v2551_v25 = vand.u32 2147483648, %v2539_v3  ;;  %v2549_v10 = vand.u32 2147483647, %v2539_v3  ;;  %v2975_v0 = vld [vmem:[%s4038_s18 + $0x70] sm:$0xff] }
0x1587   : > { %v2462_v9 = vsub.f32 1.0, %v2461_v2  ;;  %v2394_v11 = vmul.f32 %v3145_v37, %v2393_v6  ;;  %vm2545_vm8 = vweird.f32 %v2539_v3  ;;  %2717 = vmatpush.msrb.mxu3 %v2975_v0  ;;  %v2972_v6 = vld [vmem:[%s4038_s18 + $0x58] sm:$0xff] }
0x1588   : > { %v2552_v29 = vor.u32 1.1754944e-38, %v2551_v25  ;;  %vm2550_vm10 = vcmp.eq.f32.partialorder %v2549_v10, 8.507059e+37 }
0x1589   : > { %v2463_v14 = vmul.f32 %v3155_v62, %v2462_v9  ;;  %2956 = vmatmul.msk.f32.vlgmr.msra.gmra.mxu0 %vm776_vm1, %v2394_v11  ;;  %2718 = vmatpush.msrb.mxu3 %v2974_v4 }
0x158b   : > { %v2464_v12 = vadd.f32 %v3155_v62, %v2463_v14 }
0x158c   : > { %v3157_v16 = vpop.eup %3156 }
0x158d   : > { %v2541_v19 = vmul.f32 %v3157_v16, %v2539_v3  ;;  %v2316_v20 = vpop.permute.xlu1 %2315  ;;  %v2468_v22 = vsel %vm2467_vm2, %v3155_v62, %v2464_v12  ;;  %vm2546_vm7 = vweird.f32 %v3157_v16  ;;  %v2964_v62 = vld [vmem:[%s4036_s16 + $0x20] sm:$0xff] }
0x158e   : > { %2336 = vmatpush.msrb.mxu1 %v2316_v20  ;;  %v2473_v27 = vsel %vm2470_vm6, %v2472_v24, %v2468_v22  ;;  %vm2547_vm9 = vmor %vm2545_vm8, %vm2546_vm7  ;;  %v2973_v3 = vld [vmem:[%s4038_s18 + $0x60] sm:$0xff]  ;;  %v2970_v22 = vld [vmem:[%s4038_s18 + $0x48] sm:$0xff] }
0x158f   : > { %v2542_v23 = vsub.f32 1.0, %v2541_v19  ;;  %2953 = vmatmul.msk.f32.vlgmr.msrb.gmra.mxu1 %vm776_vm1, %v2314_v21  ;;  %v2474_v28 = vmul.f32 %v3879_v42, %v2473_v27  ;;  %v2944_v42 = vld [vmem:[%s4151_s0 + $0x30] sm:$0xff]  ;;  %2719 = vmatpush.msrb.mxu3 %v2973_v3  ;;  %v3078_v12 = vld [vmem:[%s4034_s14 + $0x1] ss:$0 sm:$0xff] }
0x1590   : > { %2496 = vmatpush.msra.mxu1 %v2476_v52  ;;  %2615 = vmatpush.msrb.mxu2 %v2944_v42  ;;  %v2971_v21 = vld [vmem:[%s4038_s18 + $0x50] sm:$0xff]  ;;  %v3080_v24 = vld [vmem:[%s4037_s17 + $0x1] ss:$0 sm:$0xff] }
0x1591   : > { %v2543_v26 = vmul.f32 %v3157_v16, %v2542_v23  ;;  %2720 = vmatpush.msrb.mxu3 %v2972_v6  ;;  %v2969_v23 = vld [vmem:[%s4038_s18 + $0x40] sm:$0xff] }
0x1592   : > { %2616 = vmatpush.msrb.mxu2 %v2943_v43  ;;  %2693 = vmatpush.msrb.mxu1 %v2967_v60  ;;  %v3081_v27 = vld [vmem:[%s4039_s19 + $0x1] ss:$0 sm:$0xff] }
0x1593   : > { %v2544_v32 = vadd.f32 %v3157_v16, %v2543_v26  ;;  %2721 = vmatpush.msrb.mxu3 %v2971_v21 }
0x1594   : > { %2617 = vmatpush.msrb.mxu2 %v2942_v44 }
0x1595   : > { %v2548_v30 = vsel %vm2547_vm9, %v3157_v16, %v2544_v32  ;;  %2722 = vmatpush.msrb.mxu3 %v2970_v22 }
0x1596   : > { %v2553_v31 = vsel %vm2550_vm10, %v2552_v29, %v2548_v30 }
0x1597   : > { %2959 = vmatmul.msk.f32.vlgmr.msra.gmra.mxu1 %vm776_vm1, %v2474_v28  ;;  %v2554_v33 = vmul.f32 %v3883_v45, %v2553_v31  ;;  %2723 = vmatpush.msrb.mxu3 %v2969_v23 }
0x1598   : > { %v2556_v34 = vpop.permute.xlu0 %2555 }
0x1599   : > { %2576 = vmatpush.msrb.mxu0 %v2556_v34 }
0x159a   : > { %2962 = vmatmul.msk.f32.vlgmr.msrb.gmra.mxu0 %vm776_vm1, %v2554_v33 }
0x1606   : > { %v2418_v37 = vpop.f32.mrf.mxu0 }
0x1607   : > { %2582 = vrot.lane.b32.xlu1 %v2418_v37, %s4135_s4  ;;  %s2875_s4 = sshll.u32 %s711_s29, 3 }
0x1608   : > { %s713_s8 = scalar_lea.vmem [#allocation2], %s2875_s4  ;;  %s3185_s4 = scalar_lea.hbm %s4155_s2, 16 }
0x1609   : > { %s2773_s9 = sshll.u32 %s713_s8, 4  ;;  %s2774_s9 = int_to_ptr.vmem [resolvable:$true] %s2773_s9 }
0x160c   : > { %v2338_v36 = vpop.f32.mrf.mxu1 }
0x1614   : > { %v2498_v38 = vpop.f32.mrf.mxu1 }
0x1615   : > { %2586 = vrot.lane.b32.xlu2 %v2498_v38, %s4134_s5  ;;  %s2983_s5 = sshll.u32 %s4154_s22, 3 }
0x1616   : > { %s2771_s23 = scalar_lea.hbm %s4155_s2, %s2983_s5 }
0x1617   : > { %v2578_v40 = vpop.f32.mrf.mxu0  ;;  %s2775_s1 = sshll.u32 %s2771_s23, 4  ;;  %s2776_s1 = int_to_ptr.hbm [resolvable:$true] %s2775_s1 }
0x1618   : > { %2590 = vrot.lane.b32.xlu0 %v2578_v40, %s4136_s28  ;;  %s3179_s0 = sshra.s32 %s2776_s1, 4  ;;  %s3180_s0 = int_to_ptr.hbm [resolvable:$true] %s3179_s0 }
0x1619   : > { %s3181_s24 = scalar_lea.hbm %s3180_s0, 8  ;;  %p3186_p0 = scmp.lt.s32.totalorder %s3180_s0, %s4155_s2 }
0x161a   : > { %p3182_p11 = scmp.ne.s32.totalorder %s3180_s0, %s3181_s24  ;;  %p3187_p1 = scmp.lt.s32.totalorder %s3185_s4, %s3181_s24 }
0x161c   : > { %p3183_p12 = pnand %p3182_p11, %p3397_p5  ;;  %p3188_p2 = por %p3187_p1, %p3186_p0 }
0x161e   : > { %p3184_p13 = pneg %p3183_p12 }
0x1620   : > { %p3189_p3 = pnand %p3188_p2, %p3184_p13 }
0x166f   : > { %v2587_v47 = vpop.permute.xlu2 %2586 }
0x1679   : > { %v2583_v45 = vpop.permute.xlu1 %2582 }
0x167a   : > { %v2593_v46 = vsel %vm776_vm1, %v2338_v36, %v2583_v45 }
0x167b   : > { %v2594_v49 = vsel %vm1106_vm4, %v2593_v46, %v2587_v47 }
0x168a   : > { %v2591_v48 = vpop.permute.xlu0 %2590 }
0x168b   : > { %v2595_v50 = vsel %vm1108_vm5, %v2594_v49, %v2591_v48  ;;  %v3082_v48 = vld [vmem:[%s4040_s20 + $0x1] ss:$0 sm:$0xff] }
0x168c   : > { %2963 = vmatmul.msk.f32.vlgmr.msrb.gmra.mxu2 %vm749_vm0, %v2595_v50  ;;  %v3083_v50 = vld [vmem:[%s4041_s21 + $0x1] ss:$0 sm:$0xff] }
0x170f   : > { %v2619_v51 = vpop.f32.mrf.mxu2 }
0x1710   : > { %v2620_v52 = vadd.f32 %v3077_v39, %v2619_v51 }
0x1712   : > { %v2622_v53 = vadd.f32 %v2620_v52, %v3843_v35  ;;  %v2966_v35 = vld [vmem:[%s4036_s16 + $0x30] sm:$0xff] }
0x1713   : > { %2694 = vmatpush.msrb.mxu1 %v2966_v35 }
0x1714   : > { %v2623_v54 = vsel %vm749_vm0, %v2622_v53, 0.0 }
0x1715   : > { %2624 = vadd.xlane.f32.xlu1 %v2623_v54  ;;  %2695 = vmatpush.msrb.mxu1 %v2965_v61 }
0x1717   : > { %2696 = vmatpush.msrb.mxu1 %v2964_v62 }
0x1788   : > { %v2625_v55 = vpop.xlane.xlu1 %2624 }
0x1789   : > { %v2626_v56 = vmul.f32 %v2625_v55, %v3543_v8 }
0x178b   : > { %v2627_v57 = vsub.f32 %v2622_v53, %v2626_v56 }
0x178d   : > { %v2628_v58 = vmul.f32 %v2627_v57, %v2627_v57 }
0x178f   : > { %v2629_v59 = vsel %vm749_vm0, %v2628_v58, 0.0 }
0x1790   : > { %2630 = vadd.xlane.f32.xlu2 %v2629_v59 }
0x1803   : > { %v2631_v1 = vpop.xlane.xlu2 %2630 }
0x1804   : > { %v2632_v2 = vmul.f32 %v2631_v1, %v3543_v8 }
0x1806   : > { %v2633_v5 = vadd.f32 1e-05, %v2632_v2 }
0x1808   : > { %3158 = vrsqrt.f32 %v2633_v5  ;;  %vm2640_vm4 = vweird.f32 %v2633_v5 }
0x180e   : > { %v3159_v7 = vpop.eup %3158 }
0x180f   : > { %v2635_v9 = vmul.f32 %v3159_v7, %v2633_v5  ;;  %vm2641_vm1 = vweird.f32 %v3159_v7 }
0x1810   : > { %vm2642_vm5 = vmor %vm2640_vm4, %vm2641_vm1 }
0x1811   : > { %v2636_v11 = vmul.f32 %v3159_v7, %v2635_v9 }
0x1813   : > { %v2637_v13 = vmul.f32 0.5, %v2636_v11 }
0x1815   : > { %v2638_v14 = vsub.f32 1.5, %v2637_v13 }
0x1817   : > { %v2639_v15 = vmul.f32 %v3159_v7, %v2638_v14 }
0x1819   : > { %v2643_v16 = vsel %vm2642_vm5, %v3159_v7, %v2639_v15 }
0x181a   : > { %v2644_v17 = vmul.f32 %v2643_v16, %v2627_v57 }
0x181c   : > { %v2648_v19 = vmul.f32 %v3078_v12, %v2644_v17 }
0x181e   : > { %v2652_v20 = vadd.f32 %v3079_v18, %v2648_v19 }
0x1820   : > { %2980 = vmatmul.msk.f32.vlgmr.msrb.gmra.mxu1 %vm749_vm0, %v2652_v20 }
0x189d   : > { %v2698_v25 = vpop.f32.mrf.mxu1 }
0x189e   : > { %v2699_v26 = vadd.f32 %v3080_v24, %v2698_v25 }
0x18a0   : > { %v2701_v10 = vmax.f32 %v2699_v26, 0.0 }
0x18a2   : > { %2981 = vmatmul.msk.f32.vlgmr.msrb.gmra.mxu3 %vm1690_vm3, %v2701_v10 }
0x1925   : > { %v2725_v32 = vpop.f32.mrf.mxu3 }
0x1926   : > { %v2726_v29 = vadd.f32 %v3081_v27, %v2725_v32 }
0x1928   : > { %v2728_v30 = vadd.f32 %v2726_v29, %v2652_v20 }
0x192a   : > { %v2729_v28 = vsel %vm749_vm0, %v2728_v30, 0.0 }
0x192b   : > { %2730 = vadd.xlane.f32.xlu0 %v2729_v28 }
0x199e   : > { %v2731_v31 = vpop.xlane.xlu0 %2730 }
0x199f   : > { %v2732_v33 = vmul.f32 %v2731_v31, %v3543_v8 }
0x19a1   : > { %v2733_v34 = vsub.f32 %v2728_v30, %v2732_v33 }
0x19a3   : > { %v2734_v37 = vmul.f32 %v2733_v34, %v2733_v34 }
0x19a5   : > { %v2735_v36 = vsel %vm749_vm0, %v2734_v37, 0.0 }
0x19a6   : > { %2736 = vadd.xlane.f32.xlu1 %v2735_v36 }
0x1a19   : > { %v2737_v38 = vpop.xlane.xlu1 %2736 }
0x1a1a   : > { %v2738_v40 = vmul.f32 %v2737_v38, %v3543_v8 }
0x1a1c   : > { %v2739_v41 = vadd.f32 1e-05, %v2738_v40 }
0x1a1e   : > { %3160 = vrsqrt.f32 %v2739_v41  ;;  %vm2746_vm11 = vweird.f32 %v2739_v41 }
0x1a24   : > { %v3161_v42 = vpop.eup %3160 }
0x1a25   : > { %v2741_v43 = vmul.f32 %v3161_v42, %v2739_v41  ;;  %vm2747_vm3 = vweird.f32 %v3161_v42 }
0x1a26   : > { %vm2748_vm12 = vmor %vm2746_vm11, %vm2747_vm3 }
0x1a27   : > { %v2742_v44 = vmul.f32 %v3161_v42, %v2741_v43 }
0x1a29   : > { %v2743_v45 = vmul.f32 0.5, %v2742_v44 }
0x1a2b   : > { %v2744_v46 = vsub.f32 1.5, %v2743_v45 }
0x1a2d   : > { %v2745_v47 = vmul.f32 %v3161_v42, %v2744_v46 }
0x1a2f   : > { %v2749_v8 = vsel %vm2748_vm12, %v3161_v42, %v2745_v47 }
0x1a30   : > { %v2750_v49 = vmul.f32 %v2749_v8, %v2733_v34 }
0x1a32   : > { %v2754_v39 = vmul.f32 %v3082_v48, %v2750_v49 }
0x1a34   : > { %v2758_v51 = vadd.f32 %v3083_v50, %v2754_v39 }
0x1a36   : > { %2759 = vst.msk [vmem:[%s713_s8] sm:$0xff] %vm749_vm0, %v2758_v51 }
0x1a37   : > { %3192 = shalt.err (!%p3189_p3)
}
0x1a38   : > { %2986 = dma.vmem_to_hbm [thread:$0]  (%p3397_p5), %s2774_s9, 128, %s2776_s1, %s2761_s3  }
0x1a39 PF: > { %s4157_s29 = sld [smem:[#allocation8_spill]] }
0x1a3a   : > { %s4158_s7 = sld [smem:[#allocation5_spill]] }
0x1a3f   : > { %p2992_p4 = scmp.ge.s32.totalorder %s4157_s29, 2 }
0x1a40   : > { %s2787_s25 = sand.u32 1, %s4158_s7  }
0x1a41   : > { %p2989_p7 = pnand %p2992_p4, %p3401_p6  ;;  %s2788_s23 = scalar_lea.sflag [#allocation3], %s2787_s25 }
0x1a43   : > { %p2990_p8 = pneg %p2989_p7 }
0x1a45   : > { %3210 = dma.done.wait (%p2990_p8), %s2788_s23, 128  }
0x1a46   : > { %3212 = vsyncadd (%p2990_p8), %s2788_s23, 4294967168  ;;  %s4160_s30 = sld [smem:[#allocation10_spill]] }
0x1a47   : > { %s4161_s3 = sld [smem:[#allocation6_spill]] }
0x1a48   : > { %s4162_s28 = sld [smem:[#allocation7_spill]] }
0x1a49   : > { %s4163_s29 = sld [smem:[#allocation11_spill]] }
0x1a4c   : > { %p32_p9 = scmp.ge.s32.totalorder %s4160_s30, 4  }
0x1a4e   :  { %34 = sbr.rel (!%p32_p9) target bundleno = 19 (0x13), region = 170 }
0x1a53   :  { %2794 = vsyncpa [#allocation3], 1 }
0x1a54   :  { %2796 = vsyncpa [#allocation3 + $0x1], 1 }

</bundles_post_ra>
